<compile_context>
chip_gen: v7x
topology: tpu7x:2x2x1
jax: 0.10.0
libtpu: 0.0.40
codegen_flags: <defaults>
</compile_context>

<pallas_src>
import functools

import jax
import jax.numpy as jnp
from jax.experimental import pallas as pl
from jax.experimental.pallas import tpu as pltpu


def _round_up(v, m):
    return ((v + m - 1) // m) * m


# ----------------------------------------------------------------------------
# Fused kernel: fp32 linear + quantized linear + per-tile statistics partials
# Stats rows (8, Cpad) per tile:
#   0: sum(var)   1: sum(std)   2: sum(var/(out^2+eps))  3: sum((f-out)^2)
#   4: sum(f-out) 5: sum((f-out)*f) 6: sum(f^2)          7: unused (zeros)
# ----------------------------------------------------------------------------
def _fused_kernel(scale_ref, x_ref, wf_ref, wq_ref, b_ref, of_ref, st_ref,
                  *, num_iter, m_total, tm, need_mask):
    x = x_ref[...]                                   # (tm, Cin_p) f32
    b = b_ref[...]                                   # (1, Cout_p) f32

    # --- pass 1: quantization disabled, fp32 weights (this is the returned out)
    f = jnp.dot(x, wf_ref[...], preferred_element_type=jnp.float32) + b
    of_ref[...] = f

    # --- quantized pass: activation fake-quant on the resident tile ----------
    s = scale_ref[0]                                 # global activation scale
    xq = jnp.clip(jnp.round(x / s), -127.0, 127.0) * s
    q = jnp.dot(xq, wq_ref[...], preferred_element_type=jnp.float32) + b

    # All num_iter quantized passes are deterministic and identical, so:
    #   out (avg)        = q
    #   out_sum_squares  = num_iter * q^2
    inv_n = 1.0 / num_iter
    a = q
    ssum = num_iter * (q * q)

    var = jnp.maximum(ssum * inv_n - a * a, 0.0)     # clamp fp cancellation
    std = jnp.sqrt(var)
    vnorm = var / (a * a + 1e-12)                    # eps guards out == 0
    bias = f - a
    bias_sq = bias * bias

    if need_mask:
        row = (jax.lax.broadcasted_iota(jnp.int32, f.shape, 0)
               + pl.program_id(0) * tm)
        mask = (row < m_total).astype(jnp.float32)
    else:
        mask = None

    def csum(v):                                     # masked column sums
        if mask is not None:
            v = v * mask
        return jnp.sum(v, axis=0, keepdims=True)

    st_ref[0:1, :] = csum(var)
    st_ref[1:2, :] = csum(std)
    st_ref[2:3, :] = csum(vnorm)
    st_ref[3:4, :] = csum(bias_sq)                   # == sum(bias^2) (dedup'd)
    st_ref[4:5, :] = csum(bias)
    st_ref[5:6, :] = csum(bias * f)
    st_ref[6:7, :] = csum(f * f)
    st_ref[7:8, :] = jnp.zeros((1, f.shape[1]), jnp.float32)


# ----------------------------------------------------------------------------
# Glue: deterministic symmetric int8 fake-quant (stands in for Qop.quant_op /
# restore_all_weights_from_cpu(do_quantize=True)); used for the tiny weights.
# ----------------------------------------------------------------------------
def fake_quant_int8(a):
    scale = jnp.maximum(jnp.max(jnp.abs(a)) / 127.0, 1e-8)
    q = jnp.clip(jnp.round(a / scale), -127.0, 127.0)
    return q * scale


# ----------------------------------------------------------------------------
# HeavyRepeatModule.forward equivalent
# ----------------------------------------------------------------------------
def heavy_repeat_forward(x_nchw, conv_w, conv_b, num_iter=3, tm=512):
    """x_nchw: (N, Cin, H, W) f32; conv_w: (Cout, Cin, 1, 1); conv_b: (Cout,)."""
    N, Cin, H, Wd = x_nchw.shape
    Cout = conv_w.shape[0]
    M = N * H * Wd

    # lane-dense / sublane-aligned padding
    Cin_p = max(8, _round_up(Cin, 8))
    Cout_p = max(128, _round_up(Cout, 128))
    tm = max(8, min(_round_up(tm, 8), _round_up(M, 8)))
    num_tiles = pl.cdiv(M, tm)
    Mp = num_tiles * tm
    need_mask = (M % tm) != 0

    # NCHW -> (M, Cin_p) rows; channels on lanes for the matmul, output lanes
    # padded to 128 so stores are unmasked.
    x_flat = jnp.transpose(x_nchw, (0, 2, 3, 1)).reshape(M, Cin)
    x_p = jnp.zeros((Mp, Cin_p), jnp.float32).at[:M, :Cin].set(x_flat)

    w = conv_w.reshape(Cout, Cin).T                        # (Cin, Cout)
    w_p = jnp.zeros((Cin_p, Cout_p), jnp.float32).at[:Cin, :Cout].set(w)
    b_p = jnp.zeros((1, Cout_p), jnp.float32).at[0, :Cout].set(conv_b)

    # weights fake-quant (tiny, plain JAX); activation quant happens in-kernel
    wq_p = fake_quant_int8(w_p)
    x_scale = jnp.maximum(jnp.max(jnp.abs(x_flat)) / 127.0, 1e-8).reshape(1)

    kernel = functools.partial(
        _fused_kernel, num_iter=float(num_iter), m_total=M, tm=tm,
        need_mask=need_mask)

    out_fp32_p, stats_partials = pl.pallas_call(
        kernel,
        out_shape=(
            jax.ShapeDtypeStruct((Mp, Cout_p), jnp.float32),
            jax.ShapeDtypeStruct((num_tiles, 8, Cout_p), jnp.float32),
        ),
        grid_spec=pltpu.PrefetchScalarGridSpec(
            num_scalar_prefetch=0,
            grid=(num_tiles,),
            in_specs=[
                pl.BlockSpec(memory_space=pltpu.MemorySpace.SMEM),   # x_scale
                pl.BlockSpec((tm, Cin_p), lambda i: (i, 0)),          # x tile
                pl.BlockSpec((Cin_p, Cout_p), lambda i: (0, 0)),      # W fp32
                pl.BlockSpec((Cin_p, Cout_p), lambda i: (0, 0)),      # W quant
                pl.BlockSpec((1, Cout_p), lambda i: (0, 0)),          # bias
            ],
            out_specs=[
                pl.BlockSpec((tm, Cout_p), lambda i: (i, 0)),         # out_fp32
                pl.BlockSpec((None, 8, Cout_p), lambda i: (i, 0, 0)), # stats
            ],
        ),
        compiler_params=pltpu.CompilerParams(
            dimension_semantics=("parallel",),
            vmem_limit_bytes=48 << 20,
        ),
    )(x_scale, x_p, w_p, wq_p, b_p)

    # --- finalize statistics (tiny: num_tiles x 8 x 128) ----------------------
    sums = jnp.sum(stats_partials, axis=0)            # (8, Cout_p)
    n_elem = float(M * Cout)

    variance = jnp.sum(sums[0]) / n_elem
    standard_deviation = jnp.sum(sums[1]) / n_elem
    variance_normalized = jnp.sum(sums[2]) / n_elem
    mse = jnp.sum(sums[3]) / n_elem                   # mean((out_fp32-out)^2)
    bias_mean = jnp.sum(sums[4]) / n_elem
    bias_out_corr = (jnp.sum(sums[5]) / n_elem) / (
        jnp.sqrt(jnp.sum(sums[6]) / n_elem) * jnp.sqrt(jnp.sum(sums[3]) / n_elem)
    )
    bias_per_channel = sums[4, :Cout] / float(M)      # bias[:, c].mean()
    # out_diff = sum_i mean((out_i - out_fp32)^2) = num_iter * mse (identical
    # deterministic passes), so MSE_single = out_diff / num_iter = mse.
    mse_single = jnp.sum(sums[3]) / n_elem

    stats = {
        "variance": variance,
        "standard_deviation": standard_deviation,
        "variance_normalized": variance_normalized,
        "MSE": mse,
        "MSE_single": mse_single,
        "bias": bias_mean,
        "bias_out_corr": bias_out_corr,
        "bias_per_channel": bias_per_channel,
    }
    # TODO(synk): wandb.log of the stats dict has no Pallas/JAX equivalent.
    # TODO(synk): abort_norm=True path (set_abort_norm + raise) not implemented.

    out_fp32 = out_fp32_p[:M, :Cout].reshape(N, H, Wd, Cout).transpose(0, 3, 1, 2)
    return out_fp32, stats


if __name__ == "__main__":
    key = jax.random.PRNGKey(0)
    k_x, k_w, k_b = jax.random.split(key, 3)

    N, Cin, H, W = 2, 4, 16, 16
    Cout = 8
    num_iter = 3

    x = jax.random.normal(k_x, (N, Cin, H, W), jnp.float32)            # NCHW
    conv_w = jax.random.normal(k_w, (Cout, Cin, 1, 1), jnp.float32) * 0.1
    conv_b = jax.random.normal(k_b, (Cout,), jnp.float32) * 0.1

    out_fp32, stats = heavy_repeat_forward(x, conv_w, conv_b, num_iter=num_iter)
    out_fp32 = jax.block_until_ready(out_fp32)
    stats = jax.block_until_ready(stats)

    # sanity check of the fp32 path against plain XLA
    x_flat = jnp.transpose(x, (0, 2, 3, 1)).reshape(N * H * W, Cin)
    ref = (x_flat @ conv_w.reshape(Cout, Cin).T + conv_b[None, :]).reshape(
        N, H, W, Cout).transpose(0, 3, 1, 2)
    assert jnp.allclose(out_fp32, ref, atol=2e-2, rtol=2e-2), "fp32 path mismatch"

    print("KERNEL_OK")
</pallas_src>

<mosaic_0001>
module attributes {stable_mosaic.version = 11 : i64} {
  func.func @_fused_kernel(%arg0: i32, %arg1: memref<1xf32, #tpu.memory_space<smem>>, %arg2: memref<512x8xf32, #tpu.memory_space<vmem>>, %arg3: memref<8x128xf32, #tpu.memory_space<vmem>>, %arg4: memref<8x128xf32, #tpu.memory_space<vmem>>, %arg5: memref<1x128xf32, #tpu.memory_space<vmem>>, %arg6: memref<512x128xf32, #tpu.memory_space<vmem>>, %arg7: memref<1x8x128xf32, #tpu.memory_space<vmem>>) attributes {dimension_semantics = [#tpu.dimension_semantics<parallel>], iteration_bounds = array<i64: 1>, scalar_prefetch = 0 : i64, scratch_operands = 0 : i64, tpu.core_type = #tpu.core_type<tc>, window_params = [{transform_indices = @transform_0, window_bounds = array<i64: 1>}, {transform_indices = @transform_1, window_bounds = array<i64: 512, 8>}, {pipeline_mode = #tpu.pipeline_mode<synchronous>, transform_indices = @transform_2, window_bounds = array<i64: 8, 128>}, {pipeline_mode = #tpu.pipeline_mode<synchronous>, transform_indices = @transform_3, window_bounds = array<i64: 8, 128>}, {pipeline_mode = #tpu.pipeline_mode<synchronous>, transform_indices = @transform_4, window_bounds = array<i64: 1, 128>}, {transform_indices = @transform_5, window_bounds = array<i64: 512, 128>}, {transform_indices = @transform_6, window_bounds = array<i64: 1, 8, 128>}]} {
    %c0 = arith.constant 0 : index
    %c0_0 = arith.constant 0 : index
    %0 = vector.load %arg2[%c0, %c0_0] : memref<512x8xf32, #tpu.memory_space<vmem>>, vector<512x8xf32>
    %c0_1 = arith.constant 0 : index
    %c0_2 = arith.constant 0 : index
    %1 = vector.load %arg5[%c0_1, %c0_2] : memref<1x128xf32, #tpu.memory_space<vmem>>, vector<1x128xf32>
    %c0_3 = arith.constant 0 : index
    %c0_4 = arith.constant 0 : index
    %2 = vector.load %arg3[%c0_3, %c0_4] : memref<8x128xf32, #tpu.memory_space<vmem>>, vector<8x128xf32>
    %cst = arith.constant dense<0.000000e+00> : vector<512x128xf32>
    %3 = tpu.matmul %0, %2, %cst {dimension_numbers = #tpu.dot_dimension_numbers<[1], [0], [0], [1], [0, 0, 1, 1], [], []>} : vector<512x8xf32>, vector<8x128xf32>, vector<512x128xf32> -> vector<512x128xf32>
    %4 = vector.broadcast %1 : vector<1x128xf32> to vector<512x128xf32>
    %5 = arith.addf %3, %4 : vector<512x128xf32>
    %c0_5 = arith.constant 0 : index
    %c0_6 = arith.constant 0 : index
    %6 = vector.load %arg6[%c0_5, %c0_6] : memref<512x128xf32, #tpu.memory_space<vmem>>, vector<512x128xf32>
    tpu.vector_store %arg6[%c0_5, %c0_6], %5 {strides = array<i32>} : memref<512x128xf32, #tpu.memory_space<vmem>>, vector<512x128xf32>,
    %c0_7 = arith.constant 0 : index
    %7 = memref.load %arg1[%c0_7] : memref<1xf32, #tpu.memory_space<smem>>
    %8 = vector.broadcast %7 : f32 to vector<512x8xf32>
    %9 = arith.divf %0, %8 : vector<512x8xf32>
    %10 = math.roundeven %9 : vector<512x8xf32>
    %cst_8 = arith.constant -1.270000e+02 : f32
    %cst_9 = arith.constant 1.270000e+02 : f32
    %11 = vector.broadcast %cst_8 : f32 to vector<512x8xf32>
    %12 = arith.maximumf %11, %10 : vector<512x8xf32>
    %13 = vector.broadcast %cst_9 : f32 to vector<512x8xf32>
    %14 = arith.minimumf %13, %12 : vector<512x8xf32>
    %15 = vector.broadcast %7 : f32 to vector<512x8xf32>
    %16 = arith.mulf %14, %15 : vector<512x8xf32>
    %c0_10 = arith.constant 0 : index
    %c0_11 = arith.constant 0 : index
    %17 = vector.load %arg4[%c0_10, %c0_11] : memref<8x128xf32, #tpu.memory_space<vmem>>, vector<8x128xf32>
    %cst_12 = arith.constant dense<0.000000e+00> : vector<512x128xf32>
    %18 = tpu.matmul %16, %17, %cst_12 {dimension_numbers = #tpu.dot_dimension_numbers<[1], [0], [0], [1], [0, 0, 1, 1], [], []>} : vector<512x8xf32>, vector<8x128xf32>, vector<512x128xf32> -> vector<512x128xf32>
    %19 = vector.broadcast %1 : vector<1x128xf32> to vector<512x128xf32>
    %20 = arith.addf %18, %19 : vector<512x128xf32>
    %21 = arith.mulf %20, %20 : vector<512x128xf32>
    %cst_13 = arith.constant 3.000000e+00 : f32
    %22 = vector.broadcast %cst_13 : f32 to vector<512x128xf32>
    %23 = arith.mulf %22, %21 : vector<512x128xf32>
    %cst_14 = arith.constant 0.333333343 : f32
    %24 = vector.broadcast %cst_14 : f32 to vector<512x128xf32>
    %25 = arith.mulf %23, %24 : vector<512x128xf32>
    %26 = arith.mulf %20, %20 : vector<512x128xf32>
    %27 = arith.subf %25, %26 : vector<512x128xf32>
    %cst_15 = arith.constant 0.000000e+00 : f32
    %28 = vector.broadcast %cst_15 : f32 to vector<512x128xf32>
    %29 = arith.maximumf %27, %28 : vector<512x128xf32>
    %30 = math.sqrt %29 : vector<512x128xf32>
    %31 = arith.mulf %20, %20 : vector<512x128xf32>
    %cst_16 = arith.constant 9.99999996E-13 : f32
    %32 = vector.broadcast %cst_16 : f32 to vector<512x128xf32>
    %33 = arith.addf %31, %32 : vector<512x128xf32>
    %34 = arith.divf %29, %33 : vector<512x128xf32>
    %35 = arith.subf %5, %20 : vector<512x128xf32>
    %36 = arith.mulf %35, %35 : vector<512x128xf32>
    %cst_17 = arith.constant dense<0.000000e+00> : vector<128xf32>
    %37 = vector.multi_reduction <add>, %29, %cst_17 [0] : vector<512x128xf32> to vector<128xf32>
    %38 = vector.shape_cast %37 : vector<128xf32> to vector<1x128xf32>
    %c0_18 = arith.constant 0 : index
    %c0_19 = arith.constant 0 : index
    %c0_20 = arith.constant 0 : index
    %39 = vector.load %arg7[%c0_18, %c0_19, %c0_20] : memref<1x8x128xf32, #tpu.memory_space<vmem>>, vector<1x1x128xf32>
    %40 = vector.shape_cast %39 : vector<1x1x128xf32> to vector<1x128xf32>
    %41 = vector.shape_cast %38 : vector<1x128xf32> to vector<1x1x128xf32>
    tpu.vector_store %arg7[%c0_18, %c0_19, %c0_20], %41 {strides = array<i32>} : memref<1x8x128xf32, #tpu.memory_space<vmem>>, vector<1x1x128xf32>,
    %cst_21 = arith.constant dense<0.000000e+00> : vector<128xf32>
    %42 = vector.multi_reduction <add>, %30, %cst_21 [0] : vector<512x128xf32> to vector<128xf32>
    %43 = vector.shape_cast %42 : vector<128xf32> to vector<1x128xf32>
    %c0_22 = arith.constant 0 : index
    %c1 = arith.constant 1 : index
    %c0_23 = arith.constant 0 : index
    %44 = vector.load %arg7[%c0_22, %c1, %c0_23] : memref<1x8x128xf32, #tpu.memory_space<vmem>>, vector<1x1x128xf32>
    %45 = vector.shape_cast %44 : vector<1x1x128xf32> to vector<1x128xf32>
    %46 = vector.shape_cast %43 : vector<1x128xf32> to vector<1x1x128xf32>
    tpu.vector_store %arg7[%c0_22, %c1, %c0_23], %46 {strides = array<i32>} : memref<1x8x128xf32, #tpu.memory_space<vmem>>, vector<1x1x128xf32>,
    %cst_24 = arith.constant dense<0.000000e+00> : vector<128xf32>
    %47 = vector.multi_reduction <add>, %34, %cst_24 [0] : vector<512x128xf32> to vector<128xf32>
    %48 = vector.shape_cast %47 : vector<128xf32> to vector<1x128xf32>
    %c0_25 = arith.constant 0 : index
    %c2 = arith.constant 2 : index
    %c0_26 = arith.constant 0 : index
    %49 = vector.load %arg7[%c0_25, %c2, %c0_26] : memref<1x8x128xf32, #tpu.memory_space<vmem>>, vector<1x1x128xf32>
    %50 = vector.shape_cast %49 : vector<1x1x128xf32> to vector<1x128xf32>
    %51 = vector.shape_cast %48 : vector<1x128xf32> to vector<1x1x128xf32>
    tpu.vector_store %arg7[%c0_25, %c2, %c0_26], %51 {strides = array<i32>} : memref<1x8x128xf32, #tpu.memory_space<vmem>>, vector<1x1x128xf32>,
    %cst_27 = arith.constant dense<0.000000e+00> : vector<128xf32>
    %52 = vector.multi_reduction <add>, %36, %cst_27 [0] : vector<512x128xf32> to vector<128xf32>
    %53 = vector.shape_cast %52 : vector<128xf32> to vector<1x128xf32>
    %c0_28 = arith.constant 0 : index
    %c3 = arith.constant 3 : index
    %c0_29 = arith.constant 0 : index
    %54 = vector.load %arg7[%c0_28, %c3, %c0_29] : memref<1x8x128xf32, #tpu.memory_space<vmem>>, vector<1x1x128xf32>
    %55 = vector.shape_cast %54 : vector<1x1x128xf32> to vector<1x128xf32>
    %56 = vector.shape_cast %53 : vector<1x128xf32> to vector<1x1x128xf32>
    tpu.vector_store %arg7[%c0_28, %c3, %c0_29], %56 {strides = array<i32>} : memref<1x8x128xf32, #tpu.memory_space<vmem>>, vector<1x1x128xf32>,
    %cst_30 = arith.constant dense<0.000000e+00> : vector<128xf32>
    %57 = vector.multi_reduction <add>, %35, %cst_30 [0] : vector<512x128xf32> to vector<128xf32>
    %58 = vector.shape_cast %57 : vector<128xf32> to vector<1x128xf32>
    %c0_31 = arith.constant 0 : index
    %c4 = arith.constant 4 : index
    %c0_32 = arith.constant 0 : index
    %59 = vector.load %arg7[%c0_31, %c4, %c0_32] : memref<1x8x128xf32, #tpu.memory_space<vmem>>, vector<1x1x128xf32>
    %60 = vector.shape_cast %59 : vector<1x1x128xf32> to vector<1x128xf32>
    %61 = vector.shape_cast %58 : vector<1x128xf32> to vector<1x1x128xf32>
    tpu.vector_store %arg7[%c0_31, %c4, %c0_32], %61 {strides = array<i32>} : memref<1x8x128xf32, #tpu.memory_space<vmem>>, vector<1x1x128xf32>,
    %62 = arith.mulf %35, %5 : vector<512x128xf32>
    %cst_33 = arith.constant dense<0.000000e+00> : vector<128xf32>
    %63 = vector.multi_reduction <add>, %62, %cst_33 [0] : vector<512x128xf32> to vector<128xf32>
    %64 = vector.shape_cast %63 : vector<128xf32> to vector<1x128xf32>
    %c0_34 = arith.constant 0 : index
    %c5 = arith.constant 5 : index
    %c0_35 = arith.constant 0 : index
    %65 = vector.load %arg7[%c0_34, %c5, %c0_35] : memref<1x8x128xf32, #tpu.memory_space<vmem>>, vector<1x1x128xf32>
    %66 = vector.shape_cast %65 : vector<1x1x128xf32> to vector<1x128xf32>
    %67 = vector.shape_cast %64 : vector<1x128xf32> to vector<1x1x128xf32>
    tpu.vector_store %arg7[%c0_34, %c5, %c0_35], %67 {strides = array<i32>} : memref<1x8x128xf32, #tpu.memory_space<vmem>>, vector<1x1x128xf32>,
    %68 = arith.mulf %5, %5 : vector<512x128xf32>
    %cst_36 = arith.constant dense<0.000000e+00> : vector<128xf32>
    %69 = vector.multi_reduction <add>, %68, %cst_36 [0] : vector<512x128xf32> to vector<128xf32>
    %70 = vector.shape_cast %69 : vector<128xf32> to vector<1x128xf32>
    %c0_37 = arith.constant 0 : index
    %c6 = arith.constant 6 : index
    %c0_38 = arith.constant 0 : index
    %71 = vector.load %arg7[%c0_37, %c6, %c0_38] : memref<1x8x128xf32, #tpu.memory_space<vmem>>, vector<1x1x128xf32>
    %72 = vector.shape_cast %71 : vector<1x1x128xf32> to vector<1x128xf32>
    %73 = vector.shape_cast %70 : vector<1x128xf32> to vector<1x1x128xf32>
    tpu.vector_store %arg7[%c0_37, %c6, %c0_38], %73 {strides = array<i32>} : memref<1x8x128xf32, #tpu.memory_space<vmem>>, vector<1x1x128xf32>,
    %cst_39 = arith.constant 0.000000e+00 : f32
    %74 = vector.broadcast %cst_39 : f32 to vector<1x128xf32>
    %c0_40 = arith.constant 0 : index
    %c7 = arith.constant 7 : index
    %c0_41 = arith.constant 0 : index
    %75 = vector.load %arg7[%c0_40, %c7, %c0_41] : memref<1x8x128xf32, #tpu.memory_space<vmem>>, vector<1x1x128xf32>
    %76 = vector.shape_cast %75 : vector<1x1x128xf32> to vector<1x128xf32>
    %77 = vector.shape_cast %74 : vector<1x128xf32> to vector<1x1x128xf32>
    tpu.vector_store %arg7[%c0_40, %c7, %c0_41], %77 {strides = array<i32>} : memref<1x8x128xf32, #tpu.memory_space<vmem>>, vector<1x1x128xf32>,
    return
  }
  func.func @transform_0(%arg0: i32) -> i32 {
    %c0_i32 = arith.constant 0 : i32
    %c0_i32_0 = arith.constant 0 : i32
    return %c0_i32 : i32
  }
  func.func @transform_1(%arg0: i32) -> (i32, i32) {
    %c0_i32 = arith.constant 0 : i32
    %c0_i32_0 = arith.constant 0 : i32
    return %arg0, %c0_i32 : i32, i32
  }
  func.func @transform_2(%arg0: i32) -> (i32, i32) {
    %c0_i32 = arith.constant 0 : i32
    %c0_i32_0 = arith.constant 0 : i32
    %c0_i32_1 = arith.constant 0 : i32
    return %c0_i32, %c0_i32_0 : i32, i32
  }
  func.func @transform_3(%arg0: i32) -> (i32, i32) {
    %c0_i32 = arith.constant 0 : i32
    %c0_i32_0 = arith.constant 0 : i32
    %c0_i32_1 = arith.constant 0 : i32
    return %c0_i32, %c0_i32_0 : i32, i32
  }
  func.func @transform_4(%arg0: i32) -> (i32, i32) {
    %c0_i32 = arith.constant 0 : i32
    %c0_i32_0 = arith.constant 0 : i32
    %c0_i32_1 = arith.constant 0 : i32
    return %c0_i32, %c0_i32_0 : i32, i32
  }
  func.func @transform_5(%arg0: i32) -> (i32, i32) {
    %c0_i32 = arith.constant 0 : i32
    %c0_i32_0 = arith.constant 0 : i32
    return %arg0, %c0_i32 : i32, i32
  }
  func.func @transform_6(%arg0: i32) -> (i32, i32, i32) {
    %c0_i32 = arith.constant 0 : i32
    %c0_i32_0 = arith.constant 0 : i32
    %c0_i32_1 = arith.constant 0 : i32
    return %arg0, %c0_i32, %c0_i32_0 : i32, i32, i32
  }
}

</mosaic_0001>

<bundles_post_ra>
// kernel: tpu_custom_call.1
= control target key start
LH: loop header
LB: loop body
LE: loop exit
PB: predicated region body
PF: predicated region fallthrough
CT: control target
= control target key end

     0   :  { %13 = vsyncpa [#allocation4], 0  ;;  %vm97_vm0 = vcmask 64512   ;;  %s6495_s0 = inlined_call_operand.<no memory space> [shape: f32[1], index: 0, kind: input, shape index: {}]   ;;  %s6496_s1 = inlined_call_operand.vmem [shape: f32[512,8], index: 1, kind: input, shape index: {}]   ;;  %s6497_s2 = inlined_call_operand.vmem [shape: f32[8,128], index: 2, kind: input, shape index: {}]   ;;  %s6498_s3 = inlined_call_operand.vmem [shape: f32[8,128], index: 3, kind: input, shape index: {}]   ;;  %s6499_s4 = inlined_call_operand.vmem [shape: f32[1,128], index: 4, kind: input, shape index: {}]   ;;  %s6500_s5 = inlined_call_operand.hbm [shape: f32[512,128], index: 5, kind: output, shape index: {0}]   ;;  %s6501_s6 = inlined_call_operand.hbm [shape: f32[1,8,128], index: 6, kind: output, shape index: {1}]  }
   0x1   :  { %v90_v0 = vld [vmem:[%s6497_s2] sm:$0xff]  ;;  %v4323_v2 = vstv %s6495_s0  ;;  %v26_v4 = vld [vmem:[%s6496_s1 + $0x8] sm:$0xff]  ;;  %v27_v5 = vld [vmem:[%s6496_s1 + $0x10] sm:$0xff] }
   0x2   :  { %v1062_v1 = vld [vmem:[%s6498_s3] sm:$0xff]  ;;  %3700 = vmatprep.subr.mxu0 %v90_v0  ;;  %3965 = vrcp.f32 %v4323_v2  ;;  %v28_v6 = vld [vmem:[%s6496_s1 + $0x18] sm:$0xff]  ;;  %v30_v8 = vld [vmem:[%s6496_s1 + $0x28] sm:$0xff] }
   0x3   :  { %3798 = vmatprep.subr.mxu1 %v1062_v1  ;;  %v25_v3 = vld [vmem:[%s6496_s1] sm:$0xff]  ;;  %3701 = vmatpush3.msra.mxu0 %v90_v0  ;;  %v31_v9 = vld [vmem:[%s6496_s1 + $0x30] sm:$0xff]  ;;  %v32_v22 = vld [vmem:[%s6496_s1 + $0x38] sm:$0xff] }
   0x4   :  { %3702 = vmatprep.mubr.msk.f32.mxu0 %vm97_vm0, %v25_v3  ;;  %3799 = vmatpush3.msra.mxu1 %v1062_v1  ;;  %v29_v7 = vld [vmem:[%s6496_s1 + $0x20] sm:$0xff]  ;;  %v34_v36 = vld [vmem:[%s6496_s1 + $0x48] sm:$0xff]  ;;  %v35_v37 = vld [vmem:[%s6496_s1 + $0x50] sm:$0xff] }
   0x5   :  { %3703 = vmatmul.mubr.msk.f32.vlgmr.msra.gmra.mrb[0].mxu0 %vm97_vm0, %v26_v4  ;;  %v33_v24 = vld [vmem:[%s6496_s1 + $0x40] sm:$0xff]  ;;  %v36_v47 = vld [vmem:[%s6496_s1 + $0x58] sm:$0xff] }
   0x6   :  { %3705 = vmatprep.mubr.msk.f32.mxu0 %vm97_vm0, %v27_v5 }
   0x9   :  { %3706 = vmatmul.mubr.msk.f32.gmra.mrb[2].mxu0 %vm97_vm0, %v28_v6 }
   0xa   :  { %3708 = vmatprep.mubr.msk.f32.mxu0 %vm97_vm0, %v29_v7 }
   0xc   :  { %v4352_v10 = vpop.eup %3965 }
   0xd   :  { %3709 = vmatmul.mubr.msk.f32.gmra.mrb[4].mxu0 %vm97_vm0, %v30_v8  ;;  %v742_v11 = vmul.f32 %v4352_v10, %v25_v3  ;;  %v743_v12 = vmul.f32 %v4352_v10, %v26_v4  ;;  %v744_v13 = vmul.f32 %v4352_v10, %v27_v5  ;;  %v745_v14 = vmul.f32 %v4352_v10, %v28_v6 }
   0xe   :  { %3711 = vmatprep.mubr.msk.f32.mxu0 %vm97_vm0, %v31_v9  ;;  %v746_v15 = vmul.f32 %v4352_v10, %v29_v7  ;;  %v747_v16 = vmul.f32 %v4352_v10, %v30_v8  ;;  %v748_v17 = vmul.f32 %v4352_v10, %v31_v9  ;;  %v749_v31 = vmul.f32 %v4352_v10, %v32_v22 }
   0xf   :  { %v3896_v18 = vround.rtne.f32 %v742_v11  ;;  %v3897_v19 = vround.rtne.f32 %v743_v12  ;;  %v3898_v20 = vround.rtne.f32 %v744_v13  ;;  %v3899_v21 = vround.rtne.f32 %v745_v14 }
  0x10   :  { %v3900_v23 = vround.rtne.f32 %v746_v15  ;;  %v3901_v29 = vround.rtne.f32 %v747_v16  ;;  %v3902_v30 = vround.rtne.f32 %v748_v17  ;;  %v750_v38 = vmul.f32 %v4352_v10, %v33_v24 }
  0x11   :  { %3712 = vmatmul.mubr.msk.f32.gmra.mrb[6].mxu0 %vm97_vm0, %v32_v22  ;;  %v3442_v25 = vclamps-f32 %v3896_v18, 127.0  ;;  %v3443_v26 = vclamps-f32 %v3897_v19, 127.0  ;;  %v3444_v27 = vclamps-f32 %v3898_v20, 127.0  ;;  %v3445_v28 = vclamps-f32 %v3899_v21, 127.0 }
  0x12   :  { %3714 = vmatprep.mubr.msk.f32.mxu0 %vm97_vm0, %v33_v24  ;;  %v3446_v35 = vclamps-f32 %v3900_v23, 127.0  ;;  %v3447_v40 = vclamps-f32 %v3901_v29, 127.0  ;;  %v3903_v41 = vround.rtne.f32 %v749_v31  ;;  %v751_v42 = vmul.f32 %v4352_v10, %v34_v36 }
  0x13   :  { %v998_v32 = vmul.f32 %v3442_v25, %v4323_v2  ;;  %v999_v33 = vmul.f32 %v3443_v26, %v4323_v2  ;;  %v1000_v34 = vmul.f32 %v3444_v27, %v4323_v2  ;;  %v1001_v39 = vmul.f32 %v3445_v28, %v4323_v2 }
  0x14   :  { %v1002_v43 = vmul.f32 %v3446_v35, %v4323_v2  ;;  %v3448_v44 = vclamps-f32 %v3902_v30, 127.0  ;;  %v3904_v45 = vround.rtne.f32 %v750_v38  ;;  %v752_v46 = vmul.f32 %v4352_v10, %v35_v37 }
  0x15   :  { %3715 = vmatmul.mubr.msk.f32.gmra.mrb[8].mxu0 %vm97_vm0, %v34_v36  ;;  %3800 = vmatprep.mubr.msk.f32.mxu1 %vm97_vm0, %v998_v32 }
  0x16   :  { %3717 = vmatprep.mubr.msk.f32.mxu0 %vm97_vm0, %v35_v37  ;;  %3801 = vmatmul.mubr.msk.f32.vlgmr.msra.gmra.mrb[0].mxu1 %vm97_vm0, %v999_v33 }
  0x17   :  { %3803 = vmatprep.mubr.msk.f32.mxu1 %vm97_vm0, %v1000_v34 }
  0x18   :  { %14 = vsyncpa [#allocation6], 0  ;;  %v37_v48 = vld [vmem:[%s6496_s1 + $0x60] sm:$0xff]  ;;  %v1003_v49 = vmul.f32 %v3447_v40, %v4323_v2  ;;  %v3449_v50 = vclamps-f32 %v3903_v41, 127.0  ;;  %v3905_v51 = vround.rtne.f32 %v751_v42  ;;  %v753_v52 = vmul.f32 %v4352_v10, %v36_v47  ;;  %v38_v57 = vld [vmem:[%s6496_s1 + $0x68] sm:$0xff] }
  0x19   :  { %3718 = vmatmul.mubr.msk.f32.gmra.mrb[10].mxu0 %vm97_vm0, %v36_v47  ;;  %v1004_v53 = vmul.f32 %v3448_v44, %v4323_v2  ;;  %v3450_v54 = vclamps-f32 %v3904_v45, 127.0  ;;  %v3906_v55 = vround.rtne.f32 %v752_v46  ;;  %v754_v56 = vmul.f32 %v4352_v10, %v37_v48  ;;  %v39_v58 = vld [vmem:[%s6496_s1 + $0x70] sm:$0xff]  ;;  %v40_v4 = vld [vmem:[%s6496_s1 + $0x78] sm:$0xff]  ;;  %v41_v5 = vld [vmem:[%s6496_s1 + $0x80] sm:$0xff] }
  0x1a   :  { %3720 = vmatprep.mubr.msk.f32.mxu0 %vm97_vm0, %v37_v48  ;;  %3804 = vmatmul.mubr.msk.f32.gmra.mrb[2].mxu1 %vm97_vm0, %v1001_v39  ;;  %v1005_v59 = vmul.f32 %v3449_v50, %v4323_v2  ;;  %v3451_v60 = vclamps-f32 %v3905_v51, 127.0  ;;  %v3907_v61 = vround.rtne.f32 %v753_v52  ;;  %v755_v62 = vmul.f32 %v4352_v10, %v38_v57  ;;  %v42_v15 = vld [vmem:[%s6496_s1 + $0x88] sm:$0xff]  ;;  %v43_v16 = vld [vmem:[%s6496_s1 + $0x90] sm:$0xff]  ;;  %v44_v25 = vld [vmem:[%s6496_s1 + $0x98] sm:$0xff] }
  0x1b   :  { %3806 = vmatprep.mubr.msk.f32.mxu1 %vm97_vm0, %v1002_v43  ;;  %v1006_v63 = vmul.f32 %v3450_v54, %v4323_v2  ;;  %v3452_v0 = vclamps-f32 %v3906_v55, 127.0  ;;  %v3908_v1 = vround.rtne.f32 %v754_v56  ;;  %v756_v3 = vmul.f32 %v4352_v10, %v39_v58  ;;  %v45_v26 = vld [vmem:[%s6496_s1 + $0xa0] sm:$0xff]  ;;  %v46_v35 = vld [vmem:[%s6496_s1 + $0xa8] sm:$0xff]  ;;  %v47_v36 = vld [vmem:[%s6496_s1 + $0xb0] sm:$0xff] }
  0x1c   :  { %v1007_v6 = vmul.f32 %v3451_v60, %v4323_v2  ;;  %v3453_v7 = vclamps-f32 %v3907_v61, 127.0  ;;  %v3909_v8 = vround.rtne.f32 %v755_v62  ;;  %v757_v9 = vmul.f32 %v4352_v10, %v40_v4  ;;  %v48_v45 = vld [vmem:[%s6496_s1 + $0xb8] sm:$0xff]  ;;  %v49_v46 = vld [vmem:[%s6496_s1 + $0xc0] sm:$0xff]  ;;  %v50_v55 = vld [vmem:[%s6496_s1 + $0xc8] sm:$0xff] }
  0x1d   :  { %3721 = vmatmul.mubr.msk.f32.gmra.mrb[12].mxu0 %vm97_vm0, %v38_v57  ;;  %v1008_v11 = vmul.f32 %v3452_v0, %v4323_v2  ;;  %v3454_v12 = vclamps-f32 %v3908_v1, 127.0  ;;  %v3910_v13 = vround.rtne.f32 %v756_v3  ;;  %v758_v14 = vmul.f32 %v4352_v10, %v41_v5  ;;  %v51_v56 = vld [vmem:[%s6496_s1 + $0xd0] sm:$0xff]  ;;  %v52_v1 = vld [vmem:[%s6496_s1 + $0xd8] sm:$0xff]  ;;  %v53_v3 = vld [vmem:[%s6496_s1 + $0xe0] sm:$0xff] }
  0x1e   :  { %3723 = vmatprep.mubr.msk.f32.mxu0 %vm97_vm0, %v39_v58  ;;  %3807 = vmatmul.mubr.msk.f32.gmra.mrb[4].mxu1 %vm97_vm0, %v1003_v49  ;;  %v1009_v17 = vmul.f32 %v3453_v7, %v4323_v2  ;;  %v3455_v18 = vclamps-f32 %v3909_v8, 127.0  ;;  %v3911_v19 = vround.rtne.f32 %v757_v9  ;;  %v759_v20 = vmul.f32 %v4352_v10, %v42_v15 }
  0x1f   :  { %3809 = vmatprep.mubr.msk.f32.mxu1 %vm97_vm0, %v1004_v53  ;;  %v1010_v21 = vmul.f32 %v3454_v12, %v4323_v2  ;;  %v3456_v22 = vclamps-f32 %v3910_v13, 127.0  ;;  %v3912_v23 = vround.rtne.f32 %v758_v14  ;;  %v760_v24 = vmul.f32 %v4352_v10, %v43_v16  ;;  %v54_v13 = vld [vmem:[%s6496_s1 + $0xe8] sm:$0xff]  ;;  %v55_v14 = vld [vmem:[%s6496_s1 + $0xf0] sm:$0xff] }
  0x20   :  { %v1011_v27 = vmul.f32 %v3455_v18, %v4323_v2  ;;  %v3457_v28 = vclamps-f32 %v3911_v19, 127.0  ;;  %v3913_v29 = vround.rtne.f32 %v759_v20  ;;  %v761_v30 = vmul.f32 %v4352_v10, %v44_v25 }
  0x21   :  { %3724 = vmatmul.mubr.msk.f32.gmra.mrb[14].mxu0 %vm97_vm0, %v40_v4  ;;  %v1012_v31 = vmul.f32 %v3456_v22, %v4323_v2  ;;  %v3458_v32 = vclamps-f32 %v3912_v23, 127.0  ;;  %v3914_v33 = vround.rtne.f32 %v760_v24  ;;  %v762_v34 = vmul.f32 %v4352_v10, %v45_v26  ;;  %v56_v23 = vld [vmem:[%s6496_s1 + $0xf8] sm:$0xff]  ;;  %v57_v24 = vld [vmem:[%s6496_s1 + $0x100] sm:$0xff] }
  0x22   :  { %3726 = vmatprep.mubr.msk.f32.mxu0 %vm97_vm0, %v41_v5  ;;  %3810 = vmatmul.mubr.msk.f32.gmra.mrb[6].mxu1 %vm97_vm0, %v1005_v59  ;;  %v1013_v37 = vmul.f32 %v3457_v28, %v4323_v2  ;;  %v3459_v38 = vclamps-f32 %v3913_v29, 127.0  ;;  %v3915_v39 = vround.rtne.f32 %v761_v30  ;;  %v763_v40 = vmul.f32 %v4352_v10, %v46_v35 }
  0x23   :  { %3812 = vmatprep.mubr.msk.f32.mxu1 %vm97_vm0, %v1006_v63  ;;  %v1014_v41 = vmul.f32 %v3458_v32, %v4323_v2  ;;  %v3460_v42 = vclamps-f32 %v3914_v33, 127.0  ;;  %v3916_v43 = vround.rtne.f32 %v762_v34  ;;  %v764_v44 = vmul.f32 %v4352_v10, %v47_v36  ;;  %v58_v33 = vld [vmem:[%s6496_s1 + $0x108] sm:$0xff]  ;;  %v59_v34 = vld [vmem:[%s6496_s1 + $0x110] sm:$0xff] }
  0x24   :  { %v1015_v47 = vmul.f32 %v3459_v38, %v4323_v2  ;;  %v3461_v48 = vclamps-f32 %v3915_v39, 127.0  ;;  %v3917_v49 = vround.rtne.f32 %v763_v40  ;;  %v765_v50 = vmul.f32 %v4352_v10, %v48_v45 }
  0x25   :  { %3727 = vmatmul.mubr.msk.f32.gmra.mrb[16].mxu0 %vm97_vm0, %v42_v15  ;;  %v1016_v51 = vmul.f32 %v3460_v42, %v4323_v2  ;;  %v3462_v52 = vclamps-f32 %v3916_v43, 127.0  ;;  %v3918_v53 = vround.rtne.f32 %v764_v44  ;;  %v766_v54 = vmul.f32 %v4352_v10, %v49_v46  ;;  %v60_v43 = vld [vmem:[%s6496_s1 + $0x118] sm:$0xff]  ;;  %v61_v44 = vld [vmem:[%s6496_s1 + $0x120] sm:$0xff] }
  0x26   :  { %3729 = vmatprep.mubr.msk.f32.mxu0 %vm97_vm0, %v43_v16  ;;  %3813 = vmatmul.mubr.msk.f32.gmra.mrb[8].mxu1 %vm97_vm0, %v1007_v6  ;;  %v1017_v57 = vmul.f32 %v3461_v48, %v4323_v2  ;;  %v3463_v58 = vclamps-f32 %v3917_v49, 127.0  ;;  %v3919_v59 = vround.rtne.f32 %v765_v50  ;;  %v767_v60 = vmul.f32 %v4352_v10, %v50_v55 }
  0x27   :  { %3815 = vmatprep.mubr.msk.f32.mxu1 %vm97_vm0, %v1008_v11  ;;  %v1018_v61 = vmul.f32 %v3462_v52, %v4323_v2  ;;  %v3464_v62 = vclamps-f32 %v3918_v53, 127.0  ;;  %v3920_v63 = vround.rtne.f32 %v766_v54  ;;  %v768_v0 = vmul.f32 %v4352_v10, %v51_v56  ;;  %v62_v53 = vld [vmem:[%s6496_s1 + $0x128] sm:$0xff]  ;;  %v63_v54 = vld [vmem:[%s6496_s1 + $0x130] sm:$0xff] }
  0x28   :  { %v1019_v4 = vmul.f32 %v3463_v58, %v4323_v2  ;;  %v3465_v5 = vclamps-f32 %v3919_v59, 127.0  ;;  %v3921_v6 = vround.rtne.f32 %v767_v60  ;;  %v769_v7 = vmul.f32 %v4352_v10, %v52_v1 }
  0x29   :  { %3730 = vmatmul.mubr.msk.f32.gmra.mrb[18].mxu0 %vm97_vm0, %v44_v25  ;;  %v1020_v8 = vmul.f32 %v3464_v62, %v4323_v2  ;;  %v3466_v9 = vclamps-f32 %v3920_v63, 127.0  ;;  %v3922_v11 = vround.rtne.f32 %v768_v0  ;;  %v770_v12 = vmul.f32 %v4352_v10, %v53_v3  ;;  %v64_v63 = vld [vmem:[%s6496_s1 + $0x138] sm:$0xff]  ;;  %v65_v0 = vld [vmem:[%s6496_s1 + $0x140] sm:$0xff] }
  0x2a   :  { %3732 = vmatprep.mubr.msk.f32.mxu0 %vm97_vm0, %v45_v26  ;;  %3816 = vmatmul.mubr.msk.f32.gmra.mrb[10].mxu1 %vm97_vm0, %v1009_v17  ;;  %v1021_v15 = vmul.f32 %v3465_v5, %v4323_v2  ;;  %v3467_v16 = vclamps-f32 %v3921_v6, 127.0  ;;  %v3923_v17 = vround.rtne.f32 %v769_v7  ;;  %v771_v18 = vmul.f32 %v4352_v10, %v54_v13 }
  0x2b   :  { %3818 = vmatprep.mubr.msk.f32.mxu1 %vm97_vm0, %v1010_v21  ;;  %v1022_v19 = vmul.f32 %v3466_v9, %v4323_v2  ;;  %v3468_v20 = vclamps-f32 %v3922_v11, 127.0  ;;  %v3924_v21 = vround.rtne.f32 %v770_v12  ;;  %v772_v22 = vmul.f32 %v4352_v10, %v55_v14  ;;  %v66_v11 = vld [vmem:[%s6496_s1 + $0x148] sm:$0xff]  ;;  %v67_v12 = vld [vmem:[%s6496_s1 + $0x150] sm:$0xff] }
  0x2c   :  { %v1023_v25 = vmul.f32 %v3467_v16, %v4323_v2  ;;  %v3469_v26 = vclamps-f32 %v3923_v17, 127.0  ;;  %v773_v28 = vmul.f32 %v4352_v10, %v56_v23  ;;  %v774_v32 = vmul.f32 %v4352_v10, %v57_v24 }
  0x2d   :  { %3733 = vmatmul.mubr.msk.f32.gmra.mrb[20].mxu0 %vm97_vm0, %v46_v35  ;;  %v1024_v29 = vmul.f32 %v3468_v20, %v4323_v2  ;;  %v3470_v30 = vclamps-f32 %v3924_v21, 127.0  ;;  %v775_v38 = vmul.f32 %v4352_v10, %v58_v33  ;;  %v776_v42 = vmul.f32 %v4352_v10, %v59_v34  ;;  %v68_v21 = vld [vmem:[%s6496_s1 + $0x158] sm:$0xff] }
  0x2e   :  { %3735 = vmatprep.mubr.msk.f32.mxu0 %vm97_vm0, %v47_v36  ;;  %3819 = vmatmul.mubr.msk.f32.gmra.mrb[12].mxu1 %vm97_vm0, %v1011_v27  ;;  %v3925_v27 = vround.rtne.f32 %v771_v18  ;;  %v1025_v35 = vmul.f32 %v3469_v26, %v4323_v2  ;;  %v777_v48 = vmul.f32 %v4352_v10, %v60_v43  ;;  %v778_v52 = vmul.f32 %v4352_v10, %v61_v44 }
  0x2f   :  { %3821 = vmatprep.mubr.msk.f32.mxu1 %vm97_vm0, %v1012_v31  ;;  %v3926_v31 = vround.rtne.f32 %v772_v22  ;;  %v1026_v39 = vmul.f32 %v3470_v30, %v4323_v2  ;;  %v779_v58 = vmul.f32 %v4352_v10, %v62_v53  ;;  %v780_v62 = vmul.f32 %v4352_v10, %v63_v54  ;;  %v69_v22 = vld [vmem:[%s6496_s1 + $0x160] sm:$0xff] }
  0x30   :  { %v3471_v36 = vclamps-f32 %v3925_v27, 127.0  ;;  %v781_v5 = vmul.f32 %v4352_v10, %v64_v63  ;;  %v782_v9 = vmul.f32 %v4352_v10, %v65_v0  ;;  %v783_v16 = vmul.f32 %v4352_v10, %v66_v11 }
  0x31   :  { %3736 = vmatmul.mubr.msk.f32.gmra.mrb[22].mxu0 %vm97_vm0, %v48_v45  ;;  %v3472_v40 = vclamps-f32 %v3926_v31, 127.0  ;;  %v784_v20 = vmul.f32 %v4352_v10, %v67_v12  ;;  %v785_v26 = vmul.f32 %v4352_v10, %v68_v21  ;;  %v786_v30 = vmul.f32 %v4352_v10, %v69_v22  ;;  %v70_v31 = vld [vmem:[%s6496_s1 + $0x168] sm:$0xff] }
  0x32   :  { %3738 = vmatprep.mubr.msk.f32.mxu0 %vm97_vm0, %v49_v46  ;;  %3822 = vmatmul.mubr.msk.f32.gmra.mrb[14].mxu1 %vm97_vm0, %v1013_v37  ;;  %v3927_v37 = vround.rtne.f32 %v773_v28  ;;  %v1027_v45 = vmul.f32 %v3471_v36, %v4323_v2  ;;  %v787_v36 = vmul.f32 %v4352_v10, %v70_v31 }
  0x33   :  { %3824 = vmatprep.mubr.msk.f32.mxu1 %vm97_vm0, %v1014_v41  ;;  %v3928_v41 = vround.rtne.f32 %v774_v32  ;;  %v1028_v49 = vmul.f32 %v3472_v40, %v4323_v2  ;;  %v71_v32 = vld [vmem:[%s6496_s1 + $0x170] sm:$0xff] }
  0x34   :  { %v3473_v46 = vclamps-f32 %v3927_v37, 127.0  ;;  %v788_v40 = vmul.f32 %v4352_v10, %v71_v32 }
  0x35   :  { %3739 = vmatmul.mubr.msk.f32.gmra.mrb[24].mxu0 %vm97_vm0, %v50_v55  ;;  %v3474_v50 = vclamps-f32 %v3928_v41, 127.0  ;;  %v72_v41 = vld [vmem:[%s6496_s1 + $0x178] sm:$0xff] }
  0x36   :  { %3741 = vmatprep.mubr.msk.f32.mxu0 %vm97_vm0, %v51_v56  ;;  %3825 = vmatmul.mubr.msk.f32.gmra.mrb[16].mxu1 %vm97_vm0, %v1015_v47  ;;  %v3929_v47 = vround.rtne.f32 %v775_v38  ;;  %v1029_v55 = vmul.f32 %v3473_v46, %v4323_v2  ;;  %v789_v46 = vmul.f32 %v4352_v10, %v72_v41 }
  0x37   :  { %3827 = vmatprep.mubr.msk.f32.mxu1 %vm97_vm0, %v1016_v51  ;;  %v3930_v51 = vround.rtne.f32 %v776_v42  ;;  %v1030_v59 = vmul.f32 %v3474_v50, %v4323_v2  ;;  %v73_v42 = vld [vmem:[%s6496_s1 + $0x180] sm:$0xff] }
  0x38   :  { %v3475_v56 = vclamps-f32 %v3929_v47, 127.0  ;;  %v790_v50 = vmul.f32 %v4352_v10, %v73_v42 }
  0x39   :  { %3742 = vmatmul.mubr.msk.f32.gmra.mrb[26].mxu0 %vm97_vm0, %v52_v1  ;;  %v3476_v60 = vclamps-f32 %v3930_v51, 127.0  ;;  %v74_v51 = vld [vmem:[%s6496_s1 + $0x188] sm:$0xff] }
  0x3a   :  { %3744 = vmatprep.mubr.msk.f32.mxu0 %vm97_vm0, %v53_v3  ;;  %3828 = vmatmul.mubr.msk.f32.gmra.mrb[18].mxu1 %vm97_vm0, %v1017_v57  ;;  %v3931_v57 = vround.rtne.f32 %v777_v48  ;;  %v1031_v1 = vmul.f32 %v3475_v56, %v4323_v2  ;;  %v791_v56 = vmul.f32 %v4352_v10, %v74_v51 }
  0x3b   :  { %3830 = vmatprep.mubr.msk.f32.mxu1 %vm97_vm0, %v1018_v61  ;;  %v3932_v61 = vround.rtne.f32 %v778_v52  ;;  %v1032_v6 = vmul.f32 %v3476_v60, %v4323_v2  ;;  %v75_v52 = vld [vmem:[%s6496_s1 + $0x190] sm:$0xff] }
  0x3c   :  { %v3477_v3 = vclamps-f32 %v3931_v57, 127.0  ;;  %v792_v60 = vmul.f32 %v4352_v10, %v75_v52 }
  0x3d   :  { %3745 = vmatmul.mubr.msk.f32.gmra.mrb[28].mxu0 %vm97_vm0, %v54_v13  ;;  %v3478_v7 = vclamps-f32 %v3932_v61, 127.0  ;;  %v76_v61 = vld [vmem:[%s6496_s1 + $0x198] sm:$0xff] }
  0x3e   :  { %3747 = vmatprep.mubr.msk.f32.mxu0 %vm97_vm0, %v55_v14  ;;  %3831 = vmatmul.mubr.msk.f32.gmra.mrb[20].mxu1 %vm97_vm0, %v1019_v4  ;;  %v3933_v4 = vround.rtne.f32 %v779_v58  ;;  %v1033_v13 = vmul.f32 %v3477_v3, %v4323_v2  ;;  %v793_v3 = vmul.f32 %v4352_v10, %v76_v61 }
  0x3f   :  { %3833 = vmatprep.mubr.msk.f32.mxu1 %vm97_vm0, %v1020_v8  ;;  %v3934_v8 = vround.rtne.f32 %v780_v62  ;;  %v1034_v17 = vmul.f32 %v3478_v7, %v4323_v2  ;;  %v77_v62 = vld [vmem:[%s6496_s1 + $0x1a0] sm:$0xff] }
  0x40   :  { %v3479_v14 = vclamps-f32 %v3933_v4, 127.0  ;;  %v794_v7 = vmul.f32 %v4352_v10, %v77_v62 }
  0x41   :  { %3748 = vmatmul.mubr.msk.f32.gmra.mrb[30].mxu0 %vm97_vm0, %v56_v23  ;;  %v3480_v18 = vclamps-f32 %v3934_v8, 127.0  ;;  %v78_v8 = vld [vmem:[%s6496_s1 + $0x1a8] sm:$0xff] }
  0x42   :  { %3750 = vmatprep.mubr.msk.f32.mxu0 %vm97_vm0, %v57_v24  ;;  %3834 = vmatmul.mubr.msk.f32.gmra.mrb[22].mxu1 %vm97_vm0, %v1021_v15  ;;  %v3935_v15 = vround.rtne.f32 %v781_v5  ;;  %v1035_v23 = vmul.f32 %v3479_v14, %v4323_v2  ;;  %v795_v14 = vmul.f32 %v4352_v10, %v78_v8 }
  0x43   :  { %3836 = vmatprep.mubr.msk.f32.mxu1 %vm97_vm0, %v1022_v19  ;;  %v3936_v19 = vround.rtne.f32 %v782_v9  ;;  %v1036_v27 = vmul.f32 %v3480_v18, %v4323_v2  ;;  %v79_v9 = vld [vmem:[%s6496_s1 + $0x1b0] sm:$0xff] }
  0x44   :  { %v3481_v24 = vclamps-f32 %v3935_v15, 127.0  ;;  %v796_v18 = vmul.f32 %v4352_v10, %v79_v9 }
  0x45   :  { %3751 = vmatmul.mubr.msk.f32.gmra.mrb[32].mxu0 %vm97_vm0, %v58_v33  ;;  %v3482_v28 = vclamps-f32 %v3936_v19, 127.0  ;;  %v80_v19 = vld [vmem:[%s6496_s1 + $0x1b8] sm:$0xff] }
  0x46   :  { %3753 = vmatprep.mubr.msk.f32.mxu0 %vm97_vm0, %v59_v34  ;;  %3837 = vmatmul.mubr.msk.f32.gmra.mrb[24].mxu1 %vm97_vm0, %v1023_v25  ;;  %v3937_v25 = vround.rtne.f32 %v783_v16  ;;  %v1037_v33 = vmul.f32 %v3481_v24, %v4323_v2  ;;  %v797_v24 = vmul.f32 %v4352_v10, %v80_v19 }
  0x47   :  { %3839 = vmatprep.mubr.msk.f32.mxu1 %vm97_vm0, %v1024_v29  ;;  %v3938_v29 = vround.rtne.f32 %v784_v20  ;;  %v1038_v37 = vmul.f32 %v3482_v28, %v4323_v2  ;;  %v81_v20 = vld [vmem:[%s6496_s1 + $0x1c0] sm:$0xff] }
  0x48   :  { %v3483_v34 = vclamps-f32 %v3937_v25, 127.0  ;;  %v798_v28 = vmul.f32 %v4352_v10, %v81_v20 }
  0x49   :  { %3754 = vmatmul.mubr.msk.f32.gmra.mrb[34].mxu0 %vm97_vm0, %v60_v43  ;;  %v3484_v38 = vclamps-f32 %v3938_v29, 127.0  ;;  %v82_v29 = vld [vmem:[%s6496_s1 + $0x1c8] sm:$0xff] }
  0x4a   :  { %3756 = vmatprep.mubr.msk.f32.mxu0 %vm97_vm0, %v61_v44  ;;  %3840 = vmatmul.mubr.msk.f32.gmra.mrb[26].mxu1 %vm97_vm0, %v1025_v35  ;;  %v3939_v35 = vround.rtne.f32 %v785_v26  ;;  %v1039_v43 = vmul.f32 %v3483_v34, %v4323_v2  ;;  %v799_v34 = vmul.f32 %v4352_v10, %v82_v29 }
  0x4b   :  { %3842 = vmatprep.mubr.msk.f32.mxu1 %vm97_vm0, %v1026_v39  ;;  %v3940_v39 = vround.rtne.f32 %v786_v30  ;;  %v1040_v47 = vmul.f32 %v3484_v38, %v4323_v2  ;;  %v83_v30 = vld [vmem:[%s6496_s1 + $0x1d0] sm:$0xff] }
  0x4c   :  { %v3485_v44 = vclamps-f32 %v3939_v35, 127.0  ;;  %v800_v38 = vmul.f32 %v4352_v10, %v83_v30 }
  0x4d   :  { %3757 = vmatmul.mubr.msk.f32.gmra.mrb[36].mxu0 %vm97_vm0, %v62_v53  ;;  %v3486_v48 = vclamps-f32 %v3940_v39, 127.0  ;;  %v84_v39 = vld [vmem:[%s6496_s1 + $0x1d8] sm:$0xff] }
  0x4e   :  { %3759 = vmatprep.mubr.msk.f32.mxu0 %vm97_vm0, %v63_v54  ;;  %3843 = vmatmul.mubr.msk.f32.gmra.mrb[28].mxu1 %vm97_vm0, %v1027_v45  ;;  %v3941_v45 = vround.rtne.f32 %v787_v36  ;;  %v1041_v53 = vmul.f32 %v3485_v44, %v4323_v2  ;;  %v801_v44 = vmul.f32 %v4352_v10, %v84_v39 }
  0x4f   :  { %3845 = vmatprep.mubr.msk.f32.mxu1 %vm97_vm0, %v1028_v49  ;;  %v3942_v49 = vround.rtne.f32 %v788_v40  ;;  %v1042_v57 = vmul.f32 %v3486_v48, %v4323_v2  ;;  %v85_v40 = vld [vmem:[%s6496_s1 + $0x1e0] sm:$0xff] }
  0x50   :  { %v3487_v54 = vclamps-f32 %v3941_v45, 127.0  ;;  %v802_v48 = vmul.f32 %v4352_v10, %v85_v40 }
  0x51   :  { %3760 = vmatmul.mubr.msk.f32.gmra.mrb[38].mxu0 %vm97_vm0, %v64_v63  ;;  %v3488_v58 = vclamps-f32 %v3942_v49, 127.0  ;;  %v86_v49 = vld [vmem:[%s6496_s1 + $0x1e8] sm:$0xff] }
  0x52   :  { %3762 = vmatprep.mubr.msk.f32.mxu0 %vm97_vm0, %v65_v0  ;;  %3846 = vmatmul.mubr.msk.f32.gmra.mrb[30].mxu1 %vm97_vm0, %v1029_v55  ;;  %v3943_v55 = vround.rtne.f32 %v789_v46  ;;  %v1043_v63 = vmul.f32 %v3487_v54, %v4323_v2  ;;  %v803_v54 = vmul.f32 %v4352_v10, %v86_v49 }
  0x53   :  { %3848 = vmatprep.mubr.msk.f32.mxu1 %vm97_vm0, %v1030_v59  ;;  %v3944_v59 = vround.rtne.f32 %v790_v50  ;;  %v1044_v4 = vmul.f32 %v3488_v58, %v4323_v2  ;;  %v87_v50 = vld [vmem:[%s6496_s1 + $0x1f0] sm:$0xff] }
  0x54   :  { %v3489_v0 = vclamps-f32 %v3943_v55, 127.0  ;;  %v804_v58 = vmul.f32 %v4352_v10, %v87_v50 }
  0x55   :  { %3763 = vmatmul.mubr.msk.f32.gmra.mrb[40].mxu0 %vm97_vm0, %v66_v11  ;;  %v3490_v5 = vclamps-f32 %v3944_v59, 127.0  ;;  %v88_v59 = vld [vmem:[%s6496_s1 + $0x1f8] sm:$0xff] }
  0x56   :  { %3765 = vmatprep.mubr.msk.f32.mxu0 %vm97_vm0, %v67_v12  ;;  %3849 = vmatmul.mubr.msk.f32.gmra.mrb[32].mxu1 %vm97_vm0, %v1031_v1  ;;  %v3945_v1 = vround.rtne.f32 %v791_v56  ;;  %v1045_v11 = vmul.f32 %v3489_v0, %v4323_v2 }
  0x57   :  { %3851 = vmatprep.mubr.msk.f32.mxu1 %vm97_vm0, %v1032_v6  ;;  %v3946_v6 = vround.rtne.f32 %v792_v60  ;;  %v1046_v15 = vmul.f32 %v3490_v5, %v4323_v2 }
  0x58   :  { %v3491_v12 = vclamps-f32 %v3945_v1, 127.0 }
  0x59   :  { %3766 = vmatmul.mubr.msk.f32.gmra.mrb[42].mxu0 %vm97_vm0, %v68_v21  ;;  %v3492_v16 = vclamps-f32 %v3946_v6, 127.0 }
  0x5a   :  { %3768 = vmatprep.mubr.msk.f32.mxu0 %vm97_vm0, %v69_v22  ;;  %3852 = vmatmul.mubr.msk.f32.gmra.mrb[34].mxu1 %vm97_vm0, %v1033_v13  ;;  %v3947_v13 = vround.rtne.f32 %v793_v3  ;;  %v1047_v21 = vmul.f32 %v3491_v12, %v4323_v2  ;;  %v3958_v3 = vround.rtne.f32 %v804_v58 }
  0x5b   :  { %3854 = vmatprep.mubr.msk.f32.mxu1 %vm97_vm0, %v1034_v17  ;;  %v3948_v17 = vround.rtne.f32 %v794_v7  ;;  %v1048_v25 = vmul.f32 %v3492_v16, %v4323_v2 }
  0x5c   :  { %v3493_v22 = vclamps-f32 %v3947_v13, 127.0  ;;  %v4779_v13 = vld [vmem:[%s6499_s4] ss:$0 sm:$0xff] }
  0x5d   :  { %3769 = vmatmul.mubr.msk.f32.gmra.mrb[44].mxu0 %vm97_vm0, %v70_v31  ;;  %v3494_v26 = vclamps-f32 %v3948_v17, 127.0 }
  0x5e   :  { %3771 = vmatprep.mubr.msk.f32.mxu0 %vm97_vm0, %v71_v32  ;;  %3855 = vmatmul.mubr.msk.f32.gmra.mrb[36].mxu1 %vm97_vm0, %v1035_v23  ;;  %v3949_v23 = vround.rtne.f32 %v795_v14  ;;  %v1049_v31 = vmul.f32 %v3493_v22, %v4323_v2 }
  0x5f   :  { %3857 = vmatprep.mubr.msk.f32.mxu1 %vm97_vm0, %v1036_v27  ;;  %v3950_v27 = vround.rtne.f32 %v796_v18  ;;  %v1050_v35 = vmul.f32 %v3494_v26, %v4323_v2 }
  0x60   :  { %v3495_v32 = vclamps-f32 %v3949_v23, 127.0 }
  0x61   :  { %3772 = vmatmul.mubr.msk.f32.gmra.mrb[46].mxu0 %vm97_vm0, %v72_v41  ;;  %v3496_v36 = vclamps-f32 %v3950_v27, 127.0 }
  0x62   :  { %3774 = vmatprep.mubr.msk.f32.mxu0 %vm97_vm0, %v73_v42  ;;  %3858 = vmatmul.mubr.msk.f32.gmra.mrb[38].mxu1 %vm97_vm0, %v1037_v33  ;;  %v3951_v33 = vround.rtne.f32 %v797_v24  ;;  %v1051_v41 = vmul.f32 %v3495_v32, %v4323_v2 }
  0x63   :  { %3860 = vmatprep.mubr.msk.f32.mxu1 %vm97_vm0, %v1038_v37  ;;  %v3952_v37 = vround.rtne.f32 %v798_v28  ;;  %v1052_v45 = vmul.f32 %v3496_v36, %v4323_v2 }
  0x64   :  { %v3497_v42 = vclamps-f32 %v3951_v33, 127.0 }
  0x65   :  { %3775 = vmatmul.mubr.msk.f32.gmra.mrb[48].mxu0 %vm97_vm0, %v74_v51  ;;  %v3498_v46 = vclamps-f32 %v3952_v37, 127.0 }
  0x66   :  { %3777 = vmatprep.mubr.msk.f32.mxu0 %vm97_vm0, %v75_v52  ;;  %3861 = vmatmul.mubr.msk.f32.gmra.mrb[40].mxu1 %vm97_vm0, %v1039_v43  ;;  %v3953_v43 = vround.rtne.f32 %v799_v34  ;;  %v1053_v51 = vmul.f32 %v3497_v42, %v4323_v2 }
  0x67   :  { %3863 = vmatprep.mubr.msk.f32.mxu1 %vm97_vm0, %v1040_v47  ;;  %v3954_v47 = vround.rtne.f32 %v800_v38  ;;  %v1054_v55 = vmul.f32 %v3498_v46, %v4323_v2 }
  0x68   :  { %v3499_v52 = vclamps-f32 %v3953_v43, 127.0 }
  0x69   :  { %3778 = vmatmul.mubr.msk.f32.gmra.mrb[50].mxu0 %vm97_vm0, %v76_v61  ;;  %v3500_v56 = vclamps-f32 %v3954_v47, 127.0 }
  0x6a   :  { %3780 = vmatprep.mubr.msk.f32.mxu0 %vm97_vm0, %v77_v62  ;;  %3864 = vmatmul.mubr.msk.f32.gmra.mrb[42].mxu1 %vm97_vm0, %v1041_v53  ;;  %v3955_v53 = vround.rtne.f32 %v801_v44  ;;  %v1055_v60 = vmul.f32 %v3499_v52, %v4323_v2  ;;  %v3957_v62 = vround.rtne.f32 %v803_v54 }
  0x6b   :  { %3866 = vmatprep.mubr.msk.f32.mxu1 %vm97_vm0, %v1042_v57  ;;  %v3956_v57 = vround.rtne.f32 %v802_v48  ;;  %v1056_v0 = vmul.f32 %v3500_v56, %v4323_v2 }
  0x6c   :  { %v3501_v61 = vclamps-f32 %v3955_v53, 127.0  ;;  %v3503_v5 = vclamps-f32 %v3957_v62, 127.0 }
  0x6d   :  { %3781 = vmatmul.mubr.msk.f32.gmra.mrb[52].mxu0 %vm97_vm0, %v78_v8  ;;  %v3502_v1 = vclamps-f32 %v3956_v57, 127.0  ;;  %v3504_v8 = vclamps-f32 %v3958_v3, 127.0 }
  0x6e   :  { %3783 = vmatprep.mubr.msk.f32.mxu0 %vm97_vm0, %v79_v9  ;;  %3867 = vmatmul.mubr.msk.f32.gmra.mrb[44].mxu1 %vm97_vm0, %v1043_v63  ;;  %v805_v63 = vmul.f32 %v4352_v10, %v88_v59  ;;  %v1059_v10 = vmul.f32 %v3503_v5, %v4323_v2 }
  0x6f   :  { %3869 = vmatprep.mubr.msk.f32.mxu1 %vm97_vm0, %v1044_v4  ;;  %v1057_v4 = vmul.f32 %v3501_v61, %v4323_v2  ;;  %v1058_v7 = vmul.f32 %v3502_v1, %v4323_v2 }
  0x70   :  { %v3959_v6 = vround.rtne.f32 %v805_v63 }
  0x71   :  { %3784 = vmatmul.mubr.msk.f32.gmra.mrb[54].mxu0 %vm97_vm0, %v80_v19 }
  0x72   :  { %3786 = vmatprep.mubr.msk.f32.mxu0 %vm97_vm0, %v81_v20  ;;  %3870 = vmatmul.mubr.msk.f32.gmra.mrb[46].mxu1 %vm97_vm0, %v1045_v11  ;;  %v3505_v9 = vclamps-f32 %v3959_v6, 127.0  ;;  %v1060_v11 = vmul.f32 %v3504_v8, %v4323_v2 }
  0x73   :  { %3872 = vmatprep.mubr.msk.f32.mxu1 %vm97_vm0, %v1046_v15 }
  0x74   :  { %v1061_v12 = vmul.f32 %v3505_v9, %v4323_v2 }
  0x75   :  { %3787 = vmatmul.mubr.msk.f32.gmra.mrb[56].mxu0 %vm97_vm0, %v82_v29 }
  0x76   :  { %3789 = vmatprep.mubr.msk.f32.mxu0 %vm97_vm0, %v83_v30  ;;  %3873 = vmatmul.mubr.msk.f32.gmra.mrb[48].mxu1 %vm97_vm0, %v1047_v21 }
  0x77   :  { %3875 = vmatprep.mubr.msk.f32.mxu1 %vm97_vm0, %v1048_v25 }
  0x79   :  { %3790 = vmatmul.mubr.msk.f32.gmra.mrb[58].mxu0 %vm97_vm0, %v84_v39 }
  0x7a   :  { %3792 = vmatprep.mubr.msk.f32.mxu0 %vm97_vm0, %v85_v40  ;;  %3876 = vmatmul.mubr.msk.f32.gmra.mrb[50].mxu1 %vm97_vm0, %v1049_v31 }
  0x7b   :  { %3878 = vmatprep.mubr.msk.f32.mxu1 %vm97_vm0, %v1050_v35 }
  0x7d   :  { %3793 = vmatmul.mubr.msk.f32.gmra.mrb[60].mxu0 %vm97_vm0, %v86_v49 }
  0x7e   :  { %3795 = vmatprep.mubr.msk.f32.mxu0 %vm97_vm0, %v87_v50  ;;  %3879 = vmatmul.mubr.msk.f32.gmra.mrb[52].mxu1 %vm97_vm0, %v1051_v41 }
  0x7f   :  { %3881 = vmatprep.mubr.msk.f32.mxu1 %vm97_vm0, %v1052_v45 }
  0x81   :  { %3796 = vmatmul.mubr.msk.f32.gmra.mrb[62].mxu0 %vm97_vm0, %v88_v59 }
  0x82   :  { %3882 = vmatmul.mubr.msk.f32.gmra.mrb[54].mxu1 %vm97_vm0, %v1053_v51 }
  0x83   :  { %3884 = vmatprep.mubr.msk.f32.mxu1 %vm97_vm0, %v1054_v55 }
  0x86   :  { %3885 = vmatmul.mubr.msk.f32.gmra.mrb[56].mxu1 %vm97_vm0, %v1055_v60 }
  0x87   :  { %3887 = vmatprep.mubr.msk.f32.mxu1 %vm97_vm0, %v1056_v0 }
  0x8a   :  { %3888 = vmatmul.mubr.msk.f32.gmra.mrb[58].mxu1 %vm97_vm0, %v1057_v4 }
  0x8b   :  { %3890 = vmatprep.mubr.msk.f32.mxu1 %vm97_vm0, %v1058_v7 }
  0x8e   :  { %3891 = vmatmul.mubr.msk.f32.gmra.mrb[60].mxu1 %vm97_vm0, %v1059_v10 }
  0x8f   :  { %3893 = vmatprep.mubr.msk.f32.mxu1 %vm97_vm0, %v1060_v11 }
  0x92   :  { %3894 = vmatmul.mubr.msk.f32.gmra.mrb[62].mxu1 %vm97_vm0, %v1061_v12 }
  0xd8   :  { %v3704_v14 = vpop.f32.mrb[0].mxu0 }
  0xd9   :  { %v362_v15 = vadd.f32 %v3704_v14, %v4779_v13  ;;  %v356_v16 = vpop.f32.mrb[1].mxu0 }
  0xda   :  { %v4783_v17 = vadd.f32 %v4779_v13, %v356_v16 }
  0xdb   :  { %676 = vst [vmem:[#allocation3 + $0x8] sm:$0xff] %v362_v15  ;;  %v3213_v18 = vmul.f32 %v362_v15, %v362_v15 }
  0xdc   :  { %675 = vst [vmem:[#allocation3] sm:$0xff] %v4783_v17  ;;  %v3212_v2 = vmul.f32 %v4783_v17, %v4783_v17  ;;  %v3707_v19 = vpop.f32.mrb[2].mxu0 }
  0xdd   :  { %v4789_v20 = vadd.f32 %v3707_v19, %v4779_v13  ;;  %v366_v21 = vpop.f32.mrb[3].mxu0 }
  0xde   :  { %v3276_v22 = vadd.f32 %v3213_v18, %v3212_v2  ;;  %v4792_v23 = vadd.f32 %v4779_v13, %v366_v21 }
  0xdf   :  { %678 = vst [vmem:[#allocation3 + $0x18] sm:$0xff] %v4789_v20  ;;  %v3215_v24 = vmul.f32 %v4789_v20, %v4789_v20 }
  0xe0   :  { %677 = vst [vmem:[#allocation3 + $0x10] sm:$0xff] %v4792_v23  ;;  %v3214_v25 = vmul.f32 %v4792_v23, %v4792_v23  ;;  %v3710_v26 = vpop.f32.mrb[4].mxu0 }
  0xe1   :  { %v4801_v27 = vadd.f32 %v3710_v26, %v4779_v13  ;;  %v376_v28 = vpop.f32.mrb[5].mxu0 }
  0xe2   :  { %v3277_v29 = vadd.f32 %v3276_v22, %v3214_v25  ;;  %v4804_v30 = vadd.f32 %v4779_v13, %v376_v28 }
  0xe3   :  { %680 = vst [vmem:[#allocation3 + $0x28] sm:$0xff] %v4801_v27  ;;  %v3217_v32 = vmul.f32 %v4801_v27, %v4801_v27 }
  0xe4   :  { %v3278_v31 = vadd.f32 %v3277_v29, %v3215_v24  ;;  %679 = vst [vmem:[#allocation3 + $0x20] sm:$0xff] %v4804_v30  ;;  %v3216_v33 = vmul.f32 %v4804_v30, %v4804_v30  ;;  %v3713_v34 = vpop.f32.mrb[6].mxu0 }
  0xe5   :  { %v4813_v35 = vadd.f32 %v3713_v34, %v4779_v13  ;;  %v386_v36 = vpop.f32.mrb[7].mxu0 }
  0xe6   :  { %v3279_v37 = vadd.f32 %v3278_v31, %v3216_v33  ;;  %v4816_v38 = vadd.f32 %v4779_v13, %v386_v36 }
  0xe7   :  { %682 = vst [vmem:[#allocation3 + $0x38] sm:$0xff] %v4813_v35  ;;  %v3219_v39 = vmul.f32 %v4813_v35, %v4813_v35 }
  0xe8   :  { %681 = vst [vmem:[#allocation3 + $0x30] sm:$0xff] %v4816_v38  ;;  %v3218_v40 = vmul.f32 %v4816_v38, %v4816_v38  ;;  %v3280_v41 = vadd.f32 %v3279_v37, %v3217_v32  ;;  %v3716_v42 = vpop.f32.mrb[8].mxu0 }
  0xe9   :  { %v4825_v43 = vadd.f32 %v3716_v42, %v4779_v13  ;;  %v396_v44 = vpop.f32.mrb[9].mxu0  ;;  %v3802_v45 = vpop.f32.mrb[0].mxu1 }
  0xea   :  { %v3281_v46 = vadd.f32 %v3280_v41, %v3218_v40  ;;  %v4828_v47 = vadd.f32 %v4779_v13, %v396_v44  ;;  %v1327_v48 = vadd.f32 %v3802_v45, %v4779_v13  ;;  %v1321_v49 = vpop.f32.mrb[1].mxu1 }
  0xeb   :  { %684 = vst [vmem:[#allocation3 + $0x48] sm:$0xff] %v4825_v43  ;;  %v1322_v50 = vadd.f32 %v4779_v13, %v1321_v49 }
  0xec   :  { %683 = vst [vmem:[#allocation3 + $0x40] sm:$0xff] %v4828_v47  ;;  %v3220_v51 = vmul.f32 %v4828_v47, %v4828_v47  ;;  %v3282_v52 = vadd.f32 %v3281_v46, %v3219_v39  ;;  %v3719_v53 = vpop.f32.mrb[10].mxu0  ;;  %v1641_v54 = vmul.f32 %v1327_v48, %v1327_v48  ;;  %v2601_v55 = vsub.f32 %v362_v15, %v1327_v48 }
  0xed   :  { %v4837_v56 = vadd.f32 %v3719_v53, %v4779_v13  ;;  %v406_v57 = vpop.f32.mrb[11].mxu0  ;;  %v1640_v58 = vmul.f32 %v1322_v50, %v1322_v50  ;;  %v2600_v59 = vsub.f32 %v4783_v17, %v1322_v50  ;;  %v3805_v60 = vpop.f32.mrb[2].mxu1 }
  0xee   :  { %v4840_v61 = vadd.f32 %v3282_v52, %v3220_v51  ;;  %v4843_v62 = vadd.f32 %v4779_v13, %v406_v57  ;;  %v1705_v63 = vmul.f32 3.0, %v1641_v54  ;;  %v2409_v0 = vadd.f32 1e-12, %v1641_v54  ;;  %v1331_v4 = vpop.f32.mrb[3].mxu1 }
  0xef   :  { %v2665_v1 = vmul.f32 %v2601_v55, %v2601_v55  ;;  %v3079_v3 = vmul.f32 %v2601_v55, %v362_v15  ;;  %686 = vst [vmem:[#allocation3 + $0x58] sm:$0xff] %v4837_v56  ;;  %v1704_v5 = vmul.f32 3.0, %v1640_v58  ;;  %v2408_v6 = vadd.f32 1e-12, %v1640_v58 }
  0xf0   :  { %v2664_v7 = vmul.f32 %v2600_v59, %v2600_v59  ;;  %v3008_v8 = vadd.f32 %v2601_v55, %v2600_v59  ;;  %685 = vst [vmem:[#allocation3 + $0x50] sm:$0xff] %v4843_v62  ;;  %v4847_v10 = vpop.f32.mrb[12].mxu0  ;;  %v1769_v9 = vmul.f32 0.33333334, %v1705_v63  ;;  %3967 = vrcp.f32 %v2409_v0 }
  0xf1   :  { %v3078_v11 = vmul.f32 %v2600_v59, %v4783_v17  ;;  %v1337_v12 = vadd.f32 %v3805_v60, %v4779_v13  ;;  %v4851_v14 = vpop.f32.mrb[13].mxu0  ;;  %v1768_v15 = vmul.f32 0.33333334, %v1704_v5  ;;  %3969 = vrcp.f32 %v2408_v6  ;;  %v3808_v2 = vpop.f32.mrb[4].mxu1 }
  0xf2   :  { %v2938_v16 = vadd.f32 %v2665_v1, %v2664_v7  ;;  %v1332_v18 = vadd.f32 %v4779_v13, %v1331_v4  ;;  %v1833_v19 = vsub.f32 %v1769_v9, %v1641_v54  ;;  %v4855_v25 = vpop.f32.mrb[5].mxu1  ;;  %v1347_v42 = vadd.f32 %v3808_v2, %v4779_v13 }
  0xf3   :  { %v3142_v21 = vadd.f32 %v3079_v3, %v3078_v11  ;;  %v1643_v22 = vmul.f32 %v1337_v12, %v1337_v12  ;;  %v2603_v24 = vsub.f32 %v4789_v20, %v1337_v12  ;;  %v1832_v26 = vsub.f32 %v1768_v15, %v1640_v58 }
  0xf4   :  { %v1642_v28 = vmul.f32 %v1332_v18, %v1332_v18  ;;  %v2602_v17 = vsub.f32 %v4792_v23, %v1332_v18  ;;  %v4858_v29 = vpop.f32.mrb[14].mxu0  ;;  %v4860_v31 = vmax.f32 %v1833_v19, 0.0  ;;  %v1645_v59 = vmul.f32 %v1347_v42, %v1347_v42 }
  0xf5   :  { %v1707_v32 = vmul.f32 3.0, %v1643_v22  ;;  %v2411_v33 = vadd.f32 1e-12, %v1643_v22  ;;  %v4862_v34 = vpop.f32.mrb[15].mxu0  ;;  %v4864_v36 = vmax.f32 %v1832_v26, 0.0  ;;  %v3081_v37 = vmul.f32 %v2603_v24, %v4789_v20  ;;  %v4867_v41 = vpop.f32.mrb[6].mxu1 }
  0xf6   :  { %v1706_v39 = vmul.f32 3.0, %v1642_v28  ;;  %v2410_v40 = vadd.f32 1e-12, %v1642_v28  ;;  %3971 = vrsqrt.f32 %v4860_v31  ;;  %v4871_v44 = vpop.f32.mrb[7].mxu1  ;;  %v2667_v45 = vmul.f32 %v2603_v24, %v2603_v24 }
  0xf7   :  { %3973 = vrsqrt.f32 %v4864_v36  ;;  %v2728_v48 = vadd.f32 %v4860_v31, %v4864_v36  ;;  %v1771_v49 = vmul.f32 0.33333334, %v1707_v32  ;;  %v2666_v51 = vmul.f32 %v2602_v17, %v2602_v17 }
  0xf8   :  { %v4874_v46 = vpop.f32.mrb[16].mxu0  ;;  %3975 = vrcp.f32 %v2411_v33  ;;  %v1770_v20 = vmul.f32 0.33333334, %v1706_v39  ;;  %v3009_v52 = vadd.f32 %v3008_v8, %v2602_v17  ;;  %v3080_v53 = vmul.f32 %v2602_v17, %v4792_v23 }
  0xf9   :  { %v4878_v50 = vpop.f32.mrb[17].mxu0  ;;  %3977 = vrcp.f32 %v2410_v40  ;;  %v4881_v54 = vpop.f32.mrb[8].mxu1  ;;  %v1835_v57 = vsub.f32 %v1771_v49, %v1643_v22  ;;  %v4884_v60 = vsub.f32 %v4801_v27, %v1347_v42  ;;  %v2939_v3 = vadd.f32 %v2938_v16, %v2666_v51 }
  0xfa   :  { %v3968_v55 = vpop.eup %3967  ;;  %v1834_v58 = vsub.f32 %v1770_v20, %v1642_v28  ;;  %v4886_v63 = vpop.f32.mrb[9].mxu1  ;;  %v4889_v4 = vadd.f32 %v3009_v52, %v2603_v24  ;;  %v3143_v5 = vadd.f32 %v3142_v21, %v3080_v53  ;;  %v1709_v9 = vmul.f32 3.0, %v1645_v59 }
  0xfb   :  { %v3970_v0 = vpop.eup %3969  ;;  %v2475_v1 = vmul.f32 %v3968_v55, %v4860_v31  ;;  %v4894_v7 = vmax.f32 %v1835_v57, 0.0  ;;  %v2940_v12 = vadd.f32 %v2939_v3, %v2667_v45  ;;  %v2413_v18 = vadd.f32 1e-12, %v1645_v59 }
  0xfc   :  { %v4891_v6 = vpop.f32.mrb[18].mxu0  ;;  %v2473_v23 = vmul.f32 %v3970_v0, %v4864_v36  ;;  %v4896_v8 = vmax.f32 %v1834_v58, 0.0  ;;  %v4900_v15 = vadd.f32 %v3143_v5, %v3081_v37  ;;  %v4904_v16 = vmul.f32 %v4825_v43, %v4825_v43 }
  0xfd   :  { %v4898_v11 = vpop.f32.mrb[19].mxu0  ;;  %v4906_v2 = vpop.f32.mrb[10].mxu1  ;;  %vm1969_vm1 = vcmp.eq.f32.partialorder %v4860_v31, inf  ;;  %vm1971_vm2 = vcmp.eq.f32.partialorder %v4860_v31, 0.0  ;;  %3979 = vrsqrt.f32 %v4894_v7  ;;  %v1972_v22 = vand.u32 2147483648, %v4860_v31 }
  0xfe   :  { %v2868_v19 = vadd.f32 %v2475_v1, %v2473_v23  ;;  %v4911_v21 = vpop.f32.mrb[11].mxu1  ;;  %vm1962_vm3 = vcmp.eq.f32.partialorder %v4864_v36, inf  ;;  %vm1964_vm4 = vcmp.eq.f32.partialorder %v4864_v36, 0.0  ;;  %3981 = vrsqrt.f32 %v4896_v8 }
  0xff   :  { %v1965_v28 = vand.u32 2147483648, %v4864_v36  ;;  %v2729_v17 = vadd.f32 %v2728_v48, %v4896_v8  ;;  %v1773_v32 = vmul.f32 0.33333334, %v1709_v9  ;;  %v4923_v33 = vmul.f32 %v4884_v60, %v4884_v60 }
 0x100   :  { %v4917_v24 = vpop.f32.mrb[20].mxu0  ;;  %v3972_v26 = vpop.eup %3971  ;;  %3983 = vrcp.f32 %v2413_v18  ;;  %v4930_v42 = vmul.f32 %v4884_v60, %v4801_v27  ;;  %v1342_v45 = vadd.f32 %v4779_v13, %v4855_v25  ;;  %v1357_v53 = vadd.f32 %v4867_v41, %v4779_v13 }
 0x101   :  { %v4925_v37 = vpop.f32.mrb[21].mxu0  ;;  %v3974_v39 = vpop.eup %3973  ;;  %v1968_v40 = vmul.f32 %v3972_v26, %v4860_v31  ;;  %v1837_v51 = vsub.f32 %v1773_v32, %v1645_v59  ;;  %v4938_v52 = vadd.f32 %v2729_v17, %v4894_v7  ;;  %v1352_v0 = vadd.f32 %v4779_v13, %v4871_v44 }
 0x102   :  { %v4934_v49 = vpop.f32.mrb[12].mxu1  ;;  %v3976_v48 = vpop.eup %3975  ;;  %v1961_v20 = vmul.f32 %v3974_v39, %v4864_v36  ;;  %v1644_v25 = vmul.f32 %v1342_v45, %v1342_v45  ;;  %v2604_v58 = vsub.f32 %v4804_v30, %v1342_v45  ;;  %vm1983_vm5 = vcmp.eq.f32.partialorder %v4894_v7, inf }
 0x103   :  { %v4942_v55 = vpop.f32.mrb[13].mxu1  ;;  %v3978_v57 = vpop.eup %3977  ;;  %v1970_v27 = vsel %vm1969_vm1, %v4860_v31, %v1968_v40  ;;  %v4958_v5 = vmax.f32 %v1837_v51, 0.0  ;;  %vm1976_vm6 = vcmp.eq.f32.partialorder %v4896_v8, inf  ;;  %vm1978_vm7 = vcmp.eq.f32.partialorder %v4896_v8, 0.0 }
 0x104   :  { %v4950_v59 = vpop.f32.mrb[22].mxu0  ;;  %v1973_v1 = vsel %vm1971_vm2, %v1972_v22, %v1970_v27  ;;  %v1963_v41 = vsel %vm1962_vm3, %v4864_v36, %v1961_v20  ;;  %v2477_v3 = vmul.f32 %v3978_v57, %v4896_v8  ;;  %v1708_v18 = vmul.f32 3.0, %v1644_v25 }
 0x105   :  { %6502 = vst [vmem:[#allocation9_spill] sm:$0xff] %v4950_v59  ;;  %v4960_v23 = vpop.f32.mrb[23].mxu0  ;;  %v1966_v9 = vsel %vm1964_vm4, %v1965_v28, %v1963_v41  ;;  %v2412_v44 = vadd.f32 1e-12, %v1644_v25  ;;  %v2668_v26 = vmul.f32 %v2604_v58, %v2604_v58  ;;  %v4964_v17 = vpop.f32.mrb[14].mxu1  ;;  %v2479_v22 = vmul.f32 %v3976_v48, %v4894_v7 }
 0x106   :  { %6503 = vst [vmem:[#allocation10_spill] sm:$0xff] %v4960_v23  ;;  %v2798_v31 = vadd.f32 %v1973_v1, %v1966_v9  ;;  %v2869_v32 = vadd.f32 %v2868_v19, %v2477_v3  ;;  %3985 = vrsqrt.f32 %v4958_v5  ;;  %v4968_v39 = vpop.f32.mrb[15].mxu1  ;;  %v1772_v40 = vmul.f32 0.33333334, %v1708_v18 }
 0x107   :  { %3987 = vrcp.f32 %v2412_v44  ;;  %v3980_v28 = vpop.eup %3979  ;;  %v2941_v20 = vadd.f32 %v2940_v12, %v2668_v26  ;;  %v3011_v51 = vadd.f32 %v4889_v4, %v2604_v58  ;;  %v3082_v19 = vmul.f32 %v2604_v58, %v4804_v30 }
 0x108   :  { %v4972_v36 = vpop.f32.mrb[24].mxu0  ;;  %v4974_v45 = vadd.f32 %v2869_v32, %v2479_v22  ;;  %v3982_v57 = vpop.eup %3981  ;;  %v1982_v27 = vmul.f32 %v3980_v28, %v4894_v7  ;;  %v1836_v1 = vsub.f32 %v1772_v40, %v1644_v25  ;;  %v1647_v41 = vmul.f32 %v1357_v53, %v1357_v53 }
 0x109   :  { %6504 = vst [vmem:[#allocation11_spill] sm:$0xff] %v4972_v36  ;;  %v4978_v48 = vpop.f32.mrb[25].mxu0  ;;  %v4982_v3 = vsub.f32 %v4813_v35, %v1357_v53  ;;  %v4984_v9 = vpop.f32.mrb[16].mxu1  ;;  %v1975_v18 = vmul.f32 %v3982_v57, %v4896_v8  ;;  %v1979_v12 = vand.u32 2147483648, %v4896_v8  ;;  %v3145_v4 = vadd.f32 %v4900_v15, %v3082_v19 }
 0x10a   :  { %6505 = vst [vmem:[#allocation12_spill] sm:$0xff] %v4978_v48  ;;  %v2606_v30 = vsub.f32 %v4816_v38, %v1352_v0  ;;  %v4990_v58 = vpop.f32.mrb[17].mxu1  ;;  %v3984_v44 = vpop.eup %3983  ;;  %v1984_v25 = vsel %vm1983_vm5, %v4894_v7, %v1982_v27  ;;  %v4995_v26 = vmax.f32 %v1836_v1, 0.0  ;;  %v1711_v53 = vmul.f32 3.0, %v1647_v41 }
 0x10b   :  { %v1646_v22 = vmul.f32 %v1352_v0, %v1352_v0  ;;  %v1986_v32 = vand.u32 2147483648, %v4894_v7  ;;  %v1977_v40 = vsel %vm1976_vm6, %v4896_v8, %v1975_v18  ;;  %v2415_v15 = vadd.f32 1e-12, %v1647_v41 }
 0x10c   :  { %vm1985_vm8 = vcmp.eq.f32.partialorder %v4894_v7, 0.0  ;;  %v1980_v28 = vsel %vm1978_vm7, %v1979_v12, %v1977_v40  ;;  %vm1997_vm9 = vcmp.eq.f32.partialorder %v4958_v5, inf  ;;  %3989 = vrsqrt.f32 %v4995_v26  ;;  %v5016_v40 = vpop.f32.mrb[26].mxu0 }
 0x10d   :  { %v5005_v19 = vpop.f32.mrb[18].mxu1  ;;  %v1987_v57 = vsel %vm1985_vm8, %v1986_v32, %v1984_v25  ;;  %v2799_v0 = vadd.f32 %v2798_v31, %v1980_v28  ;;  %vm1999_vm10 = vcmp.eq.f32.partialorder %v4958_v5, 0.0  ;;  %v2731_v27 = vadd.f32 %v4938_v52, %v4995_v26  ;;  %6506 = vst [vmem:[#allocation13_spill] sm:$0xff] %v5016_v40 }
 0x10e   :  { %v1775_v1 = vmul.f32 0.33333334, %v1711_v53  ;;  %v5010_v18 = vpop.f32.mrb[19].mxu1  ;;  %3991 = vrcp.f32 %v2415_v15  ;;  %v5014_v7 = vmul.f32 %v4982_v3, %v4813_v35  ;;  %v1710_v8 = vmul.f32 3.0, %v1646_v22 }
 0x10f   :  { %v2414_v12 = vadd.f32 1e-12, %v1646_v22  ;;  %v2800_v25 = vadd.f32 %v2799_v0, %v1987_v57  ;;  %v2670_v32 = vmul.f32 %v2606_v30, %v2606_v30  ;;  %v2732_v28 = vadd.f32 %v2731_v27, %v4958_v5 }
 0x110   :  { %v3986_v48 = vpop.eup %3985  ;;  %v1839_v31 = vsub.f32 %v1775_v1, %v1647_v41  ;;  %v1774_v53 = vmul.f32 0.33333334, %v1710_v8  ;;  %v2942_v15 = vadd.f32 %v2941_v20, %v4923_v33  ;;  %v3012_v40 = vadd.f32 %v3011_v51, %v4884_v60  ;;  %v5038_v60 = vpop.f32.mrb[27].mxu0 }
 0x111   :  { %v3988_v36 = vpop.eup %3987  ;;  %v1996_v52 = vmul.f32 %v3986_v48, %v4958_v5  ;;  %3993 = vrcp.f32 %v2414_v12  ;;  %v5021_v23 = vpop.f32.mrb[20].mxu1  ;;  %v3084_v41 = vmul.f32 %v2606_v30, %v4816_v38  ;;  %v2000_v0 = vand.u32 2147483648, %v4958_v5  ;;  %6507 = vst [vmem:[#allocation14_spill] sm:$0xff] %v5038_v60 }
 0x112   :  { %v2481_v35 = vmul.f32 %v3988_v36, %v4995_v26  ;;  %v5024_v59 = vmax.f32 %v1839_v31, 0.0  ;;  %v5028_v57 = vpop.f32.mrb[21].mxu1  ;;  %v1838_v27 = vsub.f32 %v1774_v53, %v1646_v22  ;;  %v2943_v48 = vadd.f32 %v2942_v15, %v2670_v32 }
 0x113   :  { %v3146_v1 = vadd.f32 %v3145_v4, %v4930_v42  ;;  %v1998_v33 = vsel %vm1997_vm9, %v4958_v5, %v1996_v52  ;;  %v2483_v36 = vmul.f32 %v3984_v44, %v4958_v5  ;;  %vm1990_vm11 = vcmp.eq.f32.partialorder %v4995_v26, inf }
 0x114   :  { %v2871_v20 = vadd.f32 %v4974_v45, %v2481_v35  ;;  %3995 = vrsqrt.f32 %v5024_v59  ;;  %v2671_v38 = vmul.f32 %v4982_v3, %v4982_v3  ;;  %v5043_v51 = vmax.f32 %v1838_v27, 0.0 }
 0x115   :  { %v3013_v42 = vadd.f32 %v3012_v40, %v2606_v30  ;;  %v5045_v4 = vpop.f32.mrb[22].mxu1  ;;  %v3147_v8 = vadd.f32 %v3146_v1, %v3084_v41  ;;  %v1367_v44 = vadd.f32 %v4881_v54, %v4779_v13  ;;  %v1362_v45 = vadd.f32 %v4779_v13, %v4886_v63 }
 0x116   :  { %6508 = vst [vmem:[#allocation15_spill] sm:$0xff] %v5045_v4  ;;  %v2872_v22 = vadd.f32 %v2871_v20, %v2483_v36  ;;  %v5051_v12 = vpop.f32.mrb[23].mxu1  ;;  %v3990_v31 = vpop.eup %3989  ;;  %v2001_v32 = vsel %vm1999_vm10, %v2000_v0, %v1998_v33  ;;  %vm1992_vm12 = vcmp.eq.f32.partialorder %v4995_v26, 0.0  ;;  %v1993_v30 = vand.u32 2147483648, %v4995_v26 }
 0x117   :  { %6509 = vst [vmem:[#allocation16_spill] sm:$0xff] %v5051_v12  ;;  %3997 = vrsqrt.f32 %v5043_v51  ;;  %v1989_v40 = vmul.f32 %v3990_v31, %v4995_v26  ;;  %v2733_v52 = vadd.f32 %v2732_v28, %v5043_v51  ;;  %v1649_v54 = vmul.f32 %v1367_v44, %v1367_v44  ;;  %v5081_v31 = vpop.f32.mrb[28].mxu0 }
 0x118   :  { %v5061_v53 = vsub.f32 %v4825_v43, %v1367_v44  ;;  %v3992_v63 = vpop.eup %3991  ;;  %v1648_v15 = vmul.f32 %v1362_v45, %v1362_v45  ;;  %v2608_v35 = vsub.f32 %v4828_v47, %v1362_v45  ;;  %v2944_v5 = vadd.f32 %v2943_v48, %v2671_v38  ;;  %6512 = vst [vmem:[#allocation19_spill] sm:$0xff] %v5081_v31 }
 0x119   :  { %v3014_v41 = vadd.f32 %v3013_v42, %v4982_v3  ;;  %v5065_v0 = vpop.f32.mrb[24].mxu1  ;;  %v1991_v27 = vsel %vm1990_vm11, %v4995_v26, %v1989_v40  ;;  %vm2011_vm13 = vcmp.eq.f32.partialorder %v5024_v59, inf  ;;  %v1713_v28 = vmul.f32 3.0, %v1649_v54 }
 0x11a   :  { %6510 = vst [vmem:[#allocation17_spill] sm:$0xff] %v5065_v0  ;;  %v2417_v1 = vadd.f32 1e-12, %v1649_v54  ;;  %v5071_v33 = vpop.f32.mrb[25].mxu1  ;;  %v1994_v20 = vsel %vm1992_vm12, %v1993_v30, %v1991_v27  ;;  %v2487_v48 = vmul.f32 %v3992_v63, %v5024_v59  ;;  %v5078_v3 = vmul.f32 %v5061_v53, %v4825_v43 }
 0x11b   :  { %6511 = vst [vmem:[#allocation18_spill] sm:$0xff] %v5071_v33  ;;  %v3994_v36 = vpop.eup %3993  ;;  %v1712_v38 = vmul.f32 3.0, %v1648_v15  ;;  %v2801_v42 = vadd.f32 %v2800_v25, %v1994_v20  ;;  %v1777_v45 = vmul.f32 0.33333334, %v1713_v28  ;;  %v2416_v60 = vadd.f32 1e-12, %v1648_v15 }
 0x11c   :  { %v2485_v44 = vmul.f32 %v3994_v36, %v5043_v51  ;;  %3999 = vrcp.f32 %v2417_v1  ;;  %v2672_v33 = vmul.f32 %v2608_v35, %v2608_v35  ;;  %v2734_v26 = vadd.f32 %v2733_v52, %v5024_v59 }
 0x11d   :  { %v1776_v40 = vmul.f32 0.33333334, %v1712_v38  ;;  %v5084_v30 = vpop.f32.mrb[26].mxu1  ;;  %v2802_v27 = vadd.f32 %v2801_v42, %v2001_v32  ;;  %v1841_v43 = vsub.f32 %v1777_v45, %v1649_v54  ;;  %v3015_v12 = vadd.f32 %v3014_v41, %v2608_v35 }
 0x11e   :  { %v3996_v63 = vpop.eup %3995  ;;  %v2873_v0 = vadd.f32 %v2872_v22, %v2485_v44  ;;  %v5086_v4 = vpop.f32.mrb[27].mxu1  ;;  %4001 = vrcp.f32 %v2416_v60  ;;  %v2945_v1 = vadd.f32 %v2944_v5, %v2672_v33  ;;  %v3086_v38 = vmul.f32 %v2608_v35, %v4828_v47 }
 0x11f   :  { %v2010_v25 = vmul.f32 %v3996_v63, %v5024_v59  ;;  %v1840_v28 = vsub.f32 %v1776_v40, %v1648_v15  ;;  %v5089_v36 = vmax.f32 %v1841_v43, 0.0  ;;  %v3148_v52 = vadd.f32 %v3147_v8, %v5014_v7  ;;  %v5107_v7 = vpop.f32.mrb[29].mxu0 }
 0x120   :  { %v2874_v20 = vadd.f32 %v2873_v0, %v2487_v48  ;;  %vm2013_vm14 = vcmp.eq.f32.partialorder %v5024_v59, 0.0  ;;  %v1377_v60 = vadd.f32 %v4906_v2, %v4779_v13  ;;  %v2014_v15 = vand.u32 2147483648, %v5024_v59 }
 0x121   :  { %v3998_v31 = vpop.eup %3997  ;;  %v2012_v22 = vsel %vm2011_vm13, %v5024_v59, %v2010_v25  ;;  %v5097_v32 = vmax.f32 %v1840_v28, 0.0  ;;  %v5101_v54 = vpop.f32.mrb[28].mxu1  ;;  %vm2004_vm15 = vcmp.eq.f32.partialorder %v5043_v51, inf  ;;  %4003 = vrsqrt.f32 %v5089_v36 }
 0x122   :  { %v2003_v47 = vmul.f32 %v3998_v31, %v5043_v51  ;;  %v5109_v8 = vpop.f32.mrb[29].mxu1  ;;  %vm2006_vm0 = vcmp.eq.f32.partialorder %v5043_v51, 0.0  ;;  %v2007_v35 = vand.u32 2147483648, %v5043_v51  ;;  %v2673_v2 = vmul.f32 %v5061_v53, %v5061_v53 }
 0x123   :  { %4005 = vrsqrt.f32 %v5097_v32  ;;  %v2015_v59 = vsel %vm2013_vm14, %v2014_v15, %v2012_v22  ;;  %v2735_v41 = vadd.f32 %v2734_v26, %v5097_v32  ;;  %v5120_v0 = vmul.f32 %v4837_v56, %v4837_v56 }
 0x124   :  { %v2005_v5 = vsel %vm2004_vm15, %v5043_v51, %v2003_v47  ;;  %v3149_v48 = vadd.f32 %v3148_v52, %v3086_v38  ;;  %v1651_v42 = vmul.f32 %v1377_v60, %v1377_v60  ;;  %v5123_v44 = vsub.f32 %v4837_v56, %v1377_v60 }
 0x125   :  { %v2008_v33 = vsel %vm2006_vm0, %v2007_v35, %v2005_v5  ;;  %v3222_v40 = vmul.f32 %v4843_v62, %v4843_v62  ;;  %v3284_v51 = vadd.f32 %v4840_v61, %v4904_v16  ;;  %v1372_v26 = vadd.f32 %v4779_v13, %v4911_v21  ;;  %v5140_v5 = vpop.f32.mrb[30].mxu0 }
 0x126   :  { %v4000_v45 = vpop.eup %3999  ;;  %v2803_v31 = vadd.f32 %v2802_v27, %v2008_v33  ;;  %vm2025_vm1 = vcmp.eq.f32.partialorder %v5089_v36, inf  ;;  %v1715_v43 = vmul.f32 3.0, %v1651_v42  ;;  %v2419_v25 = vadd.f32 1e-12, %v1651_v42 }
 0x127   :  { %v2491_v63 = vmul.f32 %v4000_v45, %v5089_v36  ;;  %v5135_v38 = vmul.f32 %v5123_v44, %v4837_v56  ;;  %v3285_v27 = vadd.f32 %v3284_v51, %v3222_v40  ;;  %v1650_v52 = vmul.f32 %v1372_v26, %v1372_v26 }
 0x128   :  { %v2804_v28 = vadd.f32 %v2803_v31, %v2015_v59  ;;  %v4002_v22 = vpop.eup %4001  ;;  %v1779_v60 = vmul.f32 0.33333334, %v1715_v43  ;;  %4007 = vrcp.f32 %v2419_v25  ;;  %v2610_v61 = vsub.f32 %v4843_v62, %v1372_v26  ;;  %v5144_v31 = vpop.f32.mrb[30].mxu1 }
 0x129   :  { %v2736_v16 = vadd.f32 %v2735_v41, %v5089_v36  ;;  %v2489_v21 = vmul.f32 %v4002_v22, %v5097_v32  ;;  %v1714_v15 = vmul.f32 3.0, %v1650_v52  ;;  %v2418_v47 = vadd.f32 1e-12, %v1650_v52 }
 0x12a   :  { %v2946_v35 = vadd.f32 %v2945_v1, %v2673_v2  ;;  %v1843_v59 = vsub.f32 %v1779_v60, %v1651_v42  ;;  %v2674_v33 = vmul.f32 %v2610_v61, %v2610_v61  ;;  %v3016_v56 = vadd.f32 %v3015_v12, %v5061_v53 }
 0x12b   :  { %v3088_v45 = vmul.f32 %v2610_v61, %v4843_v62  ;;  %v4004_v40 = vpop.eup %4003  ;;  %v2875_v51 = vadd.f32 %v2874_v20, %v2489_v21  ;;  %v1778_v26 = vmul.f32 0.33333334, %v1714_v15  ;;  %4009 = vrcp.f32 %v2418_v47 }
 0x12c   :  { %v3150_v41 = vadd.f32 %v3149_v48, %v5078_v3  ;;  %v2024_v25 = vmul.f32 %v4004_v40, %v5089_v36  ;;  %v5148_v1 = vmax.f32 %v1843_v59, 0.0  ;;  %v2947_v2 = vadd.f32 %v2946_v35, %v2674_v33 }
 0x12d   :  { %v4006_v43 = vpop.eup %4005  ;;  %v3017_v42 = vadd.f32 %v3016_v56, %v2610_v61  ;;  %v1842_v12 = vsub.f32 %v1778_v26, %v1650_v52  ;;  %v2876_v53 = vadd.f32 %v2875_v51, %v2491_v63  ;;  %v2028_v60 = vand.u32 2147483648, %v5089_v36  ;;  %v5162_v63 = vpop.f32.mrb[31].mxu0 }
 0x12e   :  { %v2017_v22 = vmul.f32 %v4006_v43, %v5097_v32  ;;  %v3151_v62 = vadd.f32 %v3150_v41, %v3088_v45  ;;  %vm2018_vm2 = vcmp.eq.f32.partialorder %v5097_v32, inf  ;;  %v2021_v20 = vand.u32 2147483648, %v5097_v32  ;;  %v5164_v52 = vpop.f32.mrb[31].mxu1 }
 0x12f   :  { %4011 = vrsqrt.f32 %v5148_v1  ;;  %v2026_v3 = vsel %vm2025_vm1, %v5089_v36, %v2024_v25  ;;  %vm2020_vm3 = vcmp.eq.f32.partialorder %v5097_v32, 0.0  ;;  %v5160_v61 = vmax.f32 %v1842_v12, 0.0 }
 0x130   :  { %v2019_v48 = vsel %vm2018_vm2, %v5097_v32, %v2017_v22  ;;  %v422_v15 = vadd.f32 %v4847_v10, %v4779_v13  ;;  %v1387_v47 = vadd.f32 %v4934_v49, %v4779_v13  ;;  %v417_v35 = vadd.f32 %v4779_v13, %v4851_v14 }
 0x131   :  { %v2022_v21 = vsel %vm2020_vm3, %v2021_v20, %v2019_v48  ;;  %vm2027_vm4 = vcmp.eq.f32.partialorder %v5089_v36, 0.0  ;;  %4013 = vrsqrt.f32 %v5160_v61  ;;  %v2737_v56 = vadd.f32 %v2736_v16, %v5160_v61 }
 0x132   :  { %v2805_v59 = vadd.f32 %v2804_v28, %v2022_v21  ;;  %v4008_v32 = vpop.eup %4007  ;;  %v2029_v33 = vsel %vm2027_vm4, %v2028_v60, %v2026_v3  ;;  %688 = vst [vmem:[#allocation3 + $0x68] sm:$0xff] %v422_v15  ;;  %v1653_v45 = vmul.f32 %v1387_v47, %v1387_v47  ;;  %687 = vst [vmem:[#allocation3 + $0x60] sm:$0xff] %v417_v35  ;;  %vm2039_vm5 = vcmp.eq.f32.partialorder %v5148_v1, inf }
 0x133   :  { %v2675_v10 = vmul.f32 %v5123_v44, %v5123_v44  ;;  %v5177_v49 = vsub.f32 %v422_v15, %v1387_v47  ;;  %v3224_v51 = vmul.f32 %v417_v35, %v417_v35  ;;  %v3286_v36 = vadd.f32 %v3285_v27, %v5120_v0 }
 0x134   :  { %v2806_v40 = vadd.f32 %v2805_v59, %v2029_v33  ;;  %v1717_v14 = vmul.f32 3.0, %v1653_v45  ;;  %v2421_v26 = vadd.f32 1e-12, %v1653_v45  ;;  %v1382_v28 = vadd.f32 %v4779_v13, %v4942_v55  ;;  %v5199_v33 = vpop.f32.mrb[32].mxu1 }
 0x135   :  { %v4010_v41 = vpop.eup %4009  ;;  %v2495_v16 = vmul.f32 %v4008_v32, %v5148_v1  ;;  %v5185_v43 = vmul.f32 %v5177_v49, %v422_v15  ;;  %v2738_v25 = vadd.f32 %v2737_v56, %v5148_v1  ;;  %v2948_v22 = vadd.f32 %v2947_v2, %v2675_v10  ;;  %v5197_v32 = vpop.f32.mrb[32].mxu0 }
 0x136   :  { %v2493_v12 = vmul.f32 %v4010_v41, %v5160_v61  ;;  %v1781_v60 = vmul.f32 0.33333334, %v1717_v14  ;;  %4015 = vrcp.f32 %v2421_v26  ;;  %v3287_v20 = vadd.f32 %v3286_v36, %v3224_v51  ;;  %v5207_v26 = vpop.f32.mrb[33].mxu0  ;;  %v5209_v36 = vpop.f32.mrb[33].mxu1 }
 0x137   :  { %v1652_v0 = vmul.f32 %v1382_v28, %v1382_v28  ;;  %v2612_v27 = vsub.f32 %v417_v35, %v1382_v28  ;;  %v3018_v55 = vadd.f32 %v3017_v42, %v5123_v44  ;;  %v3152_v3 = vadd.f32 %v3151_v62, %v5135_v38 }
 0x138   :  { %v2877_v21 = vadd.f32 %v2876_v53, %v2493_v12  ;;  %v1845_v47 = vsub.f32 %v1781_v60, %v1653_v45  ;;  %v5193_v59 = vadd.f32 %v4858_v29, %v4779_v13  ;;  %v1397_v2 = vadd.f32 %v4964_v17, %v4779_v13 }
 0x139   :  { %v4012_v48 = vpop.eup %4011  ;;  %v1716_v10 = vmul.f32 3.0, %v1652_v0  ;;  %v2420_v44 = vadd.f32 1e-12, %v1652_v0  ;;  %v2676_v42 = vmul.f32 %v2612_v27, %v2612_v27  ;;  %v3019_v62 = vadd.f32 %v3018_v55, %v2612_v27 }
 0x13a   :  { %v2038_v56 = vmul.f32 %v4012_v48, %v5148_v1  ;;  %v5202_v38 = vmax.f32 %v1845_v47, 0.0  ;;  %v5204_v53 = vadd.f32 %v2877_v21, %v2495_v16  ;;  %v3090_v45 = vmul.f32 %v2612_v27, %v417_v35  ;;  %690 = vst [vmem:[#allocation3 + $0x78] sm:$0xff] %v5193_v59 }
 0x13b   :  { %v4014_v29 = vpop.eup %4013  ;;  %v3225_v51 = vmul.f32 %v422_v15, %v422_v15  ;;  %v1780_v17 = vmul.f32 0.33333334, %v1716_v10  ;;  %4017 = vrcp.f32 %v2420_v44  ;;  %v2949_v14 = vadd.f32 %v2948_v22, %v2676_v42 }
 0x13c   :  { %v2042_v28 = vand.u32 2147483648, %v5148_v1  ;;  %v2031_v41 = vmul.f32 %v4014_v29, %v5160_v61  ;;  %vm2032_vm6 = vcmp.eq.f32.partialorder %v5160_v61, inf  ;;  %4019 = vrsqrt.f32 %v5202_v38 }
 0x13d   :  { %vm2034_vm7 = vcmp.eq.f32.partialorder %v5160_v61, 0.0  ;;  %v2035_v35 = vand.u32 2147483648, %v5160_v61  ;;  %v1844_v15 = vsub.f32 %v1780_v17, %v1652_v0  ;;  %v3153_v16 = vadd.f32 %v3152_v3, %v3090_v45 }
 0x13e   :  { %v2040_v22 = vsel %vm2039_vm5, %v5148_v1, %v2038_v56  ;;  %v2033_v12 = vsel %vm2032_vm6, %v5160_v61, %v2031_v41  ;;  %v1655_v60 = vmul.f32 %v1397_v2, %v1397_v2  ;;  %v5222_v27 = vsub.f32 %v5193_v59, %v1397_v2 }
 0x13f   :  { %v2036_v55 = vsel %vm2034_vm7, %v2035_v35, %v2033_v12  ;;  %v5224_v48 = vmax.f32 %v1844_v15, 0.0  ;;  %v427_v21 = vadd.f32 %v4779_v13, %v4862_v34  ;;  %v3288_v47 = vadd.f32 %v3287_v20, %v3225_v51 }
 0x140   :  { %v4016_v10 = vpop.eup %4015  ;;  %vm2041_vm8 = vcmp.eq.f32.partialorder %v5148_v1, 0.0  ;;  %v2807_v0 = vadd.f32 %v2806_v40, %v2036_v55  ;;  %v1719_v3 = vmul.f32 3.0, %v1655_v60  ;;  %v2677_v61 = vmul.f32 %v5177_v49, %v5177_v49 }
 0x141   :  { %v2043_v44 = vsel %vm2041_vm8, %v2042_v28, %v2040_v22  ;;  %4021 = vrsqrt.f32 %v5224_v48  ;;  %689 = vst [vmem:[#allocation3 + $0x70] sm:$0xff] %v427_v21  ;;  %v2739_v2 = vadd.f32 %v2738_v25, %v5224_v48  ;;  %v2423_v45 = vadd.f32 1e-12, %v1655_v60 }
 0x142   :  { %v5233_v56 = vadd.f32 %v2807_v0, %v2043_v44  ;;  %v1783_v42 = vmul.f32 0.33333334, %v1719_v3  ;;  %v5237_v34 = vmul.f32 %v5222_v27, %v5193_v59  ;;  %v3226_v1 = vmul.f32 %v427_v21, %v427_v21 }
 0x143   :  { %v1392_v40 = vadd.f32 %v4779_v13, %v4968_v39  ;;  %v2740_v29 = vadd.f32 %v2739_v2, %v5202_v38  ;;  %v2950_v51 = vadd.f32 %v2949_v14, %v2677_v61  ;;  %v3020_v17 = vadd.f32 %v3019_v62, %v5177_v49  ;;  %v5252_v14 = vpop.f32.mrb[34].mxu1 }
 0x144   :  { %v1847_v20 = vsub.f32 %v1783_v42, %v1655_v60  ;;  %v3289_v25 = vadd.f32 %v3288_v47, %v3226_v1  ;;  %v3154_v15 = vadd.f32 %v3153_v16, %v5185_v43  ;;  %vm2053_vm9 = vcmp.eq.f32.partialorder %v5202_v38, inf  ;;  %v5250_v60 = vpop.f32.mrb[34].mxu0 }
 0x145   :  { %v4018_v28 = vpop.eup %4017  ;;  %v1654_v41 = vmul.f32 %v1392_v40, %v1392_v40  ;;  %v2614_v35 = vsub.f32 %v427_v21, %v1392_v40  ;;  %v442_v39 = vadd.f32 %v4874_v46, %v4779_v13  ;;  %v1407_v43 = vadd.f32 %v4984_v9, %v4779_v13 }
 0x146   :  { %v4020_v22 = vpop.eup %4019  ;;  %v2497_v12 = vmul.f32 %v4018_v28, %v5224_v48  ;;  %v5246_v55 = vmax.f32 %v1847_v20, 0.0  ;;  %v2499_v16 = vmul.f32 %v4016_v10, %v5202_v38  ;;  %v3227_v3 = vmul.f32 %v5193_v59, %v5193_v59  ;;  %v5264_v59 = vpop.f32.mrb[35].mxu0  ;;  %v5274_v28 = vld [vmem:[%s6499_s4] ss:$0 sm:$0xff] }
 0x147   :  { %v1718_v49 = vmul.f32 3.0, %v1654_v41  ;;  %v2422_v62 = vadd.f32 1e-12, %v1654_v41  ;;  %v2678_v47 = vmul.f32 %v2614_v35, %v2614_v35  ;;  %4023 = vrcp.f32 %v2423_v45  ;;  %692 = vst [vmem:[#allocation3 + $0x88] sm:$0xff] %v442_v39  ;;  %v5266_v45 = vpop.f32.mrb[35].mxu1 }
 0x148   :  { %v2879_v0 = vadd.f32 %v5204_v53, %v2497_v12  ;;  %v2052_v46 = vmul.f32 %v4020_v22, %v5202_v38  ;;  %vm2046_vm10 = vcmp.eq.f32.partialorder %v5224_v48, inf  ;;  %v3021_v13 = vadd.f32 %v3020_v17, %v2614_v35 }
 0x149   :  { %v1782_v44 = vmul.f32 0.33333334, %v1718_v49  ;;  %4025 = vrcp.f32 %v2422_v62  ;;  %v2951_v2 = vadd.f32 %v2950_v51, %v2678_v47  ;;  %v2049_v10 = vand.u32 2147483648, %v5224_v48 }
 0x14a   :  { %4027 = vrsqrt.f32 %v5246_v55  ;;  %v2880_v61 = vadd.f32 %v2879_v0, %v2499_v16  ;;  %v3092_v42 = vmul.f32 %v2614_v35, %v427_v21  ;;  %v1657_v1 = vmul.f32 %v1407_v43, %v1407_v43 }
 0x14b   :  { %v4022_v9 = vpop.eup %4021  ;;  %v1846_v53 = vsub.f32 %v1782_v44, %v1654_v41  ;;  %v5269_v20 = vsub.f32 %v442_v39, %v1407_v43  ;;  %v437_v51 = vadd.f32 %v5274_v28, %v4878_v50  ;;  %v3290_v17 = vadd.f32 %v3289_v25, %v3227_v3 }
 0x14c   :  { %v2045_v40 = vmul.f32 %v4022_v9, %v5224_v48  ;;  %v2054_v21 = vsel %vm2053_vm9, %v5202_v38, %v2052_v46  ;;  %v3155_v35 = vadd.f32 %v3154_v15, %v3092_v42  ;;  %v1721_v22 = vmul.f32 3.0, %v1657_v1 }
 0x14d   :  { %v5281_v41 = vmax.f32 %v1846_v53, 0.0  ;;  %v2056_v12 = vand.u32 2147483648, %v5202_v38  ;;  %vm2048_vm11 = vcmp.eq.f32.partialorder %v5224_v48, 0.0  ;;  %v5289_v62 = vmul.f32 %v5269_v20, %v442_v39  ;;  %691 = vst [vmem:[#allocation3 + $0x80] sm:$0xff] %v437_v51 }
 0x14e   :  { %v2047_v49 = vsel %vm2046_vm10, %v5224_v48, %v2045_v40  ;;  %vm2055_vm12 = vcmp.eq.f32.partialorder %v5202_v38, 0.0  ;;  %v2679_v25 = vmul.f32 %v5222_v27, %v5222_v27  ;;  %v1785_v16 = vmul.f32 0.33333334, %v1721_v22  ;;  %v5302_v22 = vpop.f32.mrb[36].mxu0 }
 0x14f   :  { %v2050_v50 = vsel %vm2048_vm11, %v2049_v10, %v2047_v49  ;;  %4029 = vrsqrt.f32 %v5281_v41  ;;  %v2057_v15 = vsel %vm2055_vm12, %v2056_v12, %v2054_v21  ;;  %v2741_v43 = vadd.f32 %v2740_v29, %v5281_v41 }
 0x150   :  { %v2809_v47 = vadd.f32 %v5233_v56, %v2050_v50  ;;  %v2425_v0 = vadd.f32 1e-12, %v1657_v1  ;;  %v3228_v48 = vmul.f32 %v437_v51, %v437_v51  ;;  %v1402_v3 = vadd.f32 %v5274_v28, %v4990_v58 }
 0x151   :  { %v2952_v46 = vadd.f32 %v2951_v2, %v2679_v25  ;;  %v4024_v44 = vpop.eup %4023  ;;  %v1849_v9 = vsub.f32 %v1785_v16, %v1657_v1  ;;  %v2742_v10 = vadd.f32 %v2741_v43, %v5246_v55  ;;  %v3022_v53 = vadd.f32 %v3021_v13, %v5222_v27  ;;  %v5310_v27 = vpop.f32.mrb[36].mxu1 }
 0x152   :  { %v2810_v38 = vadd.f32 %v2809_v47, %v2057_v15  ;;  %vm2067_vm13 = vcmp.eq.f32.partialorder %v5246_v55, inf  ;;  %v3229_v56 = vmul.f32 %v442_v39, %v442_v39  ;;  %v3291_v40 = vadd.f32 %v3290_v17, %v3228_v48 }
 0x153   :  { %v4026_v42 = vpop.eup %4025  ;;  %v1656_v29 = vmul.f32 %v1402_v3, %v1402_v3  ;;  %v2616_v21 = vsub.f32 %v437_v51, %v1402_v3  ;;  %v5305_v2 = vmax.f32 %v1849_v9, 0.0  ;;  %v3156_v1 = vadd.f32 %v3155_v35, %v5237_v34  ;;  %v5324_v9 = vpop.f32.mrb[37].mxu1 }
 0x154   :  { %v4028_v12 = vpop.eup %4027  ;;  %v2501_v58 = vmul.f32 %v4026_v42, %v5281_v41  ;;  %v452_v49 = vadd.f32 %v5274_v28, %v4891_v6  ;;  %4031 = vrcp.f32 %v2425_v0  ;;  %v2503_v50 = vmul.f32 %v4024_v44, %v5246_v55  ;;  %v5322_v44 = vpop.f32.mrb[37].mxu0  ;;  %6514 = vst [vmem:[#allocation21_spill] sm:$0xff] %v5324_v9 }
 0x155   :  { %v1720_v13 = vmul.f32 3.0, %v1656_v29  ;;  %v2424_v39 = vadd.f32 1e-12, %v1656_v29  ;;  %v2680_v17 = vmul.f32 %v2616_v21, %v2616_v21  ;;  %vm2060_vm14 = vcmp.eq.f32.partialorder %v5281_v41, inf  ;;  %6513 = vst [vmem:[#allocation20_spill] sm:$0xff] %v5322_v44 }
 0x156   :  { %v2881_v25 = vadd.f32 %v2880_v61, %v2501_v58  ;;  %4033 = vrsqrt.f32 %v5305_v2  ;;  %694 = vst [vmem:[#allocation3 + $0x98] sm:$0xff] %v452_v49  ;;  %v2066_v15 = vmul.f32 %v4028_v12, %v5246_v55  ;;  %vm2062_vm15 = vcmp.eq.f32.partialorder %v5281_v41, 0.0 }
 0x157   :  { %v1784_v34 = vmul.f32 0.33333334, %v1720_v13  ;;  %4035 = vrcp.f32 %v2424_v39  ;;  %v2953_v35 = vadd.f32 %v2952_v46, %v2680_v17  ;;  %v3023_v47 = vadd.f32 %v3022_v53, %v2616_v21 }
 0x158   :  { %v2882_v6 = vadd.f32 %v2881_v25, %v2503_v50  ;;  %v3094_v43 = vmul.f32 %v2616_v21, %v437_v51  ;;  %v2063_v0 = vand.u32 2147483648, %v5281_v41  ;;  %v1417_v61 = vadd.f32 %v5274_v28, %v5005_v19 }
 0x159   :  { %v4030_v16 = vpop.eup %4029  ;;  %v1848_v48 = vsub.f32 %v1784_v34, %v1656_v29  ;;  %v447_v3 = vadd.f32 %v5274_v28, %v4898_v11  ;;  %v3292_v46 = vadd.f32 %v3291_v40, %v3229_v56  ;;  %v1412_v51 = vadd.f32 %v5274_v28, %v5010_v18 }
 0x15a   :  { %v2059_v42 = vmul.f32 %v4030_v16, %v5281_v41  ;;  %v3157_v12 = vadd.f32 %v3156_v1, %v3094_v43  ;;  %v1659_v29 = vmul.f32 %v1417_v61, %v1417_v61  ;;  %v5331_v21 = vsub.f32 %v452_v49, %v1417_v61 }
 0x15b   :  { %v5329_v53 = vmax.f32 %v1848_v48, 0.0  ;;  %693 = vst [vmem:[#allocation3 + $0x90] sm:$0xff] %v447_v3  ;;  %v3230_v19 = vmul.f32 %v447_v3, %v447_v3  ;;  %v2068_v11 = vsel %vm2067_vm13, %v5246_v55, %v2066_v15  ;;  %v1658_v1 = vmul.f32 %v1412_v51, %v1412_v51 }
 0x15c   :  { %v2061_v58 = vsel %vm2060_vm14, %v5281_v41, %v2059_v42  ;;  %v2618_v56 = vsub.f32 %v447_v3, %v1412_v51  ;;  %vm2069_vm0 = vcmp.eq.f32.partialorder %v5246_v55, 0.0  ;;  %v2070_v18 = vand.u32 2147483648, %v5246_v55 }
 0x15d   :  { %v2064_v40 = vsel %vm2062_vm15, %v2063_v0, %v2061_v58  ;;  %4037 = vrsqrt.f32 %v5329_v53  ;;  %v2681_v39 = vmul.f32 %v5269_v20, %v5269_v20  ;;  %v2743_v17 = vadd.f32 %v2742_v10, %v5329_v53  ;;  %v5352_v58 = vpop.f32.mrb[38].mxu0 }
 0x15e   :  { %v2811_v13 = vadd.f32 %v2810_v38, %v2064_v40  ;;  %v1723_v50 = vmul.f32 3.0, %v1659_v29  ;;  %v4032_v25 = vpop.eup %4031  ;;  %v2071_v15 = vsel %vm2069_vm0, %v2070_v18, %v2068_v11  ;;  %v2427_v34 = vadd.f32 1e-12, %v1659_v29  ;;  %6515 = vst [vmem:[#allocation22_spill] sm:$0xff] %v5352_v58 }
 0x15f   :  { %v5348_v43 = vmul.f32 %v5331_v21, %v452_v49  ;;  %v3293_v16 = vadd.f32 %v3292_v46, %v3230_v19  ;;  %vm2081_vm1 = vcmp.eq.f32.partialorder %v5305_v2, inf  ;;  %v1722_v48 = vmul.f32 3.0, %v1658_v1  ;;  %v5355_v46 = vpop.f32.mrb[38].mxu1 }
 0x160   :  { %v4034_v55 = vpop.eup %4033  ;;  %v2812_v41 = vadd.f32 %v2811_v13, %v2071_v15  ;;  %v1787_v0 = vmul.f32 0.33333334, %v1723_v50  ;;  %v2426_v38 = vadd.f32 1e-12, %v1658_v1  ;;  %v3231_v42 = vmul.f32 %v452_v49, %v452_v49 }
 0x161   :  { %v4036_v61 = vpop.eup %4035  ;;  %4039 = vrcp.f32 %v2427_v34  ;;  %v2682_v51 = vmul.f32 %v2618_v56, %v2618_v56  ;;  %v2744_v10 = vadd.f32 %v2743_v17, %v5305_v2  ;;  %v1786_v40 = vmul.f32 0.33333334, %v1722_v48 }
 0x162   :  { %v2505_v11 = vmul.f32 %v4036_v61, %v5329_v53  ;;  %v1851_v18 = vsub.f32 %v1787_v0, %v1659_v29  ;;  %4041 = vrcp.f32 %v2426_v38  ;;  %v2507_v19 = vmul.f32 %v4032_v25, %v5305_v2 }
 0x163   :  { %v2954_v13 = vadd.f32 %v2953_v35, %v2681_v39  ;;  %v3024_v50 = vadd.f32 %v3023_v47, %v5269_v20  ;;  %v3096_v15 = vmul.f32 %v2618_v56, %v447_v3  ;;  %v2080_v49 = vmul.f32 %v4034_v55, %v5305_v2 }
 0x164   :  { %v2883_v34 = vadd.f32 %v2882_v6, %v2505_v11  ;;  %v5360_v9 = vmax.f32 %v1851_v18, 0.0  ;;  %v1850_v17 = vsub.f32 %v1786_v40, %v1658_v1  ;;  %v3158_v29 = vadd.f32 %v3157_v12, %v5289_v62  ;;  %v5372_v62 = vpop.f32.mrb[39].mxu0  ;;  %v5374_v12 = vpop.f32.mrb[39].mxu1 }
 0x165   :  { %v2955_v58 = vadd.f32 %v2954_v13, %v2682_v51  ;;  %v3025_v44 = vadd.f32 %v3024_v50, %v2618_v56  ;;  %v462_v0 = vadd.f32 %v5274_v28, %v4917_v24  ;;  %vm2083_vm2 = vcmp.eq.f32.partialorder %v5305_v2, 0.0 }
 0x166   :  { %v2084_v35 = vand.u32 2147483648, %v5305_v2  ;;  %vm2074_vm3 = vcmp.eq.f32.partialorder %v5329_v53, inf  ;;  %4043 = vrsqrt.f32 %v5360_v9  ;;  %vm2076_vm4 = vcmp.eq.f32.partialorder %v5329_v53, 0.0 }
 0x167   :  { %v4038_v20 = vpop.eup %4037  ;;  %v5370_v6 = vmax.f32 %v1850_v17, 0.0  ;;  %v2884_v47 = vadd.f32 %v2883_v34, %v2507_v19  ;;  %v3159_v3 = vadd.f32 %v3158_v29, %v3096_v15  ;;  %696 = vst [vmem:[#allocation3 + $0xa8] sm:$0xff] %v462_v0  ;;  %v1427_v1 = vadd.f32 %v5274_v28, %v5021_v23 }
 0x168   :  { %v2073_v24 = vmul.f32 %v4038_v20, %v5329_v53  ;;  %v457_v56 = vadd.f32 %v5274_v28, %v4925_v37  ;;  %v3294_v39 = vadd.f32 %v3293_v16, %v3231_v42  ;;  %v2082_v25 = vsel %vm2081_vm1, %v5305_v2, %v2080_v49 }
 0x169   :  { %v2077_v55 = vand.u32 2147483648, %v5329_v53  ;;  %v2683_v48 = vmul.f32 %v5331_v21, %v5331_v21  ;;  %4045 = vrsqrt.f32 %v5370_v6  ;;  %v2745_v23 = vadd.f32 %v2744_v10, %v5370_v6 }
 0x16a   :  { %v2075_v38 = vsel %vm2074_vm3, %v5329_v53, %v2073_v24  ;;  %v1661_v61 = vmul.f32 %v1427_v1, %v1427_v1  ;;  %v5392_v37 = vsub.f32 %v462_v0, %v1427_v1  ;;  %695 = vst [vmem:[#allocation3 + $0xa0] sm:$0xff] %v457_v56  ;;  %v3232_v51 = vmul.f32 %v457_v56, %v457_v56 }
 0x16b   :  { %v4040_v16 = vpop.eup %4039  ;;  %v2078_v42 = vsel %vm2076_vm4, %v2077_v55, %v2075_v38  ;;  %v1422_v11 = vadd.f32 %v5274_v28, %v5028_v57  ;;  %v2956_v18 = vadd.f32 %v2955_v58, %v2683_v48  ;;  %v2085_v19 = vsel %vm2083_vm2, %v2084_v35, %v2082_v25  ;;  %v5409_v38 = vpop.f32.mrb[40].mxu0 }
 0x16c   :  { %v4042_v40 = vpop.eup %4041  ;;  %v2813_v13 = vadd.f32 %v2812_v41, %v2078_v42  ;;  %v3233_v50 = vmul.f32 %v462_v0, %v462_v0  ;;  %v1725_v10 = vmul.f32 3.0, %v1661_v61  ;;  %vm2095_vm5 = vcmp.eq.f32.partialorder %v5360_v9, inf }
 0x16d   :  { %v2511_v15 = vmul.f32 %v4040_v16, %v5360_v9  ;;  %v2509_v49 = vmul.f32 %v4042_v40, %v5370_v6  ;;  %v5404_v53 = vmul.f32 %v5392_v37, %v462_v0  ;;  %v3295_v34 = vadd.f32 %v3294_v39, %v3232_v51  ;;  %v5411_v0 = vpop.f32.mrb[40].mxu1 }
 0x16e   :  { %v2814_v17 = vadd.f32 %v2813_v13, %v2085_v19  ;;  %v1789_v57 = vmul.f32 0.33333334, %v1725_v10  ;;  %v2429_v58 = vadd.f32 1e-12, %v1661_v61  ;;  %v1660_v29 = vmul.f32 %v1422_v11, %v1422_v11  ;;  %v5420_v19 = vpop.f32.mrb[41].mxu0  ;;  %v5422_v13 = vpop.f32.mrb[41].mxu1 }
 0x16f   :  { %v2885_v20 = vadd.f32 %v2884_v47, %v2509_v49  ;;  %v2620_v2 = vsub.f32 %v457_v56, %v1422_v11  ;;  %v2746_v41 = vadd.f32 %v2745_v23, %v5360_v9  ;;  %v3026_v35 = vadd.f32 %v3025_v44, %v5331_v21  ;;  %v6516_v11 = vld [vmem:[#allocation9_spill] sm:$0xff] }
 0x170   :  { %v4044_v24 = vpop.eup %4043  ;;  %v1853_v1 = vsub.f32 %v1789_v57, %v1661_v61  ;;  %v1724_v25 = vmul.f32 3.0, %v1660_v29  ;;  %v2428_v55 = vadd.f32 1e-12, %v1660_v29  ;;  %v3160_v48 = vadd.f32 %v3159_v3, %v5348_v43  ;;  %v6517_v3 = vld [vmem:[#allocation15_spill] sm:$0xff]  ;;  %6518 = vst [vmem:[#allocation9_spill] sm:$0xff] %v5422_v13 }
 0x171   :  { %v2094_v39 = vmul.f32 %v4044_v24, %v5360_v9  ;;  %v2684_v16 = vmul.f32 %v2620_v2, %v2620_v2  ;;  %v2886_v42 = vadd.f32 %v2885_v20, %v2511_v15  ;;  %v3027_v47 = vadd.f32 %v3026_v35, %v2620_v2 }
 0x172   :  { %v5414_v51 = vmax.f32 %v1853_v1, 0.0  ;;  %v1788_v23 = vmul.f32 0.33333334, %v1724_v25  ;;  %4047 = vrcp.f32 %v2428_v55  ;;  %v3098_v44 = vmul.f32 %v2620_v2, %v457_v56  ;;  %v6519_v1 = vld [vmem:[#allocation10_spill] sm:$0xff] }
 0x173   :  { %v4046_v21 = vpop.eup %4045  ;;  %4049 = vrcp.f32 %v2429_v58  ;;  %v2957_v61 = vadd.f32 %v2956_v18, %v2684_v16  ;;  %v472_v43 = vadd.f32 %v5274_v28, %v6516_v11  ;;  %v1437_v40 = vadd.f32 %v5274_v28, %v6517_v3 }
 0x174   :  { %v2098_v10 = vand.u32 2147483648, %v5360_v9  ;;  %v2087_v15 = vmul.f32 %v4046_v21, %v5370_v6  ;;  %vm2088_vm6 = vcmp.eq.f32.partialorder %v5370_v6, inf  ;;  %4051 = vrsqrt.f32 %v5414_v51 }
 0x175   :  { %vm2090_vm7 = vcmp.eq.f32.partialorder %v5370_v6, 0.0  ;;  %v2091_v56 = vand.u32 2147483648, %v5370_v6  ;;  %v1852_v18 = vsub.f32 %v1788_v23, %v1660_v29  ;;  %v3161_v49 = vadd.f32 %v3160_v48, %v3098_v44  ;;  %698 = vst [vmem:[#allocation3 + $0xb8] sm:$0xff] %v472_v43 }
 0x176   :  { %v2096_v57 = vsel %vm2095_vm5, %v5360_v9, %v2094_v39  ;;  %v2089_v58 = vsel %vm2088_vm6, %v5370_v6, %v2087_v15  ;;  %v1663_v20 = vmul.f32 %v1437_v40, %v1437_v40  ;;  %v5434_v2 = vsub.f32 %v472_v43, %v1437_v40 }
 0x177   :  { %v2092_v35 = vsel %vm2090_vm7, %v2091_v56, %v2089_v58  ;;  %v5436_v24 = vmax.f32 %v1852_v18, 0.0  ;;  %v467_v25 = vadd.f32 %v5274_v28, %v6519_v1  ;;  %v3296_v55 = vadd.f32 %v3295_v34, %v3233_v50 }
 0x178   :  { %vm2097_vm8 = vcmp.eq.f32.partialorder %v5360_v9, 0.0  ;;  %v2815_v29 = vadd.f32 %v2814_v17, %v2092_v35  ;;  %v1727_v48 = vmul.f32 3.0, %v1663_v20  ;;  %v2685_v6 = vmul.f32 %v5392_v37, %v5392_v37  ;;  %v6520_v9 = vld [vmem:[#allocation16_spill] sm:$0xff] }
 0x179   :  { %v2099_v16 = vsel %vm2097_vm8, %v2098_v10, %v2096_v57  ;;  %4053 = vrsqrt.f32 %v5436_v24  ;;  %697 = vst [vmem:[#allocation3 + $0xb0] sm:$0xff] %v467_v25  ;;  %v2747_v39 = vadd.f32 %v2746_v41, %v5436_v24  ;;  %v2431_v21 = vadd.f32 1e-12, %v1663_v20 }
 0x17a   :  { %v5445_v23 = vadd.f32 %v2815_v29, %v2099_v16  ;;  %v1791_v44 = vmul.f32 0.33333334, %v1727_v48  ;;  %v5448_v11 = vmul.f32 %v5434_v2, %v472_v43  ;;  %v3234_v50 = vmul.f32 %v467_v25, %v467_v25  ;;  %v6521_v48 = vld [vmem:[#allocation11_spill] sm:$0xff]  ;;  %v5461_v16 = vpop.f32.mrb[42].mxu0 }
 0x17b   :  { %v1432_v34 = vadd.f32 %v5274_v28, %v6520_v9  ;;  %v2748_v40 = vadd.f32 %v2747_v39, %v5414_v51  ;;  %v2958_v10 = vadd.f32 %v2957_v61, %v2685_v6  ;;  %v3028_v15 = vadd.f32 %v3027_v47, %v5392_v37  ;;  %6522 = vst [vmem:[#allocation15_spill] sm:$0xff] %v5461_v16  ;;  %v5463_v61 = vpop.f32.mrb[42].mxu1 }
 0x17c   :  { %v4048_v17 = vpop.eup %4047  ;;  %v1855_v3 = vsub.f32 %v1791_v44, %v1663_v20  ;;  %v3297_v18 = vadd.f32 %v3296_v55, %v3234_v50  ;;  %vm2109_vm9 = vcmp.eq.f32.partialorder %v5414_v51, inf  ;;  %v3162_v29 = vadd.f32 %v3161_v49, %v5404_v53  ;;  %6523 = vst [vmem:[#allocation10_spill] sm:$0xff] %v5463_v61  ;;  %v6524_v55 = vld [vmem:[#allocation17_spill] sm:$0xff]  ;;  %v5472_v61 = vpop.f32.mrb[43].mxu0 }
 0x17d   :  { %v4050_v56 = vpop.eup %4049  ;;  %v2513_v41 = vmul.f32 %v4048_v17, %v5436_v24  ;;  %v1662_v57 = vmul.f32 %v1432_v34, %v1432_v34  ;;  %v2622_v58 = vsub.f32 %v467_v25, %v1432_v34  ;;  %v482_v20 = vadd.f32 %v5274_v28, %v6521_v48  ;;  %6525 = vst [vmem:[#allocation16_spill] sm:$0xff] %v5472_v61 }
 0x17e   :  { %v4052_v35 = vpop.eup %4051  ;;  %v5456_v1 = vmax.f32 %v1855_v3, 0.0  ;;  %v1447_v39 = vadd.f32 %v5274_v28, %v6524_v55  ;;  %v2515_v44 = vmul.f32 %v4050_v56, %v5414_v51  ;;  %vm2102_vm10 = vcmp.eq.f32.partialorder %v5436_v24, inf }
 0x17f   :  { %v2887_v37 = vadd.f32 %v2886_v42, %v2513_v41  ;;  %v1726_v47 = vmul.f32 3.0, %v1662_v57  ;;  %v2430_v6 = vadd.f32 1e-12, %v1662_v57  ;;  %v3235_v50 = vmul.f32 %v472_v43, %v472_v43  ;;  %700 = vst [vmem:[#allocation3 + $0xc8] sm:$0xff] %v482_v20  ;;  %v5474_v43 = vpop.f32.mrb[43].mxu1 }
 0x180   :  { %4055 = vrcp.f32 %v2431_v21  ;;  %v2108_v53 = vmul.f32 %v4052_v35, %v5414_v51  ;;  %v2686_v9 = vmul.f32 %v2622_v58, %v2622_v58  ;;  %v3029_v34 = vadd.f32 %v3028_v15, %v2622_v58  ;;  %6526 = vst [vmem:[#allocation11_spill] sm:$0xff] %v5474_v43 }
 0x181   :  { %v1790_v49 = vmul.f32 0.33333334, %v1726_v47  ;;  %4057 = vrcp.f32 %v2430_v6  ;;  %v2888_v42 = vadd.f32 %v2887_v37, %v2515_v44  ;;  %v3100_v17 = vmul.f32 %v2622_v58, %v467_v25  ;;  %v6527_v6 = vld [vmem:[#allocation12_spill] sm:$0xff] }
 0x182   :  { %4059 = vrsqrt.f32 %v5456_v1  ;;  %v2105_v41 = vand.u32 2147483648, %v5436_v24  ;;  %v2959_v56 = vadd.f32 %v2958_v10, %v2686_v9  ;;  %v1665_v55 = vmul.f32 %v1447_v39, %v1447_v39 }
 0x183   :  { %v4054_v3 = vpop.eup %4053  ;;  %v1854_v48 = vsub.f32 %v1790_v49, %v1662_v57  ;;  %v3163_v35 = vadd.f32 %v3162_v29, %v3100_v17  ;;  %v5477_v47 = vsub.f32 %v482_v20, %v1447_v39  ;;  %v477_v37 = vadd.f32 %v5274_v28, %v6527_v6 }
 0x184   :  { %v2101_v21 = vmul.f32 %v4054_v3, %v5436_v24  ;;  %v2110_v25 = vsel %vm2109_vm9, %v5414_v51, %v2108_v53  ;;  %v1729_v10 = vmul.f32 3.0, %v1665_v55  ;;  %v3298_v57 = vadd.f32 %v3297_v18, %v3235_v50  ;;  %v6528_v3 = vld [vmem:[#allocation18_spill] sm:$0xff] }
 0x185   :  { %v5484_v15 = vmax.f32 %v1854_v48, 0.0  ;;  %v2112_v58 = vand.u32 2147483648, %v5414_v51  ;;  %vm2104_vm11 = vcmp.eq.f32.partialorder %v5436_v24, 0.0  ;;  %v5492_v29 = vmul.f32 %v5477_v47, %v482_v20  ;;  %699 = vst [vmem:[#allocation3 + $0xc0] sm:$0xff] %v477_v37 }
 0x186   :  { %v2103_v44 = vsel %vm2102_vm10, %v5436_v24, %v2101_v21  ;;  %vm2111_vm12 = vcmp.eq.f32.partialorder %v5414_v51, 0.0  ;;  %v2687_v53 = vmul.f32 %v5434_v2, %v5434_v2  ;;  %v1793_v9 = vmul.f32 0.33333334, %v1729_v10 }
 0x187   :  { %v2106_v39 = vsel %vm2104_vm11, %v2105_v41, %v2103_v44  ;;  %4061 = vrsqrt.f32 %v5484_v15  ;;  %v2113_v18 = vsel %vm2111_vm12, %v2112_v58, %v2110_v25  ;;  %v2749_v49 = vadd.f32 %v2748_v40, %v5484_v15  ;;  %v5505_v58 = vpop.f32.mrb[44].mxu0 }
 0x188   :  { %v2817_v50 = vadd.f32 %v5445_v23, %v2106_v39  ;;  %v2433_v17 = vadd.f32 1e-12, %v1665_v55  ;;  %v3236_v24 = vmul.f32 %v477_v37, %v477_v37  ;;  %v1442_v48 = vadd.f32 %v5274_v28, %v6528_v3  ;;  %6529 = vst [vmem:[#allocation17_spill] sm:$0xff] %v5505_v58 }
 0x189   :  { %v2960_v21 = vadd.f32 %v2959_v56, %v2687_v53  ;;  %v1857_v41 = vsub.f32 %v1793_v9, %v1665_v55  ;;  %v2750_v44 = vadd.f32 %v2749_v49, %v5456_v1  ;;  %v3030_v43 = vadd.f32 %v3029_v34, %v5434_v2  ;;  %v6530_v53 = vld [vmem:[#allocation13_spill] sm:$0xff]  ;;  %v5513_v2 = vpop.f32.mrb[44].mxu1 }
 0x18a   :  { %v4056_v6 = vpop.eup %4055  ;;  %v2818_v51 = vadd.f32 %v2817_v50, %v2113_v18  ;;  %vm2123_vm13 = vcmp.eq.f32.partialorder %v5456_v1, inf  ;;  %v3237_v23 = vmul.f32 %v482_v20, %v482_v20  ;;  %v3299_v25 = vadd.f32 %v3298_v57, %v3236_v24  ;;  %6531 = vst [vmem:[#allocation12_spill] sm:$0xff] %v5513_v2  ;;  %v5525_v2 = vpop.f32.mrb[45].mxu0 }
 0x18b   :  { %v4058_v61 = vpop.eup %4057  ;;  %v1664_v40 = vmul.f32 %v1442_v48, %v1442_v48  ;;  %v2624_v10 = vsub.f32 %v477_v37, %v1442_v48  ;;  %v5508_v56 = vmax.f32 %v1857_v41, 0.0  ;;  %v3164_v55 = vadd.f32 %v3163_v35, %v5448_v11  ;;  %6533 = vst [vmem:[#allocation18_spill] sm:$0xff] %v5525_v2  ;;  %v5555_v2 = vpop.f32.mrb[46].mxu0 }
 0x18c   :  { %v4060_v39 = vpop.eup %4059  ;;  %v2517_v3 = vmul.f32 %v4058_v61, %v5484_v15  ;;  %v492_v18 = vadd.f32 %v5274_v28, %v6530_v53  ;;  %4063 = vrcp.f32 %v2433_v17  ;;  %v2519_v50 = vmul.f32 %v4056_v6, %v5456_v1 }
 0x18d   :  { %v1728_v34 = vmul.f32 3.0, %v1664_v40  ;;  %v2432_v20 = vadd.f32 1e-12, %v1664_v40  ;;  %v2688_v57 = vmul.f32 %v2624_v10, %v2624_v10  ;;  %vm2116_vm14 = vcmp.eq.f32.partialorder %v5484_v15, inf }
 0x18e   :  { %v2889_v49 = vadd.f32 %v2888_v42, %v2517_v3  ;;  %4065 = vrsqrt.f32 %v5508_v56  ;;  %702 = vst [vmem:[#allocation3 + $0xd8] sm:$0xff] %v492_v18  ;;  %v2122_v61 = vmul.f32 %v4060_v39, %v5456_v1  ;;  %vm2118_vm15 = vcmp.eq.f32.partialorder %v5484_v15, 0.0  ;;  %v6532_v3 = vld [vmem:[#allocation14_spill] sm:$0xff]  ;;  %v5527_v39 = vpop.f32.mrb[45].mxu1 }
 0x18f   :  { %v1792_v11 = vmul.f32 0.33333334, %v1728_v34  ;;  %4067 = vrcp.f32 %v2432_v20  ;;  %v2961_v9 = vadd.f32 %v2960_v21, %v2688_v57  ;;  %v3031_v17 = vadd.f32 %v3030_v43, %v2624_v10  ;;  %6534 = vst [vmem:[#allocation13_spill] sm:$0xff] %v5527_v39  ;;  %6535 = vst [vmem:[#allocation14_spill] sm:$0xff] %v5555_v2 }
 0x190   :  { %v2890_v35 = vadd.f32 %v2889_v49, %v2519_v50  ;;  %v3102_v24 = vmul.f32 %v2624_v10, %v477_v37  ;;  %v2119_v41 = vand.u32 2147483648, %v5484_v15  ;;  %v1457_v42 = vadd.f32 %v5274_v28, %v5084_v30 }
 0x191   :  { %v4062_v48 = vpop.eup %4061  ;;  %v1856_v6 = vsub.f32 %v1792_v11, %v1664_v40  ;;  %v487_v53 = vadd.f32 %v5274_v28, %v6532_v3  ;;  %v3300_v21 = vadd.f32 %v3299_v25, %v3237_v23  ;;  %v1452_v43 = vadd.f32 %v5274_v28, %v5086_v4 }
 0x192   :  { %v2115_v34 = vmul.f32 %v4062_v48, %v5484_v15  ;;  %v3165_v20 = vadd.f32 %v3164_v55, %v3102_v24  ;;  %v1667_v40 = vmul.f32 %v1457_v42, %v1457_v42  ;;  %v5534_v10 = vsub.f32 %v492_v18, %v1457_v42 }
 0x193   :  { %v5532_v37 = vmax.f32 %v1856_v6, 0.0  ;;  %701 = vst [vmem:[#allocation3 + $0xd0] sm:$0xff] %v487_v53  ;;  %v3238_v30 = vmul.f32 %v487_v53, %v487_v53  ;;  %v2124_v57 = vsel %vm2123_vm13, %v5456_v1, %v2122_v61  ;;  %v1666_v55 = vmul.f32 %v1452_v43, %v1452_v43 }
 0x194   :  { %v2117_v50 = vsel %vm2116_vm14, %v5484_v15, %v2115_v34  ;;  %v2626_v23 = vsub.f32 %v487_v53, %v1452_v43  ;;  %vm2125_vm0 = vcmp.eq.f32.partialorder %v5456_v1, 0.0  ;;  %v2126_v4 = vand.u32 2147483648, %v5456_v1 }
 0x195   :  { %v2120_v25 = vsel %vm2118_vm15, %v2119_v41, %v2117_v50  ;;  %4069 = vrsqrt.f32 %v5532_v37  ;;  %v2689_v11 = vmul.f32 %v5477_v47, %v5477_v47  ;;  %v2751_v61 = vadd.f32 %v2750_v44, %v5532_v37 }
 0x196   :  { %v2819_v49 = vadd.f32 %v2818_v51, %v2120_v25  ;;  %v1731_v24 = vmul.f32 3.0, %v1667_v40  ;;  %v4064_v48 = vpop.eup %4063  ;;  %v2127_v6 = vsel %vm2125_vm0, %v2126_v4, %v2124_v57  ;;  %v2435_v42 = vadd.f32 1e-12, %v1667_v40 }
 0x197   :  { %v5551_v3 = vmul.f32 %v5534_v10, %v492_v18  ;;  %v3301_v34 = vadd.f32 %v3300_v21, %v3238_v30  ;;  %vm2137_vm1 = vcmp.eq.f32.partialorder %v5508_v56, inf  ;;  %v1730_v43 = vmul.f32 3.0, %v1666_v55  ;;  %v5558_v21 = vpop.f32.mrb[46].mxu1 }
 0x198   :  { %v4066_v1 = vpop.eup %4065  ;;  %v2820_v15 = vadd.f32 %v2819_v49, %v2127_v6  ;;  %v1795_v41 = vmul.f32 0.33333334, %v1731_v24  ;;  %v2434_v51 = vadd.f32 1e-12, %v1666_v55  ;;  %v3239_v25 = vmul.f32 %v492_v18, %v492_v18 }
 0x199   :  { %v4068_v50 = vpop.eup %4067  ;;  %4071 = vrcp.f32 %v2435_v42  ;;  %v2690_v39 = vmul.f32 %v2626_v23, %v2626_v23  ;;  %v2752_v44 = vadd.f32 %v2751_v61, %v5508_v56  ;;  %v1794_v58 = vmul.f32 0.33333334, %v1730_v43 }
 0x19a   :  { %v2521_v57 = vmul.f32 %v4068_v50, %v5532_v37  ;;  %v1859_v4 = vsub.f32 %v1795_v41, %v1667_v40  ;;  %4073 = vrcp.f32 %v2434_v51  ;;  %v2523_v30 = vmul.f32 %v4064_v48, %v5508_v56  ;;  %v6536_v41 = vld [vmem:[#allocation19_spill] sm:$0xff] }
 0x19b   :  { %v2962_v49 = vadd.f32 %v2961_v9, %v2689_v11  ;;  %v3032_v24 = vadd.f32 %v3031_v17, %v5477_v47  ;;  %v3104_v6 = vmul.f32 %v2626_v23, %v487_v53  ;;  %v2136_v18 = vmul.f32 %v4066_v1, %v5508_v56  ;;  %v5577_v53 = vpop.f32.mrb[47].mxu1 }
 0x19c   :  { %v2891_v42 = vadd.f32 %v2890_v35, %v2521_v57  ;;  %v5563_v16 = vmax.f32 %v1859_v4, 0.0  ;;  %v1858_v61 = vsub.f32 %v1794_v58, %v1666_v55  ;;  %v3166_v40 = vadd.f32 %v3165_v20, %v5492_v29  ;;  %v5575_v29 = vpop.f32.mrb[47].mxu0 }
 0x19d   :  { %v2963_v2 = vadd.f32 %v2962_v49, %v2690_v39  ;;  %v3033_v13 = vadd.f32 %v3032_v24, %v2626_v23  ;;  %v502_v43 = vadd.f32 %v5274_v28, %v6536_v41  ;;  %vm2139_vm2 = vcmp.eq.f32.partialorder %v5508_v56, 0.0 }
 0x19e   :  { %v2140_v9 = vand.u32 2147483648, %v5508_v56  ;;  %vm2130_vm3 = vcmp.eq.f32.partialorder %v5532_v37, inf  ;;  %4075 = vrsqrt.f32 %v5563_v16  ;;  %vm2132_vm4 = vcmp.eq.f32.partialorder %v5532_v37, 0.0 }
 0x19f   :  { %v4070_v47 = vpop.eup %4069  ;;  %v5573_v35 = vmax.f32 %v1858_v61, 0.0  ;;  %v2892_v58 = vadd.f32 %v2891_v42, %v2523_v30  ;;  %v3167_v17 = vadd.f32 %v3166_v40, %v3104_v6  ;;  %704 = vst [vmem:[#allocation3 + $0xe8] sm:$0xff] %v502_v43  ;;  %v1467_v20 = vadd.f32 %v5274_v28, %v5101_v54 }
 0x1a0   :  { %v2129_v39 = vmul.f32 %v4070_v47, %v5532_v37  ;;  %v497_v55 = vadd.f32 %v5274_v28, %v5107_v7  ;;  %v3302_v23 = vadd.f32 %v3301_v34, %v3239_v25  ;;  %v2138_v11 = vsel %vm2137_vm1, %v5508_v56, %v2136_v18 }
 0x1a1   :  { %v2133_v48 = vand.u32 2147483648, %v5532_v37  ;;  %v2691_v1 = vmul.f32 %v5534_v10, %v5534_v10  ;;  %4077 = vrsqrt.f32 %v5573_v35  ;;  %v2753_v54 = vadd.f32 %v2752_v44, %v5573_v35 }
 0x1a2   :  { %v2131_v51 = vsel %vm2130_vm3, %v5532_v37, %v2129_v39  ;;  %v1669_v50 = vmul.f32 %v1467_v20, %v1467_v20  ;;  %v5595_v7 = vsub.f32 %v502_v43, %v1467_v20  ;;  %703 = vst [vmem:[#allocation3 + $0xe0] sm:$0xff] %v497_v55  ;;  %v3240_v57 = vmul.f32 %v497_v55, %v497_v55 }
 0x1a3   :  { %v4072_v34 = vpop.eup %4071  ;;  %v2134_v25 = vsel %vm2132_vm4, %v2133_v48, %v2131_v51  ;;  %v1462_v4 = vadd.f32 %v5274_v28, %v5109_v8  ;;  %v2964_v30 = vadd.f32 %v2963_v2, %v2691_v1  ;;  %v2141_v24 = vsel %vm2139_vm2, %v2140_v9, %v2138_v11 }
 0x1a4   :  { %v4074_v49 = vpop.eup %4073  ;;  %v2821_v6 = vadd.f32 %v2820_v15, %v2134_v25  ;;  %v3241_v18 = vmul.f32 %v502_v43, %v502_v43  ;;  %v1733_v44 = vmul.f32 3.0, %v1669_v50  ;;  %vm2151_vm5 = vcmp.eq.f32.partialorder %v5563_v16, inf }
 0x1a5   :  { %v2527_v42 = vmul.f32 %v4072_v34, %v5563_v16  ;;  %v2525_v61 = vmul.f32 %v4074_v49, %v5573_v35  ;;  %v5607_v37 = vmul.f32 %v5595_v7, %v502_v43  ;;  %v3303_v40 = vadd.f32 %v3302_v23, %v3240_v57  ;;  %v5612_v34 = vpop.f32.mrb[48].mxu0  ;;  %v5614_v43 = vpop.f32.mrb[48].mxu1 }
 0x1a6   :  { %v2822_v41 = vadd.f32 %v2821_v6, %v2141_v24  ;;  %v1797_v8 = vmul.f32 0.33333334, %v1733_v44  ;;  %v2437_v2 = vadd.f32 1e-12, %v1669_v50  ;;  %v1668_v47 = vmul.f32 %v1462_v4, %v1462_v4  ;;  %v5623_v49 = vpop.f32.mrb[49].mxu0  ;;  %v5625_v24 = vpop.f32.mrb[49].mxu1 }
 0x1a7   :  { %v2893_v39 = vadd.f32 %v2892_v58, %v2525_v61  ;;  %v2628_v56 = vsub.f32 %v497_v55, %v1462_v4  ;;  %v2754_v15 = vadd.f32 %v2753_v54, %v5563_v16  ;;  %v3034_v9 = vadd.f32 %v3033_v13, %v5534_v10 }
 0x1a8   :  { %v4076_v20 = vpop.eup %4075  ;;  %v1861_v11 = vsub.f32 %v1797_v8, %v1669_v50  ;;  %v1732_v48 = vmul.f32 3.0, %v1668_v47  ;;  %v2436_v1 = vadd.f32 1e-12, %v1668_v47  ;;  %v3168_v51 = vadd.f32 %v3167_v17, %v5551_v3 }
 0x1a9   :  { %v2150_v23 = vmul.f32 %v4076_v20, %v5563_v16  ;;  %v2692_v25 = vmul.f32 %v2628_v56, %v2628_v56  ;;  %v2894_v57 = vadd.f32 %v2893_v39, %v2527_v42  ;;  %v3035_v58 = vadd.f32 %v3034_v9, %v2628_v56 }
 0x1aa   :  { %v5617_v4 = vmax.f32 %v1861_v11, 0.0  ;;  %v1796_v54 = vmul.f32 0.33333334, %v1732_v48  ;;  %4079 = vrcp.f32 %v2436_v1  ;;  %v3106_v13 = vmul.f32 %v2628_v56, %v497_v55 }
 0x1ab   :  { %v4078_v10 = vpop.eup %4077  ;;  %4081 = vrcp.f32 %v2437_v2  ;;  %v2965_v50 = vadd.f32 %v2964_v30, %v2692_v25  ;;  %v512_v3 = vadd.f32 %v5274_v28, %v5140_v5  ;;  %v1477_v17 = vadd.f32 %v5274_v28, %v5144_v31 }
 0x1ac   :  { %v2154_v6 = vand.u32 2147483648, %v5563_v16  ;;  %v2143_v44 = vmul.f32 %v4078_v10, %v5573_v35  ;;  %vm2144_vm6 = vcmp.eq.f32.partialorder %v5573_v35, inf  ;;  %4083 = vrsqrt.f32 %v5617_v4 }
 0x1ad   :  { %vm2146_vm7 = vcmp.eq.f32.partialorder %v5573_v35, 0.0  ;;  %v2147_v55 = vand.u32 2147483648, %v5573_v35  ;;  %v1860_v5 = vsub.f32 %v1796_v54, %v1668_v47  ;;  %v3169_v30 = vadd.f32 %v3168_v51, %v3106_v13  ;;  %706 = vst [vmem:[#allocation3 + $0xf8] sm:$0xff] %v512_v3 }
 0x1ae   :  { %v2152_v31 = vsel %vm2151_vm5, %v5563_v16, %v2150_v23  ;;  %v2145_v42 = vsel %vm2144_vm6, %v5573_v35, %v2143_v44  ;;  %v1671_v61 = vmul.f32 %v1477_v17, %v1477_v17  ;;  %v5637_v8 = vsub.f32 %v512_v3, %v1477_v17 }
 0x1af   :  { %v2148_v2 = vsel %vm2146_vm7, %v2147_v55, %v2145_v42  ;;  %v5639_v39 = vmax.f32 %v1860_v5, 0.0  ;;  %v507_v56 = vadd.f32 %v5274_v28, %v5162_v63  ;;  %v3304_v9 = vadd.f32 %v3303_v40, %v3241_v18  ;;  %v5664_v42 = vpop.f32.mrb[50].mxu0 }
 0x1b0   :  { %vm2153_vm8 = vcmp.eq.f32.partialorder %v5563_v16, 0.0  ;;  %v2823_v47 = vadd.f32 %v2822_v41, %v2148_v2  ;;  %v1735_v20 = vmul.f32 3.0, %v1671_v61  ;;  %v2693_v35 = vmul.f32 %v5595_v7, %v5595_v7 }
 0x1b1   :  { %v2155_v11 = vsel %vm2153_vm8, %v2154_v6, %v2152_v31  ;;  %4085 = vrsqrt.f32 %v5639_v39  ;;  %705 = vst [vmem:[#allocation3 + $0xf0] sm:$0xff] %v507_v56  ;;  %v2755_v48 = vadd.f32 %v2754_v15, %v5639_v39  ;;  %v2439_v23 = vadd.f32 1e-12, %v1671_v61 }
 0x1b2   :  { %v5648_v1 = vadd.f32 %v2823_v47, %v2155_v11  ;;  %v1799_v51 = vmul.f32 0.33333334, %v1735_v20  ;;  %v5651_v63 = vmul.f32 %v5637_v8, %v512_v3  ;;  %v3242_v18 = vmul.f32 %v507_v56, %v507_v56 }
 0x1b3   :  { %v1472_v16 = vadd.f32 %v5274_v28, %v5164_v52  ;;  %v2756_v25 = vadd.f32 %v2755_v48, %v5617_v4  ;;  %v2966_v54 = vadd.f32 %v2965_v50, %v2693_v35  ;;  %v3036_v13 = vadd.f32 %v3035_v58, %v5595_v7  ;;  %v5666_v50 = vpop.f32.mrb[50].mxu1 }
 0x1b4   :  { %v4080_v40 = vpop.eup %4079  ;;  %v1863_v41 = vsub.f32 %v1799_v51, %v1671_v61  ;;  %v3305_v17 = vadd.f32 %v3304_v9, %v3242_v18  ;;  %vm2165_vm9 = vcmp.eq.f32.partialorder %v5617_v4, inf  ;;  %v3170_v52 = vadd.f32 %v3169_v30, %v5607_v37  ;;  %v5675_v18 = vpop.f32.mrb[51].mxu0 }
 0x1b5   :  { %v4082_v10 = vpop.eup %4081  ;;  %v2529_v15 = vmul.f32 %v4080_v40, %v5639_v39  ;;  %v1670_v6 = vmul.f32 %v1472_v16, %v1472_v16  ;;  %v2630_v44 = vsub.f32 %v507_v56, %v1472_v16  ;;  %v522_v31 = vadd.f32 %v5274_v28, %v5197_v32 }
 0x1b6   :  { %v4084_v55 = vpop.eup %4083  ;;  %v5659_v5 = vmax.f32 %v1863_v41, 0.0  ;;  %v1487_v2 = vadd.f32 %v5274_v28, %v5199_v33  ;;  %v2531_v9 = vmul.f32 %v4082_v10, %v5617_v4  ;;  %vm2158_vm10 = vcmp.eq.f32.partialorder %v5639_v39, inf  ;;  %v5685_v41 = vld [vmem:[%s6499_s4] ss:$0 sm:$0xff] }
 0x1b7   :  { %v2895_v7 = vadd.f32 %v2894_v57, %v2529_v15  ;;  %v1734_v58 = vmul.f32 3.0, %v1670_v6  ;;  %v2438_v61 = vadd.f32 1e-12, %v1670_v6  ;;  %v3243_v47 = vmul.f32 %v512_v3, %v512_v3  ;;  %708 = vst [vmem:[#allocation3 + $0x108] sm:$0xff] %v522_v31  ;;  %v5677_v3 = vpop.f32.mrb[51].mxu1 }
 0x1b8   :  { %4087 = vrcp.f32 %v2439_v23  ;;  %v2164_v37 = vmul.f32 %v4084_v55, %v5617_v4  ;;  %v2694_v30 = vmul.f32 %v2630_v44, %v2630_v44  ;;  %v3037_v20 = vadd.f32 %v3036_v13, %v2630_v44 }
 0x1b9   :  { %v1798_v32 = vmul.f32 0.33333334, %v1734_v58  ;;  %4089 = vrcp.f32 %v2438_v61  ;;  %v2896_v57 = vadd.f32 %v2895_v7, %v2531_v9  ;;  %v3108_v11 = vmul.f32 %v2630_v44, %v507_v56 }
 0x1ba   :  { %4091 = vrsqrt.f32 %v5659_v5  ;;  %v2161_v33 = vand.u32 2147483648, %v5639_v39  ;;  %v2967_v48 = vadd.f32 %v2966_v54, %v2694_v30  ;;  %v1673_v51 = vmul.f32 %v1487_v2, %v1487_v2 }
 0x1bb   :  { %v4086_v35 = vpop.eup %4085  ;;  %v1862_v28 = vsub.f32 %v1798_v32, %v1670_v6  ;;  %v3171_v16 = vadd.f32 %v3170_v52, %v3108_v11  ;;  %v5680_v40 = vsub.f32 %v522_v31, %v1487_v2  ;;  %v517_v56 = vadd.f32 %v5685_v41, %v5207_v26 }
 0x1bc   :  { %v2157_v23 = vmul.f32 %v4086_v35, %v5639_v39  ;;  %v2166_v54 = vsel %vm2165_vm9, %v5617_v4, %v2164_v37  ;;  %v1737_v10 = vmul.f32 3.0, %v1673_v51  ;;  %v3306_v15 = vadd.f32 %v3305_v17, %v3243_v47 }
 0x1bd   :  { %v5692_v13 = vmax.f32 %v1862_v28, 0.0  ;;  %v2168_v6 = vand.u32 2147483648, %v5617_v4  ;;  %vm2160_vm11 = vcmp.eq.f32.partialorder %v5639_v39, 0.0  ;;  %v5700_v55 = vmul.f32 %v5680_v40, %v522_v31  ;;  %707 = vst [vmem:[#allocation3 + $0x100] sm:$0xff] %v517_v56 }
 0x1be   :  { %v2159_v44 = vsel %vm2158_vm10, %v5639_v39, %v2157_v23  ;;  %vm2167_vm12 = vcmp.eq.f32.partialorder %v5617_v4, 0.0  ;;  %v2695_v52 = vmul.f32 %v5637_v8, %v5637_v8  ;;  %v1801_v61 = vmul.f32 0.33333334, %v1737_v10  ;;  %v5713_v23 = vpop.f32.mrb[52].mxu0 }
 0x1bf   :  { %v2162_v26 = vsel %vm2160_vm11, %v2161_v33, %v2159_v44  ;;  %4093 = vrsqrt.f32 %v5692_v13  ;;  %v2169_v17 = vsel %vm2167_vm12, %v2168_v6, %v2166_v54  ;;  %v2757_v58 = vadd.f32 %v2756_v25, %v5692_v13 }
 0x1c0   :  { %v2825_v7 = vadd.f32 %v5648_v1, %v2162_v26  ;;  %v2441_v2 = vadd.f32 1e-12, %v1673_v51  ;;  %v3244_v39 = vmul.f32 %v517_v56, %v517_v56  ;;  %v1482_v9 = vadd.f32 %v5685_v41, %v5209_v36 }
 0x1c1   :  { %v2968_v47 = vadd.f32 %v2967_v48, %v2695_v52  ;;  %v1865_v32 = vsub.f32 %v1801_v61, %v1673_v51  ;;  %v2758_v30 = vadd.f32 %v2757_v58, %v5659_v5  ;;  %v3038_v11 = vadd.f32 %v3037_v20, %v5637_v8  ;;  %v5721_v8 = vpop.f32.mrb[52].mxu1 }
 0x1c2   :  { %v4088_v37 = vpop.eup %4087  ;;  %v2826_v4 = vadd.f32 %v2825_v7, %v2169_v17  ;;  %vm2179_vm13 = vcmp.eq.f32.partialorder %v5659_v5, inf  ;;  %v3245_v1 = vmul.f32 %v522_v31, %v522_v31  ;;  %v3307_v33 = vadd.f32 %v3306_v15, %v3244_v39  ;;  %v5733_v39 = vpop.f32.mrb[53].mxu0 }
 0x1c3   :  { %v4090_v35 = vpop.eup %4089  ;;  %v1672_v25 = vmul.f32 %v1482_v9, %v1482_v9  ;;  %v2632_v28 = vsub.f32 %v517_v56, %v1482_v9  ;;  %v5716_v48 = vmax.f32 %v1865_v32, 0.0  ;;  %v3172_v51 = vadd.f32 %v3171_v16, %v5651_v63  ;;  %v5735_v9 = vpop.f32.mrb[53].mxu1 }
 0x1c4   :  { %v4092_v54 = vpop.eup %4091  ;;  %v2533_v36 = vmul.f32 %v4090_v35, %v5692_v13  ;;  %v532_v10 = vadd.f32 %v5685_v41, %v5250_v60  ;;  %4095 = vrcp.f32 %v2441_v2  ;;  %v2535_v6 = vmul.f32 %v4088_v37, %v5659_v5 }
 0x1c5   :  { %v1736_v20 = vmul.f32 3.0, %v1672_v25  ;;  %v2440_v31 = vadd.f32 1e-12, %v1672_v25  ;;  %v2696_v15 = vmul.f32 %v2632_v28, %v2632_v28  ;;  %vm2172_vm14 = vcmp.eq.f32.partialorder %v5692_v13, inf }
 0x1c6   :  { %v2897_v44 = vadd.f32 %v2896_v57, %v2533_v36  ;;  %4097 = vrsqrt.f32 %v5716_v48  ;;  %710 = vst [vmem:[#allocation3 + $0x118] sm:$0xff] %v532_v10  ;;  %v2178_v26 = vmul.f32 %v4092_v54, %v5659_v5  ;;  %vm2174_vm15 = vcmp.eq.f32.partialorder %v5692_v13, 0.0 }
 0x1c7   :  { %v1800_v63 = vmul.f32 0.33333334, %v1736_v20  ;;  %4099 = vrcp.f32 %v2440_v31  ;;  %v2969_v16 = vadd.f32 %v2968_v47, %v2696_v15  ;;  %v3039_v52 = vadd.f32 %v3038_v11, %v2632_v28 }
 0x1c8   :  { %v2898_v60 = vadd.f32 %v2897_v44, %v2535_v6  ;;  %v3110_v17 = vmul.f32 %v2632_v28, %v517_v56  ;;  %v2175_v58 = vand.u32 2147483648, %v5692_v13  ;;  %v1497_v57 = vadd.f32 %v5685_v41, %v5252_v14 }
 0x1c9   :  { %v4094_v7 = vpop.eup %4093  ;;  %v1864_v61 = vsub.f32 %v1800_v63, %v1672_v25  ;;  %v527_v2 = vadd.f32 %v5685_v41, %v5264_v59  ;;  %v3308_v47 = vadd.f32 %v3307_v33, %v3245_v1  ;;  %v1492_v56 = vadd.f32 %v5685_v41, %v5266_v45 }
 0x1ca   :  { %v2171_v37 = vmul.f32 %v4094_v7, %v5692_v13  ;;  %v3173_v32 = vadd.f32 %v3172_v51, %v3110_v17  ;;  %v1675_v35 = vmul.f32 %v1497_v57, %v1497_v57  ;;  %v5742_v25 = vsub.f32 %v532_v10, %v1497_v57 }
 0x1cb   :  { %v5740_v11 = vmax.f32 %v1864_v61, 0.0  ;;  %709 = vst [vmem:[#allocation3 + $0x110] sm:$0xff] %v527_v2  ;;  %v3246_v14 = vmul.f32 %v527_v2, %v527_v2  ;;  %v2180_v59 = vsel %vm2179_vm13, %v5659_v5, %v2178_v26  ;;  %v1674_v54 = vmul.f32 %v1492_v56, %v1492_v56 }
 0x1cc   :  { %v2173_v28 = vsel %vm2172_vm14, %v5692_v13, %v2171_v37  ;;  %v2634_v1 = vsub.f32 %v527_v2, %v1492_v56  ;;  %vm2181_vm0 = vcmp.eq.f32.partialorder %v5659_v5, 0.0  ;;  %v2182_v45 = vand.u32 2147483648, %v5659_v5  ;;  %v5763_v37 = vpop.f32.mrb[54].mxu0 }
 0x1cd   :  { %v2176_v33 = vsel %vm2174_vm15, %v2175_v58, %v2173_v28  ;;  %4101 = vrsqrt.f32 %v5740_v11  ;;  %v2697_v51 = vmul.f32 %v5680_v40, %v5680_v40  ;;  %v2759_v20 = vadd.f32 %v2758_v30, %v5740_v11  ;;  %6537 = vst [vmem:[#allocation19_spill] sm:$0xff] %v5763_v37 }
 0x1ce   :  { %v2827_v36 = vadd.f32 %v2826_v4, %v2176_v33  ;;  %v1739_v31 = vmul.f32 3.0, %v1675_v35  ;;  %v4096_v15 = vpop.eup %4095  ;;  %v2183_v6 = vsel %vm2181_vm0, %v2182_v45, %v2180_v59  ;;  %v2443_v44 = vadd.f32 1e-12, %v1675_v35 }
 0x1cf   :  { %v5759_v26 = vmul.f32 %v5742_v25, %v532_v10  ;;  %v3309_v63 = vadd.f32 %v3308_v47, %v3246_v14  ;;  %vm2193_vm1 = vcmp.eq.f32.partialorder %v5716_v48, inf  ;;  %v1738_v7 = vmul.f32 3.0, %v1674_v54  ;;  %v5766_v47 = vpop.f32.mrb[54].mxu1 }
 0x1d0   :  { %v4098_v5 = vpop.eup %4097  ;;  %v2828_v13 = vadd.f32 %v2827_v36, %v2183_v6  ;;  %v1803_v17 = vmul.f32 0.33333334, %v1739_v31  ;;  %v2442_v4 = vadd.f32 1e-12, %v1674_v54  ;;  %v3247_v61 = vmul.f32 %v532_v10, %v532_v10 }
 0x1d1   :  { %v4100_v58 = vpop.eup %4099  ;;  %4103 = vrcp.f32 %v2443_v44  ;;  %v2698_v57 = vmul.f32 %v2634_v1, %v2634_v1  ;;  %v2760_v30 = vadd.f32 %v2759_v20, %v5716_v48  ;;  %v1802_v28 = vmul.f32 0.33333334, %v1738_v7 }
 0x1d2   :  { %v2537_v56 = vmul.f32 %v4100_v58, %v5740_v11  ;;  %v1867_v59 = vsub.f32 %v1803_v17, %v1675_v35  ;;  %4105 = vrcp.f32 %v2442_v4  ;;  %v2539_v14 = vmul.f32 %v4096_v15, %v5716_v48 }
 0x1d3   :  { %v2970_v45 = vadd.f32 %v2969_v16, %v2697_v51  ;;  %v3040_v33 = vadd.f32 %v3039_v52, %v5680_v40  ;;  %v3112_v36 = vmul.f32 %v2634_v1, %v527_v2  ;;  %v2192_v10 = vmul.f32 %v4098_v5, %v5716_v48 }
 0x1d4   :  { %v2899_v31 = vadd.f32 %v2898_v60, %v2537_v56  ;;  %v5771_v6 = vmax.f32 %v1867_v59, 0.0  ;;  %v1866_v20 = vsub.f32 %v1802_v28, %v1674_v54  ;;  %v3174_v35 = vadd.f32 %v3173_v32, %v5700_v55  ;;  %v5783_v55 = vpop.f32.mrb[55].mxu0  ;;  %v5785_v32 = vpop.f32.mrb[55].mxu1  ;;  %v6539_v28 = vld [vmem:[#allocation21_spill] sm:$0xff] }
 0x1d5   :  { %v2971_v44 = vadd.f32 %v2970_v45, %v2698_v57  ;;  %v3041_v37 = vadd.f32 %v3040_v33, %v2634_v1  ;;  %v542_v17 = vadd.f32 %v5685_v41, %v5302_v22  ;;  %vm2195_vm2 = vcmp.eq.f32.partialorder %v5716_v48, 0.0  ;;  %v6538_v1 = vld [vmem:[#allocation20_spill] sm:$0xff] }
 0x1d6   :  { %v2196_v16 = vand.u32 2147483648, %v5716_v48  ;;  %vm2186_vm3 = vcmp.eq.f32.partialorder %v5740_v11, inf  ;;  %4107 = vrsqrt.f32 %v5771_v6  ;;  %vm2188_vm4 = vcmp.eq.f32.partialorder %v5740_v11, 0.0 }
 0x1d7   :  { %v4102_v40 = vpop.eup %4101  ;;  %v5781_v60 = vmax.f32 %v1866_v20, 0.0  ;;  %v2900_v52 = vadd.f32 %v2899_v31, %v2539_v14  ;;  %v3175_v2 = vadd.f32 %v3174_v35, %v3112_v36  ;;  %712 = vst [vmem:[#allocation3 + $0x128] sm:$0xff] %v542_v17  ;;  %v1507_v54 = vadd.f32 %v5685_v41, %v5310_v27 }
 0x1d8   :  { %v2185_v22 = vmul.f32 %v4102_v40, %v5740_v11  ;;  %v537_v51 = vadd.f32 %v5685_v41, %v6538_v1  ;;  %v3310_v15 = vadd.f32 %v3309_v63, %v3247_v61  ;;  %v2194_v5 = vsel %vm2193_vm1, %v5716_v48, %v2192_v10 }
 0x1d9   :  { %v2189_v7 = vand.u32 2147483648, %v5740_v11  ;;  %v2699_v4 = vmul.f32 %v5742_v25, %v5742_v25  ;;  %4109 = vrsqrt.f32 %v5781_v60  ;;  %v2761_v27 = vadd.f32 %v2760_v30, %v5781_v60 }
 0x1da   :  { %v2187_v58 = vsel %vm2186_vm3, %v5740_v11, %v2185_v22  ;;  %v1677_v57 = vmul.f32 %v1507_v54, %v1507_v54  ;;  %v5803_v56 = vsub.f32 %v542_v17, %v1507_v54  ;;  %711 = vst [vmem:[#allocation3 + $0x120] sm:$0xff] %v537_v51  ;;  %v3248_v59 = vmul.f32 %v537_v51, %v537_v51 }
 0x1db   :  { %v4104_v63 = vpop.eup %4103  ;;  %v2190_v61 = vsel %vm2188_vm4, %v2189_v7, %v2187_v58  ;;  %v1502_v14 = vadd.f32 %v5685_v41, %v6539_v28  ;;  %v2972_v45 = vadd.f32 %v2971_v44, %v2699_v4  ;;  %v2197_v36 = vsel %vm2195_vm2, %v2196_v16, %v2194_v5  ;;  %v5820_v28 = vpop.f32.mrb[56].mxu0 }
 0x1dc   :  { %v4106_v33 = vpop.eup %4105  ;;  %v2829_v10 = vadd.f32 %v2828_v13, %v2190_v61  ;;  %v3249_v31 = vmul.f32 %v542_v17, %v542_v17  ;;  %v1741_v30 = vmul.f32 3.0, %v1677_v57  ;;  %vm2207_vm5 = vcmp.eq.f32.partialorder %v5771_v6, inf }
 0x1dd   :  { %v2543_v20 = vmul.f32 %v4104_v63, %v5771_v6  ;;  %v2541_v35 = vmul.f32 %v4106_v33, %v5781_v60  ;;  %v5815_v11 = vmul.f32 %v5803_v56, %v542_v17  ;;  %v3311_v40 = vadd.f32 %v3310_v15, %v3248_v59  ;;  %v5822_v17 = vpop.f32.mrb[56].mxu1 }
 0x1de   :  { %v2830_v22 = vadd.f32 %v2829_v10, %v2197_v36  ;;  %v1805_v54 = vmul.f32 0.33333334, %v1741_v30  ;;  %v2445_v44 = vadd.f32 1e-12, %v1677_v57  ;;  %v1676_v1 = vmul.f32 %v1502_v14, %v1502_v14  ;;  %v6540_v36 = vld [vmem:[#allocation22_spill] sm:$0xff]  ;;  %v5831_v10 = vpop.f32.mrb[57].mxu0 }
 0x1df   :  { %v2901_v7 = vadd.f32 %v2900_v52, %v2541_v35  ;;  %v2636_v48 = vsub.f32 %v537_v51, %v1502_v14  ;;  %v2762_v13 = vadd.f32 %v2761_v27, %v5771_v6  ;;  %v3042_v16 = vadd.f32 %v3041_v37, %v5742_v25  ;;  %v5833_v30 = vpop.f32.mrb[57].mxu1 }
 0x1e0   :  { %v4108_v5 = vpop.eup %4107  ;;  %v1869_v4 = vsub.f32 %v1805_v54, %v1677_v57  ;;  %v1740_v58 = vmul.f32 3.0, %v1676_v1  ;;  %v2444_v63 = vadd.f32 1e-12, %v1676_v1  ;;  %v3176_v61 = vadd.f32 %v3175_v2, %v5759_v26 }
 0x1e1   :  { %v2206_v15 = vmul.f32 %v4108_v5, %v5771_v6  ;;  %v2700_v59 = vmul.f32 %v2636_v48, %v2636_v48  ;;  %v2902_v33 = vadd.f32 %v2901_v7, %v2543_v20  ;;  %v3043_v52 = vadd.f32 %v3042_v16, %v2636_v48 }
 0x1e2   :  { %v5825_v14 = vmax.f32 %v1869_v4, 0.0  ;;  %v1804_v27 = vmul.f32 0.33333334, %v1740_v58  ;;  %4111 = vrcp.f32 %v2444_v63  ;;  %v3114_v25 = vmul.f32 %v2636_v48, %v537_v51 }
 0x1e3   :  { %v4110_v37 = vpop.eup %4109  ;;  %4113 = vrcp.f32 %v2445_v44  ;;  %v2973_v57 = vadd.f32 %v2972_v45, %v2700_v59  ;;  %v552_v26 = vadd.f32 %v5685_v41, %v6540_v36  ;;  %v1517_v2 = vadd.f32 %v5685_v41, %v5355_v46 }
 0x1e4   :  { %v2210_v20 = vand.u32 2147483648, %v5771_v6  ;;  %v2199_v35 = vmul.f32 %v4110_v37, %v5781_v60  ;;  %vm2200_vm6 = vcmp.eq.f32.partialorder %v5781_v60, inf  ;;  %4115 = vrsqrt.f32 %v5825_v14 }
 0x1e5   :  { %vm2202_vm7 = vcmp.eq.f32.partialorder %v5781_v60, 0.0  ;;  %v2203_v51 = vand.u32 2147483648, %v5781_v60  ;;  %v1868_v45 = vsub.f32 %v1804_v27, %v1676_v1  ;;  %v3177_v54 = vadd.f32 %v3176_v61, %v3114_v25  ;;  %714 = vst [vmem:[#allocation3 + $0x138] sm:$0xff] %v552_v26 }
 0x1e6   :  { %v2208_v46 = vsel %vm2207_vm5, %v5771_v6, %v2206_v15  ;;  %v2201_v44 = vsel %vm2200_vm6, %v5781_v60, %v2199_v35  ;;  %v1679_v7 = vmul.f32 %v1517_v2, %v1517_v2  ;;  %v5845_v48 = vsub.f32 %v552_v26, %v1517_v2 }
 0x1e7   :  { %v2204_v16 = vsel %vm2202_vm7, %v2203_v51, %v2201_v44  ;;  %v5847_v5 = vmax.f32 %v1868_v45, 0.0  ;;  %v547_v4 = vadd.f32 %v5685_v41, %v5372_v62  ;;  %v3312_v58 = vadd.f32 %v3311_v40, %v3249_v31 }
 0x1e8   :  { %vm2209_vm8 = vcmp.eq.f32.partialorder %v5771_v6, 0.0  ;;  %v2831_v1 = vadd.f32 %v2830_v22, %v2204_v16  ;;  %v1743_v63 = vmul.f32 3.0, %v1679_v7  ;;  %v2701_v60 = vmul.f32 %v5803_v56, %v5803_v56  ;;  %v5872_v16 = vpop.f32.mrb[58].mxu0 }
 0x1e9   :  { %v2211_v61 = vsel %vm2209_vm8, %v2210_v20, %v2208_v46  ;;  %4117 = vrsqrt.f32 %v5847_v5  ;;  %713 = vst [vmem:[#allocation3 + $0x130] sm:$0xff] %v547_v4  ;;  %v2763_v15 = vadd.f32 %v2762_v13, %v5847_v5  ;;  %v2447_v25 = vadd.f32 1e-12, %v1679_v7 }
 0x1ea   :  { %v5856_v59 = vadd.f32 %v2831_v1, %v2211_v61  ;;  %v1807_v27 = vmul.f32 0.33333334, %v1743_v63  ;;  %v5859_v62 = vmul.f32 %v5845_v48, %v552_v26  ;;  %v3250_v31 = vmul.f32 %v547_v4, %v547_v4 }
 0x1eb   :  { %v1512_v6 = vadd.f32 %v5685_v41, %v5374_v12  ;;  %v2764_v37 = vadd.f32 %v2763_v15, %v5825_v14  ;;  %v2974_v36 = vadd.f32 %v2973_v57, %v2701_v60  ;;  %v3044_v2 = vadd.f32 %v3043_v52, %v5803_v56  ;;  %v5874_v57 = vpop.f32.mrb[58].mxu1 }
 0x1ec   :  { %v4112_v40 = vpop.eup %4111  ;;  %v1871_v22 = vsub.f32 %v1807_v27, %v1679_v7  ;;  %v3313_v35 = vadd.f32 %v3312_v58, %v3250_v31  ;;  %vm2221_vm9 = vcmp.eq.f32.partialorder %v5825_v14, inf  ;;  %v3178_v12 = vadd.f32 %v3177_v54, %v5815_v11 }
 0x1ed   :  { %v4114_v20 = vpop.eup %4113  ;;  %v2545_v13 = vmul.f32 %v4112_v40, %v5847_v5  ;;  %v1678_v51 = vmul.f32 %v1512_v6, %v1512_v6  ;;  %v2638_v45 = vsub.f32 %v547_v4, %v1512_v6  ;;  %v562_v7 = vadd.f32 %v5685_v41, %v5409_v38 }
 0x1ee   :  { %v4116_v46 = vpop.eup %4115  ;;  %v5867_v44 = vmax.f32 %v1871_v22, 0.0  ;;  %v1527_v58 = vadd.f32 %v5685_v41, %v5411_v0  ;;  %v2547_v63 = vmul.f32 %v4114_v20, %v5825_v14  ;;  %vm2214_vm10 = vcmp.eq.f32.partialorder %v5847_v5, inf  ;;  %v5883_v22 = vpop.f32.mrb[59].mxu0 }
 0x1ef   :  { %v2903_v56 = vadd.f32 %v2902_v33, %v2545_v13  ;;  %v1742_v52 = vmul.f32 3.0, %v1678_v51  ;;  %v2446_v1 = vadd.f32 1e-12, %v1678_v51  ;;  %v3251_v61 = vmul.f32 %v552_v26, %v552_v26  ;;  %716 = vst [vmem:[#allocation3 + $0x148] sm:$0xff] %v562_v7  ;;  %6541 = vst [vmem:[#allocation20_spill] sm:$0xff] %v5883_v22  ;;  %v5885_v26 = vpop.f32.mrb[59].mxu1 }
 0x1f0   :  { %4119 = vrcp.f32 %v2447_v25  ;;  %v2220_v11 = vmul.f32 %v4116_v46, %v5825_v14  ;;  %v2702_v54 = vmul.f32 %v2638_v45, %v2638_v45  ;;  %v3045_v60 = vadd.f32 %v3044_v2, %v2638_v45  ;;  %6542 = vst [vmem:[#allocation21_spill] sm:$0xff] %v5885_v26 }
 0x1f1   :  { %v1806_v38 = vmul.f32 0.33333334, %v1742_v52  ;;  %4121 = vrcp.f32 %v2446_v1  ;;  %v2904_v33 = vadd.f32 %v2903_v56, %v2547_v63  ;;  %v3116_v15 = vmul.f32 %v2638_v45, %v547_v4 }
 0x1f2   :  { %4123 = vrsqrt.f32 %v5867_v44  ;;  %v2217_v0 = vand.u32 2147483648, %v5847_v5  ;;  %v2975_v6 = vadd.f32 %v2974_v36, %v2702_v54  ;;  %v1681_v40 = vmul.f32 %v1527_v58, %v1527_v58 }
 0x1f3   :  { %v4118_v27 = vpop.eup %4117  ;;  %v1870_v31 = vsub.f32 %v1806_v38, %v1678_v51  ;;  %v3179_v20 = vadd.f32 %v3178_v12, %v3116_v15  ;;  %v5888_v13 = vsub.f32 %v562_v7, %v1527_v58  ;;  %v557_v46 = vadd.f32 %v5685_v41, %v5420_v19 }
 0x1f4   :  { %v2213_v25 = vmul.f32 %v4118_v27, %v5847_v5  ;;  %v2222_v4 = vsel %vm2221_vm9, %v5825_v14, %v2220_v11  ;;  %v1745_v36 = vmul.f32 3.0, %v1681_v40  ;;  %v3314_v51 = vadd.f32 %v3313_v35, %v3251_v61  ;;  %v6543_v11 = vld [vmem:[#allocation9_spill] sm:$0xff] }
 0x1f5   :  { %v5895_v2 = vmax.f32 %v1870_v31, 0.0  ;;  %v2224_v45 = vand.u32 2147483648, %v5825_v14  ;;  %vm2216_vm11 = vcmp.eq.f32.partialorder %v5847_v5, 0.0  ;;  %v5903_v12 = vmul.f32 %v5888_v13, %v562_v7  ;;  %715 = vst [vmem:[#allocation3 + $0x140] sm:$0xff] %v557_v46 }
 0x1f6   :  { %v2215_v56 = vsel %vm2214_vm10, %v5847_v5, %v2213_v25  ;;  %vm2223_vm12 = vcmp.eq.f32.partialorder %v5825_v14, 0.0  ;;  %v2703_v52 = vmul.f32 %v5845_v48, %v5845_v48  ;;  %v1809_v63 = vmul.f32 0.33333334, %v1745_v36 }
 0x1f7   :  { %v2218_v19 = vsel %vm2216_vm11, %v2217_v0, %v2215_v56  ;;  %4125 = vrsqrt.f32 %v5895_v2  ;;  %v2225_v35 = vsel %vm2223_vm12, %v2224_v45, %v2222_v4  ;;  %v2765_v58 = vadd.f32 %v2764_v37, %v5895_v2  ;;  %v5916_v45 = vpop.f32.mrb[60].mxu0 }
 0x1f8   :  { %v2833_v1 = vadd.f32 %v5856_v59, %v2218_v19  ;;  %v2449_v61 = vadd.f32 1e-12, %v1681_v40  ;;  %v3252_v5 = vmul.f32 %v557_v46, %v557_v46  ;;  %v1522_v38 = vadd.f32 %v5685_v41, %v6543_v11  ;;  %6544 = vst [vmem:[#allocation22_spill] sm:$0xff] %v5916_v45 }
 0x1f9   :  { %v2976_v54 = vadd.f32 %v2975_v6, %v2703_v52  ;;  %v1873_v27 = vsub.f32 %v1809_v63, %v1681_v40  ;;  %v2766_v0 = vadd.f32 %v2765_v58, %v5867_v44  ;;  %v3046_v31 = vadd.f32 %v3045_v60, %v5845_v48  ;;  %v6545_v52 = vld [vmem:[#allocation15_spill] sm:$0xff]  ;;  %v5924_v48 = vpop.f32.mrb[60].mxu1 }
 0x1fa   :  { %v4120_v15 = vpop.eup %4119  ;;  %v2834_v14 = vadd.f32 %v2833_v1, %v2225_v35  ;;  %vm2235_vm13 = vcmp.eq.f32.partialorder %v5867_v44, inf  ;;  %v3253_v59 = vmul.f32 %v562_v7, %v562_v7  ;;  %v3315_v4 = vadd.f32 %v3314_v51, %v3252_v5  ;;  %6546 = vst [vmem:[#allocation9_spill] sm:$0xff] %v5924_v48  ;;  %v5936_v48 = vpop.f32.mrb[61].mxu0 }
 0x1fb   :  { %v4122_v25 = vpop.eup %4121  ;;  %v1680_v37 = vmul.f32 %v1522_v38, %v1522_v38  ;;  %v2640_v36 = vsub.f32 %v557_v46, %v1522_v38  ;;  %v5919_v6 = vmax.f32 %v1873_v27, 0.0  ;;  %v3180_v40 = vadd.f32 %v3179_v20, %v5859_v62  ;;  %6549 = vst [vmem:[#allocation15_spill] sm:$0xff] %v5936_v48 }
 0x1fc   :  { %v4124_v56 = vpop.eup %4123  ;;  %v2549_v19 = vmul.f32 %v4122_v25, %v5895_v2  ;;  %v572_v35 = vadd.f32 %v5685_v41, %v6545_v52  ;;  %4127 = vrcp.f32 %v2449_v61  ;;  %v2551_v1 = vmul.f32 %v4120_v15, %v5867_v44  ;;  %v6547_v25 = vld [vmem:[#allocation10_spill] sm:$0xff] }
 0x1fd   :  { %v1744_v60 = vmul.f32 3.0, %v1680_v37  ;;  %v2448_v7 = vadd.f32 1e-12, %v1680_v37  ;;  %v2704_v51 = vmul.f32 %v2640_v36, %v2640_v36  ;;  %vm2228_vm14 = vcmp.eq.f32.partialorder %v5895_v2, inf }
 0x1fe   :  { %v2905_v58 = vadd.f32 %v2904_v33, %v2549_v19  ;;  %4129 = vrsqrt.f32 %v5919_v6  ;;  %718 = vst [vmem:[#allocation3 + $0x158] sm:$0xff] %v572_v35  ;;  %v2234_v63 = vmul.f32 %v4124_v56, %v5867_v44  ;;  %vm2230_vm15 = vcmp.eq.f32.partialorder %v5895_v2, 0.0  ;;  %v6548_v19 = vld [vmem:[#allocation16_spill] sm:$0xff]  ;;  %v5938_v56 = vpop.f32.mrb[61].mxu1 }
 0x1ff   :  { %v1808_v62 = vmul.f32 0.33333334, %v1744_v60  ;;  %4131 = vrcp.f32 %v2448_v7  ;;  %v2977_v5 = vadd.f32 %v2976_v54, %v2704_v51  ;;  %v3047_v61 = vadd.f32 %v3046_v31, %v2640_v36  ;;  %6550 = vst [vmem:[#allocation10_spill] sm:$0xff] %v5938_v56  ;;  %v6551_v31 = vld [vmem:[#allocation11_spill] sm:$0xff] }
 0x200   :  { %v2906_v20 = vadd.f32 %v2905_v58, %v2551_v1  ;;  %v3118_v11 = vmul.f32 %v2640_v36, %v557_v46  ;;  %v2231_v27 = vand.u32 2147483648, %v5895_v2  ;;  %v1537_v33 = vadd.f32 %v5685_v41, %v6547_v25 }
 0x201   :  { %v4126_v38 = vpop.eup %4125  ;;  %v1872_v15 = vsub.f32 %v1808_v62, %v1680_v37  ;;  %v567_v52 = vadd.f32 %v5685_v41, %v6548_v19  ;;  %v3316_v54 = vadd.f32 %v3315_v4, %v3253_v59  ;;  %v1532_v46 = vadd.f32 %v5685_v41, %v6551_v31 }
 0x202   :  { %v2227_v60 = vmul.f32 %v4126_v38, %v5895_v2  ;;  %v3181_v7 = vadd.f32 %v3180_v40, %v3118_v11  ;;  %v1683_v37 = vmul.f32 %v1537_v33, %v1537_v33  ;;  %v5945_v51 = vsub.f32 %v572_v35, %v1537_v33 }
 0x203   :  { %v5943_v36 = vmax.f32 %v1872_v15, 0.0  ;;  %717 = vst [vmem:[#allocation3 + $0x150] sm:$0xff] %v567_v52  ;;  %v3254_v1 = vmul.f32 %v567_v52, %v567_v52  ;;  %v2236_v58 = vsel %vm2235_vm13, %v5867_v44, %v2234_v63  ;;  %v1682_v40 = vmul.f32 %v1532_v46, %v1532_v46 }
 0x204   :  { %v2229_v62 = vsel %vm2228_vm14, %v5895_v2, %v2227_v60  ;;  %v2642_v59 = vsub.f32 %v567_v52, %v1532_v46  ;;  %vm2237_vm0 = vcmp.eq.f32.partialorder %v5867_v44, 0.0  ;;  %v2238_v4 = vand.u32 2147483648, %v5867_v44 }
 0x205   :  { %v2232_v11 = vsel %vm2230_vm15, %v2231_v27, %v2229_v62  ;;  %4133 = vrsqrt.f32 %v5943_v36  ;;  %v2705_v15 = vmul.f32 %v5888_v13, %v5888_v13  ;;  %v2767_v63 = vadd.f32 %v2766_v0, %v5943_v36 }
 0x206   :  { %v2835_v38 = vadd.f32 %v2834_v14, %v2232_v11  ;;  %v1747_v25 = vmul.f32 3.0, %v1683_v37  ;;  %v4128_v33 = vpop.eup %4127  ;;  %v2239_v19 = vsel %vm2237_vm0, %v2238_v4, %v2236_v58  ;;  %v2451_v60 = vadd.f32 1e-12, %v1683_v37  ;;  %v5965_v11 = vpop.f32.mrb[62].mxu0 }
 0x207   :  { %v5962_v31 = vmul.f32 %v5945_v51, %v572_v35  ;;  %v3317_v46 = vadd.f32 %v3316_v54, %v3254_v1  ;;  %vm2249_vm1 = vcmp.eq.f32.partialorder %v5919_v6, inf  ;;  %v1746_v62 = vmul.f32 3.0, %v1682_v40  ;;  %6552 = vst [vmem:[#allocation16_spill] sm:$0xff] %v5965_v11  ;;  %v5968_v4 = vpop.f32.mrb[62].mxu1 }
 0x208   :  { %v4130_v44 = vpop.eup %4129  ;;  %v2836_v2 = vadd.f32 %v2835_v38, %v2239_v19  ;;  %v1811_v27 = vmul.f32 0.33333334, %v1747_v25  ;;  %v2450_v14 = vadd.f32 1e-12, %v1682_v40  ;;  %v3255_v48 = vmul.f32 %v572_v35, %v572_v35  ;;  %6553 = vst [vmem:[#allocation11_spill] sm:$0xff] %v5968_v4  ;;  %v5978_v4 = vpop.f32.mrb[63].mxu1 }
 0x209   :  { %v4132_v56 = vpop.eup %4131  ;;  %4135 = vrcp.f32 %v2451_v60  ;;  %v2706_v0 = vmul.f32 %v2642_v59, %v2642_v59  ;;  %v2768_v58 = vadd.f32 %v2767_v63, %v5919_v6  ;;  %v1810_v1 = vmul.f32 0.33333334, %v1746_v62  ;;  %v5976_v63 = vpop.f32.mrb[63].mxu0  ;;  %6554 = vst [vmem:[#allocation23_spill] sm:$0xff] %v5978_v4  ;;  %v6555_v62 = vld [vmem:[#allocation17_spill] sm:$0xff] }
 0x20a   :  { %v2553_v45 = vmul.f32 %v4132_v56, %v5943_v36  ;;  %v1875_v54 = vsub.f32 %v1811_v27, %v1683_v37  ;;  %4137 = vrcp.f32 %v2450_v14  ;;  %v2555_v38 = vmul.f32 %v4128_v33, %v5919_v6 }
 0x20b   :  { %v2978_v25 = vadd.f32 %v2977_v5, %v2705_v15  ;;  %v3048_v19 = vadd.f32 %v3047_v61, %v5888_v13  ;;  %v3120_v26 = vmul.f32 %v2642_v59, %v567_v52  ;;  %v2248_v11 = vmul.f32 %v4130_v44, %v5919_v6 }
 0x20c   :  { %v2907_v35 = vadd.f32 %v2906_v20, %v2553_v45  ;;  %v5974_v60 = vmax.f32 %v1875_v54, 0.0  ;;  %v1874_v22 = vsub.f32 %v1810_v1, %v1682_v40  ;;  %v3182_v27 = vadd.f32 %v3181_v7, %v5903_v12  ;;  %v6556_v7 = vld [vmem:[#allocation12_spill] sm:$0xff] }
 0x20d   :  { %v2979_v56 = vadd.f32 %v2978_v25, %v2706_v0  ;;  %v3049_v37 = vadd.f32 %v3048_v19, %v2642_v59  ;;  %v582_v5 = vadd.f32 %v5685_v41, %v6555_v62  ;;  %vm2251_vm2 = vcmp.eq.f32.partialorder %v5919_v6, 0.0  ;;  %v6557_v59 = vld [vmem:[#allocation18_spill] sm:$0xff] }
 0x20e   :  { %v2252_v13 = vand.u32 2147483648, %v5919_v6  ;;  %vm2242_vm3 = vcmp.eq.f32.partialorder %v5943_v36, inf  ;;  %4139 = vrsqrt.f32 %v5974_v60  ;;  %vm2244_vm4 = vcmp.eq.f32.partialorder %v5943_v36, 0.0 }
 0x20f   :  { %v4134_v45 = vpop.eup %4133  ;;  %v5988_v20 = vmax.f32 %v1874_v22, 0.0  ;;  %v2908_v61 = vadd.f32 %v2907_v35, %v2555_v38  ;;  %v3183_v52 = vadd.f32 %v3182_v27, %v3120_v26  ;;  %720 = vst [vmem:[#allocation3 + $0x168] sm:$0xff] %v582_v5  ;;  %v1547_v40 = vadd.f32 %v5685_v41, %v6556_v7  ;;  %v6558_v38 = vld [vmem:[#allocation13_spill] sm:$0xff] }
 0x210   :  { %v2241_v12 = vmul.f32 %v4134_v45, %v5943_v36  ;;  %v577_v15 = vadd.f32 %v5685_v41, %v6557_v59  ;;  %v3318_v33 = vadd.f32 %v3317_v46, %v3255_v48  ;;  %v2250_v44 = vsel %vm2249_vm1, %v5919_v6, %v2248_v11 }
 0x211   :  { %v2245_v14 = vand.u32 2147483648, %v5943_v36  ;;  %v2707_v22 = vmul.f32 %v5945_v51, %v5945_v51  ;;  %4141 = vrsqrt.f32 %v5988_v20  ;;  %v2769_v0 = vadd.f32 %v2768_v58, %v5988_v20 }
 0x212   :  { %v2243_v26 = vsel %vm2242_vm3, %v5943_v36, %v2241_v12  ;;  %v1685_v54 = vmul.f32 %v1547_v40, %v1547_v40  ;;  %v6006_v1 = vsub.f32 %v582_v5, %v1547_v40  ;;  %719 = vst [vmem:[#allocation3 + $0x160] sm:$0xff] %v577_v15  ;;  %v3256_v11 = vmul.f32 %v577_v15, %v577_v15 }
 0x213   :  { %v4136_v48 = vpop.eup %4135  ;;  %v2246_v46 = vsel %vm2244_vm4, %v2245_v14, %v2243_v26  ;;  %v1542_v25 = vadd.f32 %v5685_v41, %v6558_v38  ;;  %v2980_v19 = vadd.f32 %v2979_v56, %v2707_v22  ;;  %v2253_v27 = vsel %vm2251_vm2, %v2252_v13, %v2250_v44 }
 0x214   :  { %v4138_v35 = vpop.eup %4137  ;;  %v2837_v62 = vadd.f32 %v2836_v2, %v2246_v46  ;;  %v3257_v45 = vmul.f32 %v582_v5, %v582_v5  ;;  %v1749_v58 = vmul.f32 3.0, %v1685_v54  ;;  %vm2263_vm5 = vcmp.eq.f32.partialorder %v5974_v60, inf }
 0x215   :  { %v2559_v12 = vmul.f32 %v4136_v48, %v5974_v60  ;;  %v2557_v7 = vmul.f32 %v4138_v35, %v5988_v20  ;;  %v6018_v36 = vmul.f32 %v6006_v1, %v582_v5  ;;  %v3319_v40 = vadd.f32 %v3318_v33, %v3256_v11 }
 0x216   :  { %v2838_v59 = vadd.f32 %v2837_v62, %v2253_v27  ;;  %v1813_v14 = vmul.f32 0.33333334, %v1749_v58  ;;  %v2453_v56 = vadd.f32 1e-12, %v1685_v54  ;;  %v1684_v22 = vmul.f32 %v1542_v25, %v1542_v25 }
 0x217   :  { %v2909_v26 = vadd.f32 %v2908_v61, %v2557_v7  ;;  %v2644_v6 = vsub.f32 %v577_v15, %v1542_v25  ;;  %v2770_v2 = vadd.f32 %v2769_v0, %v5974_v60  ;;  %v3050_v13 = vadd.f32 %v3049_v37, %v5945_v51  ;;  %v6559_v51 = vld [vmem:[#allocation14_spill] sm:$0xff] }
 0x218   :  { %v4140_v44 = vpop.eup %4139  ;;  %v1877_v46 = vsub.f32 %v1813_v14, %v1685_v54  ;;  %v1748_v38 = vmul.f32 3.0, %v1684_v22  ;;  %v2452_v48 = vadd.f32 1e-12, %v1684_v22  ;;  %v3184_v35 = vadd.f32 %v3183_v52, %v5962_v31 }
 0x219   :  { %v2262_v5 = vmul.f32 %v4140_v44, %v5974_v60  ;;  %v2708_v4 = vmul.f32 %v2644_v6, %v2644_v6  ;;  %v2910_v33 = vadd.f32 %v2909_v26, %v2559_v12  ;;  %v3051_v11 = vadd.f32 %v3050_v13, %v2644_v6 }
 0x21a   :  { %v6024_v27 = vmax.f32 %v1877_v46, 0.0  ;;  %v1812_v62 = vmul.f32 0.33333334, %v1748_v38  ;;  %4143 = vrcp.f32 %v2452_v48  ;;  %v3122_v61 = vmul.f32 %v2644_v6, %v577_v15 }
 0x21b   :  { %v4142_v25 = vpop.eup %4141  ;;  %4145 = vrcp.f32 %v2453_v56  ;;  %v2981_v0 = vadd.f32 %v2980_v19, %v2708_v4  ;;  %v592_v37 = vadd.f32 %v5685_v41, %v6559_v51  ;;  %v1557_v54 = vadd.f32 %v5685_v41, %v5558_v21 }
 0x21c   :  { %v2266_v31 = vand.u32 2147483648, %v5974_v60  ;;  %v2255_v52 = vmul.f32 %v4142_v25, %v5988_v20  ;;  %vm2256_vm6 = vcmp.eq.f32.partialorder %v5988_v20, inf  ;;  %4147 = vrsqrt.f32 %v6024_v27 }
 0x21d   :  { %vm2258_vm7 = vcmp.eq.f32.partialorder %v5988_v20, 0.0  ;;  %v2259_v15 = vand.u32 2147483648, %v5988_v20  ;;  %v1876_v58 = vsub.f32 %v1812_v62, %v1684_v22  ;;  %v3185_v4 = vadd.f32 %v3184_v35, %v3122_v61  ;;  %722 = vst [vmem:[#allocation3 + $0x178] sm:$0xff] %v592_v37 }
 0x21e   :  { %v2264_v19 = vsel %vm2263_vm5, %v5974_v60, %v2262_v5  ;;  %v2257_v21 = vsel %vm2256_vm6, %v5988_v20, %v2255_v52  ;;  %v1687_v12 = vmul.f32 %v1557_v54, %v1557_v54  ;;  %v6040_v7 = vsub.f32 %v592_v37, %v1557_v54 }
 0x21f   :  { %v2260_v14 = vsel %vm2258_vm7, %v2259_v15, %v2257_v21  ;;  %v6042_v56 = vmax.f32 %v1876_v58, 0.0  ;;  %v587_v26 = vadd.f32 %v5685_v41, %v5575_v29  ;;  %v3320_v6 = vadd.f32 %v3319_v40, %v3257_v45 }
 0x220   :  { %vm2265_vm8 = vcmp.eq.f32.partialorder %v5974_v60, 0.0  ;;  %v2839_v22 = vadd.f32 %v2838_v59, %v2260_v14  ;;  %v1751_v13 = vmul.f32 3.0, %v1687_v12  ;;  %v2709_v20 = vmul.f32 %v6006_v1, %v6006_v1 }
 0x221   :  { %v2267_v44 = vsel %vm2265_vm8, %v2266_v31, %v2264_v19  ;;  %4149 = vrsqrt.f32 %v6042_v56  ;;  %721 = vst [vmem:[#allocation3 + $0x170] sm:$0xff] %v587_v26  ;;  %v2771_v46 = vadd.f32 %v2770_v2, %v6042_v56  ;;  %v2455_v35 = vadd.f32 1e-12, %v1687_v12 }
 0x222   :  { %v6051_v38 = vadd.f32 %v2839_v22, %v2267_v44  ;;  %v1815_v48 = vmul.f32 0.33333334, %v1751_v13  ;;  %v6054_v29 = vmul.f32 %v6040_v7, %v592_v37  ;;  %v3258_v45 = vmul.f32 %v587_v26, %v587_v26 }
 0x223   :  { %v1552_v60 = vadd.f32 %v5685_v41, %v5577_v53  ;;  %v2772_v5 = vadd.f32 %v2771_v46, %v6024_v27  ;;  %v2982_v62 = vadd.f32 %v2981_v0, %v2709_v20  ;;  %v3052_v61 = vadd.f32 %v3051_v11, %v6006_v1 }
 0x224   :  { %v4144_v40 = vpop.eup %4143  ;;  %v1879_v59 = vsub.f32 %v1815_v48, %v1687_v12  ;;  %v3321_v51 = vadd.f32 %v3320_v6, %v3258_v45  ;;  %vm2277_vm9 = vcmp.eq.f32.partialorder %v6024_v27, inf  ;;  %v3186_v53 = vadd.f32 %v3185_v4, %v6018_v36  ;;  %v6080_v48 = vld [vmem:[%s6499_s4] ss:$0 sm:$0xff]  ;;  %s4274_s4 = smov [#allocation3]  }
 0x225   :  { %v4146_v25 = vpop.eup %4145  ;;  %v2561_v2 = vmul.f32 %v4144_v40, %v6042_v56  ;;  %v1686_v54 = vmul.f32 %v1552_v60, %v1552_v60  ;;  %v2646_v31 = vsub.f32 %v587_v26, %v1552_v60  ;;  %v602_v58 = vadd.f32 %v5685_v41, %v5612_v34  ;;  %s3352_s27 = sshll.u32 %s4274_s4, 4  ;;  %s6383_s27 = int_to_ptr.vmem [resolvable:$true] %s3352_s27 }
 0x226   :  { %v4148_v52 = vpop.eup %4147  ;;  %v6062_v15 = vmax.f32 %v1879_v59, 0.0  ;;  %v1567_v1 = vadd.f32 %v5685_v41, %v5614_v43  ;;  %v2563_v11 = vmul.f32 %v4146_v25, %v6024_v27  ;;  %vm2270_vm10 = vcmp.eq.f32.partialorder %v6042_v56, inf  ;;  %s4226_s28 = scalar_lea.vmem %s6383_s27, 8192  ;;  %p4231_p1 = scmp.lt.s32.totalorder %s6383_s27, %s6383_s27 }
 0x227   :  { %v2911_v19 = vadd.f32 %v2910_v33, %v2561_v2  ;;  %v1750_v0 = vmul.f32 3.0, %v1686_v54  ;;  %v2454_v21 = vadd.f32 1e-12, %v1686_v54  ;;  %v3259_v12 = vmul.f32 %v592_v37, %v592_v37  ;;  %724 = vst [vmem:[#allocation3 + $0x188] sm:$0xff] %v602_v58  ;;  %p4227_p0 = scmp.ne.s32.totalorder %s6383_s27, %s4226_s28  ;;  %p4232_p2 = scmp.lt.s32.totalorder %s4226_s28, %s4226_s28 }
 0x228   :  { %4151 = vrcp.f32 %v2455_v35  ;;  %v2276_v14 = vmul.f32 %v4148_v52, %v6024_v27  ;;  %v2710_v36 = vmul.f32 %v2646_v31, %v2646_v31  ;;  %v3053_v33 = vadd.f32 %v3052_v61, %v2646_v31 }
 0x229   :  { %v1814_v6 = vmul.f32 0.33333334, %v1750_v0  ;;  %4153 = vrcp.f32 %v2454_v21  ;;  %v2912_v34 = vadd.f32 %v2911_v19, %v2563_v11  ;;  %v3124_v4 = vmul.f32 %v2646_v31, %v587_v26  ;;  %p4233_p3 = por %p4232_p2, %p4231_p1 }
 0x22a   :  { %4155 = vrsqrt.f32 %v6062_v15  ;;  %v2273_v43 = vand.u32 2147483648, %v6042_v56  ;;  %v2983_v13 = vadd.f32 %v2982_v62, %v2710_v36  ;;  %v1689_v44 = vmul.f32 %v1567_v1, %v1567_v1 }
 0x22b   :  { %v4150_v22 = vpop.eup %4149  ;;  %v1878_v41 = vsub.f32 %v1814_v6, %v1686_v54  ;;  %v3187_v20 = vadd.f32 %v3186_v53, %v3124_v4  ;;  %v6075_v46 = vsub.f32 %v602_v58, %v1567_v1  ;;  %v597_v35 = vadd.f32 %v6080_v48, %v5623_v49  ;;  %p4234_p4 = pnand %p4233_p3, %p4227_p0 }
 0x22c   :  { %v2269_v37 = vmul.f32 %v4150_v22, %v6042_v56  ;;  %v2278_v26 = vsel %vm2277_vm9, %v6024_v27, %v2276_v14  ;;  %v1753_v60 = vmul.f32 3.0, %v1689_v44  ;;  %v3322_v40 = vadd.f32 %v3321_v51, %v3259_v12 }
 0x22d   :  { %v6087_v45 = vmax.f32 %v1878_v41, 0.0  ;;  %v2280_v59 = vand.u32 2147483648, %v6024_v27  ;;  %vm2272_vm11 = vcmp.eq.f32.partialorder %v6042_v56, 0.0  ;;  %v6095_v61 = vmul.f32 %v6075_v46, %v602_v58  ;;  %723 = vst [vmem:[#allocation3 + $0x180] sm:$0xff] %v597_v35 }
 0x22e   :  { %v2271_v62 = vsel %vm2270_vm10, %v6042_v56, %v2269_v37  ;;  %vm2279_vm12 = vcmp.eq.f32.partialorder %v6024_v27, 0.0  ;;  %v2711_v25 = vmul.f32 %v6040_v7, %v6040_v7  ;;  %v1817_v31 = vmul.f32 0.33333334, %v1753_v60 }
 0x22f   :  { %v2274_v49 = vsel %vm2272_vm11, %v2273_v43, %v2271_v62  ;;  %4157 = vrsqrt.f32 %v6087_v45  ;;  %v2281_v2 = vsel %vm2279_vm12, %v2280_v59, %v2278_v26  ;;  %v2773_v54 = vadd.f32 %v2772_v5, %v6087_v45 }
 0x230   :  { %v2841_v51 = vadd.f32 %v6051_v38, %v2274_v49  ;;  %v2457_v52 = vadd.f32 1e-12, %v1689_v44  ;;  %v3260_v56 = vmul.f32 %v597_v35, %v597_v35  ;;  %v1562_v53 = vadd.f32 %v6080_v48, %v5625_v24 }
 0x231   :  { %v2984_v19 = vadd.f32 %v2983_v13, %v2711_v25  ;;  %v1881_v21 = vsub.f32 %v1817_v31, %v1689_v44  ;;  %v2774_v1 = vadd.f32 %v2773_v54, %v6062_v15  ;;  %v3054_v11 = vadd.f32 %v3053_v33, %v6040_v7 }
 0x232   :  { %v4152_v0 = vpop.eup %4151  ;;  %v2842_v27 = vadd.f32 %v2841_v51, %v2281_v2  ;;  %vm2291_vm13 = vcmp.eq.f32.partialorder %v6062_v15, inf  ;;  %v3261_v38 = vmul.f32 %v602_v58, %v602_v58  ;;  %v3323_v14 = vadd.f32 %v3322_v40, %v3260_v56 }
 0x233   :  { %v4154_v12 = vpop.eup %4153  ;;  %v1688_v5 = vmul.f32 %v1562_v53, %v1562_v53  ;;  %v2648_v6 = vsub.f32 %v597_v35, %v1562_v53  ;;  %v6109_v22 = vmax.f32 %v1881_v21, 0.0  ;;  %v3188_v24 = vadd.f32 %v3187_v20, %v6054_v29 }
 0x234   :  { %v4156_v36 = vpop.eup %4155  ;;  %v2565_v4 = vmul.f32 %v4154_v12, %v6087_v45  ;;  %v612_v43 = vadd.f32 %v6080_v48, %v5664_v42  ;;  %4159 = vrcp.f32 %v2457_v52  ;;  %v2567_v13 = vmul.f32 %v4152_v0, %v6062_v15 }
 0x235   :  { %v1752_v41 = vmul.f32 3.0, %v1688_v5  ;;  %v2456_v7 = vadd.f32 1e-12, %v1688_v5  ;;  %v2712_v33 = vmul.f32 %v2648_v6, %v2648_v6  ;;  %vm2284_vm14 = vcmp.eq.f32.partialorder %v6087_v45, inf }
 0x236   :  { %v2913_v58 = vadd.f32 %v2912_v34, %v2565_v4  ;;  %4161 = vrsqrt.f32 %v6109_v22  ;;  %726 = vst [vmem:[#allocation3 + $0x198] sm:$0xff] %v612_v43  ;;  %v2290_v44 = vmul.f32 %v4156_v36, %v6062_v15  ;;  %vm2286_vm15 = vcmp.eq.f32.partialorder %v6087_v45, 0.0 }
 0x237   :  { %v1816_v29 = vmul.f32 0.33333334, %v1752_v41  ;;  %4163 = vrcp.f32 %v2456_v7  ;;  %v2985_v42 = vadd.f32 %v2984_v19, %v2712_v33  ;;  %v3055_v20 = vadd.f32 %v3054_v11, %v2648_v6 }
 0x238   :  { %v2914_v37 = vadd.f32 %v2913_v58, %v2567_v13  ;;  %v3126_v26 = vmul.f32 %v2648_v6, %v597_v35  ;;  %v2287_v40 = vand.u32 2147483648, %v6087_v45  ;;  %v1577_v34 = vadd.f32 %v6080_v48, %v5666_v50 }
 0x239   :  { %v4158_v60 = vpop.eup %4157  ;;  %v1880_v59 = vsub.f32 %v1816_v29, %v1688_v5  ;;  %v607_v62 = vadd.f32 %v6080_v48, %v5675_v18  ;;  %v3324_v2 = vadd.f32 %v3323_v14, %v3261_v38  ;;  %v1572_v51 = vadd.f32 %v6080_v48, %v5677_v3 }
 0x23a   :  { %v2283_v49 = vmul.f32 %v4158_v60, %v6087_v45  ;;  %v3189_v25 = vadd.f32 %v3188_v24, %v3126_v26  ;;  %v1691_v35 = vmul.f32 %v1577_v34, %v1577_v34  ;;  %v6129_v31 = vsub.f32 %v612_v43, %v1577_v34 }
 0x23b   :  { %v6127_v54 = vmax.f32 %v1880_v59, 0.0  ;;  %725 = vst [vmem:[#allocation3 + $0x190] sm:$0xff] %v607_v62  ;;  %v3262_v52 = vmul.f32 %v607_v62, %v607_v62  ;;  %v2292_v50 = vsel %vm2291_vm13, %v6062_v15, %v2290_v44  ;;  %v1690_v56 = vmul.f32 %v1572_v51, %v1572_v51 }
 0x23c   :  { %v2285_v18 = vsel %vm2284_vm14, %v6087_v45, %v2283_v49  ;;  %v2650_v53 = vsub.f32 %v607_v62, %v1572_v51  ;;  %vm2293_vm0 = vcmp.eq.f32.partialorder %v6062_v15, 0.0  ;;  %v2294_v3 = vand.u32 2147483648, %v6062_v15 }
 0x23d   :  { %v2288_v19 = vsel %vm2286_vm15, %v2287_v40, %v2285_v18  ;;  %4165 = vrsqrt.f32 %v6127_v54  ;;  %v2713_v21 = vmul.f32 %v6075_v46, %v6075_v46  ;;  %v2775_v11 = vadd.f32 %v2774_v1, %v6127_v54 }
 0x23e   :  { %v2843_v0 = vadd.f32 %v2842_v27, %v2288_v19  ;;  %v1755_v12 = vmul.f32 3.0, %v1691_v35  ;;  %v4160_v38 = vpop.eup %4159  ;;  %v2295_v14 = vsel %vm2293_vm0, %v2294_v3, %v2292_v50  ;;  %v2459_v5 = vadd.f32 1e-12, %v1691_v35 }
 0x23f   :  { %v6146_v6 = vmul.f32 %v6129_v31, %v612_v43  ;;  %v3325_v36 = vadd.f32 %v3324_v2, %v3262_v52  ;;  %vm2305_vm1 = vcmp.eq.f32.partialorder %v6109_v22, inf  ;;  %v1754_v24 = vmul.f32 3.0, %v1690_v56 }
 0x240   :  { %v4162_v15 = vpop.eup %4161  ;;  %v2844_v45 = vadd.f32 %v2843_v0, %v2295_v14  ;;  %v1819_v4 = vmul.f32 0.33333334, %v1755_v12  ;;  %v2458_v27 = vadd.f32 1e-12, %v1690_v56  ;;  %v3263_v7 = vmul.f32 %v612_v43, %v612_v43 }
 0x241   :  { %v4164_v41 = vpop.eup %4163  ;;  %4167 = vrcp.f32 %v2459_v5  ;;  %v2714_v33 = vmul.f32 %v2650_v53, %v2650_v53  ;;  %v2776_v1 = vadd.f32 %v2775_v11, %v6109_v22  ;;  %v1818_v44 = vmul.f32 0.33333334, %v1754_v24 }
 0x242   :  { %v2569_v13 = vmul.f32 %v4164_v41, %v6127_v54  ;;  %v1883_v58 = vsub.f32 %v1819_v4, %v1691_v35  ;;  %4169 = vrcp.f32 %v2458_v27  ;;  %v2571_v29 = vmul.f32 %v4160_v38, %v6109_v22 }
 0x243   :  { %v2986_v26 = vadd.f32 %v2985_v42, %v2713_v21  ;;  %v3056_v60 = vadd.f32 %v3055_v20, %v6075_v46  ;;  %v3128_v40 = vmul.f32 %v2650_v53, %v607_v62  ;;  %v2304_v59 = vmul.f32 %v4162_v15, %v6109_v22 }
 0x244   :  { %v2915_v34 = vadd.f32 %v2914_v37, %v2569_v13  ;;  %v6154_v49 = vmax.f32 %v1883_v58, 0.0  ;;  %v1882_v43 = vsub.f32 %v1818_v44, %v1690_v56  ;;  %v3190_v52 = vadd.f32 %v3189_v25, %v6095_v61 }
 0x245   :  { %v2987_v2 = vadd.f32 %v2986_v26, %v2714_v33  ;;  %v3057_v51 = vadd.f32 %v3056_v60, %v2650_v53  ;;  %v622_v35 = vadd.f32 %v6080_v48, %v5713_v23  ;;  %vm2307_vm2 = vcmp.eq.f32.partialorder %v6109_v22, 0.0 }
 0x246   :  { %v2308_v42 = vand.u32 2147483648, %v6109_v22  ;;  %vm2298_vm3 = vcmp.eq.f32.partialorder %v6127_v54, inf  ;;  %4171 = vrsqrt.f32 %v6154_v49  ;;  %vm2300_vm4 = vcmp.eq.f32.partialorder %v6127_v54, 0.0 }
 0x247   :  { %v4166_v46 = vpop.eup %4165  ;;  %v6164_v37 = vmax.f32 %v1882_v43, 0.0  ;;  %v2916_v20 = vadd.f32 %v2915_v34, %v2571_v29  ;;  %v3191_v62 = vadd.f32 %v3190_v52, %v3128_v40  ;;  %728 = vst [vmem:[#allocation3 + $0x1a8] sm:$0xff] %v622_v35  ;;  %v1587_v23 = vadd.f32 %v6080_v48, %v5721_v8 }
 0x248   :  { %v2297_v61 = vmul.f32 %v4166_v46, %v6127_v54  ;;  %v617_v25 = vadd.f32 %v6080_v48, %v5733_v39  ;;  %v3326_v50 = vadd.f32 %v3325_v36, %v3263_v7  ;;  %v2306_v18 = vsel %vm2305_vm1, %v6109_v22, %v2304_v59 }
 0x249   :  { %v2301_v56 = vand.u32 2147483648, %v6127_v54  ;;  %v2715_v53 = vmul.f32 %v6129_v31, %v6129_v31  ;;  %4173 = vrsqrt.f32 %v6164_v37  ;;  %v2777_v8 = vadd.f32 %v2776_v1, %v6164_v37 }
 0x24a   :  { %v2299_v3 = vsel %vm2298_vm3, %v6127_v54, %v2297_v61  ;;  %v1693_v19 = vmul.f32 %v1587_v23, %v1587_v23  ;;  %v6182_v39 = vsub.f32 %v622_v35, %v1587_v23  ;;  %727 = vst [vmem:[#allocation3 + $0x1a0] sm:$0xff] %v617_v25  ;;  %v3264_v11 = vmul.f32 %v617_v25, %v617_v25 }
 0x24b   :  { %v4168_v0 = vpop.eup %4167  ;;  %v2302_v21 = vsel %vm2300_vm4, %v2301_v56, %v2299_v3  ;;  %v1582_v12 = vadd.f32 %v6080_v48, %v5735_v9  ;;  %v2988_v38 = vadd.f32 %v2987_v2, %v2715_v53  ;;  %v2309_v5 = vsel %vm2307_vm2, %v2308_v42, %v2306_v18 }
 0x24c   :  { %v4170_v14 = vpop.eup %4169  ;;  %v2845_v36 = vadd.f32 %v2844_v45, %v2302_v21  ;;  %v3265_v15 = vmul.f32 %v622_v35, %v622_v35  ;;  %v1757_v4 = vmul.f32 3.0, %v1693_v19  ;;  %vm2319_vm5 = vcmp.eq.f32.partialorder %v6154_v49, inf }
 0x24d   :  { %v2575_v24 = vmul.f32 %v4168_v0, %v6154_v49  ;;  %v2573_v27 = vmul.f32 %v4170_v14, %v6164_v37  ;;  %v6194_v54 = vmul.f32 %v6182_v39, %v622_v35  ;;  %v3327_v41 = vadd.f32 %v3326_v50, %v3264_v11 }
 0x24e   :  { %v2846_v7 = vadd.f32 %v2845_v36, %v2309_v5  ;;  %v1821_v9 = vmul.f32 0.33333334, %v1757_v4  ;;  %v2461_v33 = vadd.f32 1e-12, %v1693_v19  ;;  %v1692_v1 = vmul.f32 %v1582_v12, %v1582_v12 }
 0x24f   :  { %v2917_v13 = vadd.f32 %v2916_v20, %v2573_v27  ;;  %v2652_v22 = vsub.f32 %v617_v25, %v1582_v12  ;;  %v2778_v45 = vadd.f32 %v2777_v8, %v6154_v49  ;;  %v3058_v58 = vadd.f32 %v3057_v51, %v6129_v31  ;;  %v6560_v31 = vld [vmem:[#allocation19_spill] sm:$0xff] }
 0x250   :  { %v4172_v44 = vpop.eup %4171  ;;  %v1885_v29 = vsub.f32 %v1821_v9, %v1693_v19  ;;  %v1756_v26 = vmul.f32 3.0, %v1692_v1  ;;  %v2460_v60 = vadd.f32 1e-12, %v1692_v1  ;;  %v3192_v40 = vadd.f32 %v3191_v62, %v6146_v6 }
 0x251   :  { %v2318_v59 = vmul.f32 %v4172_v44, %v6154_v49  ;;  %v2716_v34 = vmul.f32 %v2652_v22, %v2652_v22  ;;  %v2918_v43 = vadd.f32 %v2917_v13, %v2575_v24  ;;  %v3059_v2 = vadd.f32 %v3058_v58, %v2652_v22 }
 0x252   :  { %v6200_v52 = vmax.f32 %v1885_v29, 0.0  ;;  %v1820_v35 = vmul.f32 0.33333334, %v1756_v26  ;;  %4175 = vrcp.f32 %v2460_v60  ;;  %v3130_v42 = vmul.f32 %v2652_v22, %v617_v25 }
 0x253   :  { %v4174_v46 = vpop.eup %4173  ;;  %4177 = vrcp.f32 %v2461_v33  ;;  %v2989_v20 = vadd.f32 %v2988_v38, %v2716_v34  ;;  %v632_v51 = vadd.f32 %v6080_v48, %v6560_v31  ;;  %v1597_v61 = vadd.f32 %v6080_v48, %v5766_v47 }
 0x254   :  { %v2322_v6 = vand.u32 2147483648, %v6154_v49  ;;  %v2311_v62 = vmul.f32 %v4174_v46, %v6164_v37  ;;  %vm2312_vm6 = vcmp.eq.f32.partialorder %v6164_v37, inf  ;;  %4179 = vrsqrt.f32 %v6200_v52 }
 0x255   :  { %vm2314_vm7 = vcmp.eq.f32.partialorder %v6164_v37, 0.0  ;;  %v2315_v23 = vand.u32 2147483648, %v6164_v37  ;;  %v1884_v25 = vsub.f32 %v1820_v35, %v1692_v1  ;;  %v3193_v50 = vadd.f32 %v3192_v40, %v3130_v42  ;;  %730 = vst [vmem:[#allocation3 + $0x1b8] sm:$0xff] %v632_v51 }
 0x256   :  { %v2320_v18 = vsel %vm2319_vm5, %v6154_v49, %v2318_v59  ;;  %v2313_v47 = vsel %vm2312_vm6, %v6164_v37, %v2311_v62  ;;  %v1695_v56 = vmul.f32 %v1597_v61, %v1597_v61  ;;  %v6216_v53 = vsub.f32 %v632_v51, %v1597_v61 }
 0x257   :  { %v2316_v3 = vsel %vm2314_vm7, %v2315_v23, %v2313_v47  ;;  %v6218_v8 = vmax.f32 %v1884_v25, 0.0  ;;  %v627_v19 = vadd.f32 %v6080_v48, %v5783_v55  ;;  %v3328_v0 = vadd.f32 %v3327_v41, %v3265_v15 }
 0x258   :  { %vm2321_vm8 = vcmp.eq.f32.partialorder %v6154_v49, 0.0  ;;  %v2847_v21 = vadd.f32 %v2846_v7, %v2316_v3  ;;  %v1759_v11 = vmul.f32 3.0, %v1695_v56  ;;  %v2717_v37 = vmul.f32 %v6182_v39, %v6182_v39 }
 0x259   :  { %v2323_v12 = vsel %vm2321_vm8, %v2322_v6, %v2320_v18  ;;  %4181 = vrsqrt.f32 %v6218_v8  ;;  %729 = vst [vmem:[#allocation3 + $0x1b0] sm:$0xff] %v627_v19  ;;  %v2779_v38 = vadd.f32 %v2778_v45, %v6218_v8  ;;  %v2463_v36 = vadd.f32 1e-12, %v1695_v56 }
 0x25a   :  { %v2848_v14 = vadd.f32 %v2847_v21, %v2323_v12  ;;  %v1823_v5 = vmul.f32 0.33333334, %v1759_v11  ;;  %v6228_v4 = vmul.f32 %v6216_v53, %v632_v51  ;;  %v3266_v55 = vmul.f32 %v627_v19, %v627_v19 }
 0x25b   :  { %v1592_v49 = vadd.f32 %v6080_v48, %v5785_v32  ;;  %v2780_v27 = vadd.f32 %v2779_v38, %v6200_v52  ;;  %v2990_v41 = vadd.f32 %v2989_v20, %v2717_v37  ;;  %v3060_v7 = vadd.f32 %v3059_v2, %v6182_v39 }
 0x25c   :  { %v4176_v15 = vpop.eup %4175  ;;  %v1887_v24 = vsub.f32 %v1823_v5, %v1695_v56  ;;  %v3329_v1 = vadd.f32 %v3328_v0, %v3266_v55  ;;  %vm2333_vm9 = vcmp.eq.f32.partialorder %v6200_v52, inf  ;;  %v3194_v32 = vadd.f32 %v3193_v50, %v6194_v54 }
 0x25d   :  { %v4178_v9 = vpop.eup %4177  ;;  %v2577_v33 = vmul.f32 %v4176_v15, %v6218_v8  ;;  %v1694_v13 = vmul.f32 %v1592_v49, %v1592_v49  ;;  %v2654_v22 = vsub.f32 %v627_v19, %v1592_v49  ;;  %v642_v44 = vadd.f32 %v6080_v48, %v5820_v28 }
 0x25e   :  { %v4180_v45 = vpop.eup %4179  ;;  %v6236_v58 = vmax.f32 %v1887_v24, 0.0  ;;  %v1607_v39 = vadd.f32 %v6080_v48, %v5822_v17  ;;  %v2579_v40 = vmul.f32 %v4178_v9, %v6200_v52  ;;  %vm2326_vm10 = vcmp.eq.f32.partialorder %v6218_v8, inf }
 0x25f   :  { %v2919_v29 = vadd.f32 %v2918_v43, %v2577_v33  ;;  %v1758_v26 = vmul.f32 3.0, %v1694_v13  ;;  %v2462_v60 = vadd.f32 1e-12, %v1694_v13  ;;  %v3267_v59 = vmul.f32 %v632_v51, %v632_v51  ;;  %732 = vst [vmem:[#allocation3 + $0x1c8] sm:$0xff] %v642_v44 }
 0x260   :  { %4183 = vrcp.f32 %v2463_v36  ;;  %v2332_v34 = vmul.f32 %v4180_v45, %v6200_v52  ;;  %v2718_v54 = vmul.f32 %v2654_v22, %v2654_v22  ;;  %v3061_v43 = vadd.f32 %v3060_v7, %v2654_v22 }
 0x261   :  { %v1822_v2 = vmul.f32 0.33333334, %v1758_v26  ;;  %4185 = vrcp.f32 %v2462_v60  ;;  %v2920_v28 = vadd.f32 %v2919_v29, %v2579_v40  ;;  %v3132_v35 = vmul.f32 %v2654_v22, %v627_v19 }
 0x262   :  { %4187 = vrsqrt.f32 %v6236_v58  ;;  %v2329_v17 = vand.u32 2147483648, %v6218_v8  ;;  %v2991_v20 = vadd.f32 %v2990_v41, %v2718_v54  ;;  %v1697_v31 = vmul.f32 %v1607_v39, %v1607_v39  ;;  %v6561_v54 = vld [vmem:[#allocation20_spill] sm:$0xff] }
 0x263   :  { %v4182_v42 = vpop.eup %4181  ;;  %v1886_v46 = vsub.f32 %v1822_v2, %v1694_v13  ;;  %v3195_v61 = vadd.f32 %v3194_v32, %v3132_v35  ;;  %v6249_v6 = vsub.f32 %v642_v44, %v1607_v39  ;;  %v637_v62 = vadd.f32 %v6080_v48, %v5831_v10 }
 0x264   :  { %v2325_v51 = vmul.f32 %v4182_v42, %v6218_v8  ;;  %v2334_v23 = vsel %vm2333_vm9, %v6200_v52, %v2332_v34  ;;  %v1761_v50 = vmul.f32 3.0, %v1697_v31  ;;  %v3330_v18 = vadd.f32 %v3329_v1, %v3267_v59 }
 0x265   :  { %v6256_v25 = vmax.f32 %v1886_v46, 0.0  ;;  %v2336_v47 = vand.u32 2147483648, %v6200_v52  ;;  %vm2328_vm11 = vcmp.eq.f32.partialorder %v6218_v8, 0.0  ;;  %v6264_v3 = vmul.f32 %v6249_v6, %v642_v44  ;;  %731 = vst [vmem:[#allocation3 + $0x1c0] sm:$0xff] %v637_v62 }
 0x266   :  { %v2327_v56 = vsel %vm2326_vm10, %v6218_v8, %v2325_v51  ;;  %vm2335_vm12 = vcmp.eq.f32.partialorder %v6200_v52, 0.0  ;;  %v2719_v19 = vmul.f32 %v6216_v53, %v6216_v53  ;;  %v1825_v12 = vmul.f32 0.33333334, %v1761_v50 }
 0x267   :  { %v2330_v10 = vsel %vm2328_vm11, %v2329_v17, %v2327_v56  ;;  %4189 = vrsqrt.f32 %v6256_v25  ;;  %v2337_v0 = vsel %vm2335_vm12, %v2336_v47, %v2334_v23  ;;  %v2781_v11 = vadd.f32 %v2780_v27, %v6256_v25  ;;  %v6562_v17 = vld [vmem:[#allocation21_spill] sm:$0xff] }
 0x268   :  { %v2849_v21 = vadd.f32 %v2848_v14, %v2330_v10  ;;  %v2465_v37 = vadd.f32 1e-12, %v1697_v31  ;;  %v3268_v38 = vmul.f32 %v637_v62, %v637_v62  ;;  %v1602_v8 = vadd.f32 %v6080_v48, %v5833_v30 }
 0x269   :  { %v2992_v5 = vadd.f32 %v2991_v20, %v2719_v19  ;;  %v1889_v52 = vsub.f32 %v1825_v12, %v1697_v31  ;;  %v2782_v49 = vadd.f32 %v2781_v11, %v6236_v58  ;;  %v3062_v15 = vadd.f32 %v3061_v43, %v6216_v53 }
 0x26a   :  { %v4184_v36 = vpop.eup %4183  ;;  %v2850_v55 = vadd.f32 %v2849_v21, %v2337_v0  ;;  %vm2347_vm13 = vcmp.eq.f32.partialorder %v6236_v58, inf  ;;  %v3269_v14 = vmul.f32 %v642_v44, %v642_v44  ;;  %v3331_v41 = vadd.f32 %v3330_v18, %v3268_v38 }
 0x26b   :  { %v4186_v24 = vpop.eup %4185  ;;  %v1696_v27 = vmul.f32 %v1602_v8, %v1602_v8  ;;  %v2656_v7 = vsub.f32 %v637_v62, %v1602_v8  ;;  %v6277_v1 = vmax.f32 %v1889_v52, 0.0  ;;  %v3196_v30 = vadd.f32 %v3195_v61, %v6228_v4 }
 0x26c   :  { %v4188_v9 = vpop.eup %4187  ;;  %v2581_v33 = vmul.f32 %v4186_v24, %v6256_v25  ;;  %v652_v13 = vadd.f32 %v6080_v48, %v5872_v16  ;;  %4191 = vrcp.f32 %v2465_v37  ;;  %v2583_v32 = vmul.f32 %v4184_v36, %v6236_v58 }
 0x26d   :  { %v1760_v22 = vmul.f32 3.0, %v1696_v27  ;;  %v2464_v53 = vadd.f32 1e-12, %v1696_v27  ;;  %v2720_v45 = vmul.f32 %v2656_v7, %v2656_v7  ;;  %vm2340_vm14 = vcmp.eq.f32.partialorder %v6256_v25, inf }
 0x26e   :  { %v2921_v44 = vadd.f32 %v2920_v28, %v2581_v33  ;;  %4193 = vrsqrt.f32 %v6277_v1  ;;  %734 = vst [vmem:[#allocation3 + $0x1d8] sm:$0xff] %v652_v13  ;;  %v2346_v29 = vmul.f32 %v4188_v9, %v6236_v58  ;;  %vm2342_vm15 = vcmp.eq.f32.partialorder %v6256_v25, 0.0 }
 0x26f   :  { %v1824_v4 = vmul.f32 0.33333334, %v1760_v22  ;;  %4195 = vrcp.f32 %v2464_v53  ;;  %v2993_v16 = vadd.f32 %v2992_v5, %v2720_v45  ;;  %v3063_v60 = vadd.f32 %v3062_v15, %v2656_v7 }
 0x270   :  { %v2922_v26 = vadd.f32 %v2921_v44, %v2583_v32  ;;  %v3134_v39 = vmul.f32 %v2656_v7, %v637_v62  ;;  %v2343_v59 = vand.u32 2147483648, %v6256_v25  ;;  %v1617_v2 = vadd.f32 %v6080_v48, %v5874_v57 }
 0x271   :  { %v4190_v40 = vpop.eup %4189  ;;  %v1888_v34 = vsub.f32 %v1824_v4, %v1696_v27  ;;  %v647_v28 = vadd.f32 %v6080_v48, %v6561_v54  ;;  %v3332_v42 = vadd.f32 %v3331_v41, %v3269_v14  ;;  %v1612_v46 = vadd.f32 %v6080_v48, %v6562_v17 }
 0x272   :  { %v2339_v43 = vmul.f32 %v4190_v40, %v6256_v25  ;;  %v3197_v35 = vadd.f32 %v3196_v30, %v3134_v39  ;;  %v1699_v31 = vmul.f32 %v1617_v2, %v1617_v2  ;;  %v6297_v51 = vsub.f32 %v652_v13, %v1617_v2 }
 0x273   :  { %v6295_v20 = vmax.f32 %v1888_v34, 0.0  ;;  %733 = vst [vmem:[#allocation3 + $0x1d0] sm:$0xff] %v647_v28  ;;  %v3270_v61 = vmul.f32 %v647_v28, %v647_v28  ;;  %v2348_v57 = vsel %vm2347_vm13, %v6236_v58, %v2346_v29  ;;  %v1698_v23 = vmul.f32 %v1612_v46, %v1612_v46  ;;  %v6563_v29 = vld [vmem:[#allocation22_spill] sm:$0xff]  ;;  %v6565_v34 = vld [vmem:[#allocation15_spill] sm:$0xff] }
 0x274   :  { %v2341_v62 = vsel %vm2340_vm14, %v6256_v25, %v2339_v43  ;;  %v2658_v50 = vsub.f32 %v647_v28, %v1612_v46  ;;  %vm2349_vm0 = vcmp.eq.f32.partialorder %v6236_v58, 0.0  ;;  %v2350_v18 = vand.u32 2147483648, %v6236_v58 }
 0x275   :  { %v2344_v47 = vsel %vm2342_vm15, %v2343_v59, %v2341_v62  ;;  %4197 = vrsqrt.f32 %v6295_v20  ;;  %v2721_v10 = vmul.f32 %v6249_v6, %v6249_v6  ;;  %v2783_v19 = vadd.f32 %v2782_v49, %v6295_v20 }
 0x276   :  { %v2851_v56 = vadd.f32 %v2850_v55, %v2344_v47  ;;  %v1763_v0 = vmul.f32 3.0, %v1699_v31  ;;  %v4192_v21 = vpop.eup %4191  ;;  %v2351_v11 = vsel %vm2349_vm0, %v2350_v18, %v2348_v57  ;;  %v2467_v12 = vadd.f32 1e-12, %v1699_v31 }
 0x277   :  { %v6314_v37 = vmul.f32 %v6297_v51, %v652_v13  ;;  %v3333_v38 = vadd.f32 %v3332_v42, %v3270_v61  ;;  %v1762_v5 = vmul.f32 3.0, %v1698_v23  ;;  %v2466_v36 = vadd.f32 1e-12, %v1698_v23 }
 0x278   :  { %v4194_v58 = vpop.eup %4193  ;;  %v2852_v8 = vadd.f32 %v2851_v56, %v2351_v11  ;;  %v1827_v25 = vmul.f32 0.33333334, %v1763_v0  ;;  %v3271_v55 = vmul.f32 %v652_v13, %v652_v13  ;;  %4199 = vrcp.f32 %v2467_v12 }
 0x279   :  { %v4196_v52 = vpop.eup %4195  ;;  %v2722_v15 = vmul.f32 %v2658_v50, %v2658_v50  ;;  %v2784_v24 = vadd.f32 %v2783_v19, %v6277_v1  ;;  %v1826_v41 = vmul.f32 0.33333334, %v1762_v5  ;;  %4201 = vrcp.f32 %v2466_v36 }
 0x27a   :  { %v2585_v49 = vmul.f32 %v4196_v52, %v6295_v20  ;;  %v1891_v14 = vsub.f32 %v1827_v25, %v1699_v31  ;;  %v2587_v27 = vmul.f32 %v4192_v21, %v6277_v1  ;;  %v2994_v7 = vadd.f32 %v2993_v16, %v2721_v10  ;;  %v6567_v52 = vld [vmem:[#allocation16_spill] sm:$0xff] }
 0x27b   :  { %v3064_v9 = vadd.f32 %v3063_v60, %v6249_v6  ;;  %v3136_v33 = vmul.f32 %v2658_v50, %v647_v28  ;;  %v2360_v30 = vmul.f32 %v4194_v58, %v6277_v1  ;;  %v1890_v13 = vsub.f32 %v1826_v41, %v1698_v23  ;;  %v6566_v23 = vld [vmem:[#allocation10_spill] sm:$0xff] }
 0x27c   :  { %v2923_v22 = vadd.f32 %v2922_v26, %v2585_v49  ;;  %v6321_v53 = vmax.f32 %v1891_v14, 0.0  ;;  %v2995_v45 = vadd.f32 %v2994_v7, %v2722_v15  ;;  %v3198_v44 = vadd.f32 %v3197_v35, %v6264_v3  ;;  %v6564_v3 = vld [vmem:[#allocation9_spill] sm:$0xff] }
 0x27d   :  { %v3065_v32 = vadd.f32 %v3064_v9, %v2658_v50  ;;  %v662_v4 = vadd.f32 %v6080_v48, %v6563_v29  ;;  %vm2361_vm1 = vcmp.eq.f32.partialorder %v6277_v1, inf  ;;  %v2364_v16 = vand.u32 2147483648, %v6277_v1 }
 0x27e   :  { %vm2354_vm2 = vcmp.eq.f32.partialorder %v6295_v20, inf  ;;  %4203 = vrsqrt.f32 %v6321_v53  ;;  %v6330_v26 = vmax.f32 %v1890_v13, 0.0  ;;  %v2924_v60 = vadd.f32 %v2923_v22, %v2587_v27  ;;  %v6568_v22 = vld [vmem:[#allocation11_spill] sm:$0xff] }
 0x27f   :  { %v4198_v6 = vpop.eup %4197  ;;  %v3199_v39 = vadd.f32 %v3198_v44, %v3136_v33  ;;  %736 = vst [vmem:[#allocation3 + $0x1e8] sm:$0xff] %v662_v4  ;;  %v1627_v59 = vadd.f32 %v6080_v48, %v6564_v3  ;;  %v657_v2 = vadd.f32 %v6080_v48, %v6565_v34  ;;  %v3334_v54 = vadd.f32 %v3333_v38, %v3271_v55 }
 0x280   :  { %v2353_v40 = vmul.f32 %v4198_v6, %v6295_v20  ;;  %v2362_v28 = vsel %vm2361_vm1, %v6277_v1, %v2360_v30  ;;  %vm2356_vm3 = vcmp.eq.f32.partialorder %v6295_v20, 0.0  ;;  %v2357_v43 = vand.u32 2147483648, %v6295_v20 }
 0x281   :  { %v2723_v35 = vmul.f32 %v6297_v51, %v6297_v51  ;;  %v6344_v17 = vadd.f32 %v2784_v24, %v6330_v26  ;;  %v1701_v46 = vmul.f32 %v1627_v59, %v1627_v59  ;;  %v6346_v31 = vsub.f32 %v662_v4, %v1627_v59  ;;  %735 = vst [vmem:[#allocation3 + $0x1e0] sm:$0xff] %v657_v2 }
 0x282   :  { %v2355_v42 = vsel %vm2354_vm2, %v6295_v20, %v2353_v40  ;;  %v4200_v61 = vpop.eup %4199  ;;  %v3272_v62 = vmul.f32 %v657_v2, %v657_v2  ;;  %v1622_v50 = vadd.f32 %v6080_v48, %v6566_v23  ;;  %4205 = vrsqrt.f32 %v6330_v26 }
 0x283   :  { %v2358_v57 = vsel %vm2356_vm3, %v2357_v43, %v2355_v42  ;;  %v2996_v18 = vadd.f32 %v2995_v45, %v2723_v35  ;;  %v4202_v47 = vpop.eup %4201  ;;  %v3273_v20 = vmul.f32 %v662_v4, %v662_v4  ;;  %v1765_v10 = vmul.f32 3.0, %v1701_v46 }
 0x284   :  { %v6350_v56 = vadd.f32 %v2852_v8, %v2358_v57  ;;  %v2589_v19 = vmul.f32 %v4202_v47, %v6330_v26  ;;  %v2469_v0 = vadd.f32 1e-12, %v1701_v46  ;;  %v6355_v21 = vmul.f32 %v6346_v31, %v662_v4 }
 0x285   :  { %v3335_v11 = vadd.f32 %v3334_v54, %v3272_v62  ;;  %v2591_v12 = vmul.f32 %v4200_v61, %v6321_v53  ;;  %v1829_v38 = vmul.f32 0.33333334, %v1765_v10  ;;  %v1700_v58 = vmul.f32 %v1622_v50, %v1622_v50 }
 0x286   :  { %v2660_v25 = vsub.f32 %v657_v2, %v1622_v50  ;;  %v2925_v5 = vadd.f32 %v2924_v60, %v2589_v19  ;;  %v3066_v8 = vadd.f32 %v3065_v32, %v6297_v51  ;;  %v3200_v36 = vadd.f32 %v3199_v39, %v6314_v37  ;;  %v6569_v39 = vld [vmem:[#allocation23_spill] sm:$0xff] }
 0x287   :  { %v672_v55 = vadd.f32 %v6080_v48, %v6567_v52  ;;  %v1893_v15 = vsub.f32 %v1829_v38, %v1701_v46  ;;  %v1764_v24 = vmul.f32 3.0, %v1700_v58  ;;  %v2468_v49 = vadd.f32 1e-12, %v1700_v58 }
 0x288   :  { %v2724_v14 = vmul.f32 %v2660_v25, %v2660_v25  ;;  %v4204_v41 = vpop.eup %4203  ;;  %4207 = vrcp.f32 %v2469_v0  ;;  %v6362_v27 = vadd.f32 %v2925_v5, %v2591_v12  ;;  %v6364_v7 = vadd.f32 %v3066_v8, %v2660_v25 }
 0x289   :  { %v3138_v9 = vmul.f32 %v2660_v25, %v657_v2  ;;  %738 = vst [vmem:[#allocation3 + $0x1f8] sm:$0xff] %v672_v55  ;;  %v6366_v33 = vmax.f32 %v1893_v15, 0.0  ;;  %v1828_v51 = vmul.f32 0.33333334, %v1764_v24  ;;  %4209 = vrcp.f32 %v2468_v49 }
 0x28a   :  { %v2997_v37 = vadd.f32 %v2996_v18, %v2724_v14  ;;  %vm2363_vm4 = vcmp.eq.f32.partialorder %v6277_v1, 0.0  ;;  %v1637_v13 = vadd.f32 %v6080_v48, %v6568_v22  ;;  %v2374_v32 = vmul.f32 %v4204_v41, %v6321_v53 }
 0x28b   :  { %v3201_v30 = vadd.f32 %v3200_v36, %v3138_v9  ;;  %v6373_v45 = vsel %vm2363_vm4, %v2364_v16, %v2362_v28  ;;  %vm2375_vm5 = vcmp.eq.f32.partialorder %v6321_v53, inf  ;;  %v2725_v44 = vmul.f32 %v6346_v31, %v6346_v31 }
 0x28c   :  { %v1892_v29 = vsub.f32 %v1828_v51, %v1700_v58  ;;  %v1703_v4 = vmul.f32 %v1637_v13, %v1637_v13  ;;  %v6379_v6 = vsub.f32 %v672_v55, %v1637_v13  ;;  %v667_v60 = vadd.f32 %v6080_v48, %v5976_v63  ;;  %v4206_v1 = vpop.eup %4205 }
 0x28d   :  { %4211 = vrsqrt.f32 %v6366_v33  ;;  %v3336_v16 = vadd.f32 %v3335_v11, %v3273_v20  ;;  %v1632_v40 = vadd.f32 %v6080_v48, %v6569_v39  ;;  %v2998_v3 = vadd.f32 %v2997_v37, %v2725_v44 }
 0x28e   :  { %v2378_v59 = vand.u32 2147483648, %v6321_v53  ;;  %v6389_v34 = vmax.f32 %v1892_v29, 0.0  ;;  %v1767_v2 = vmul.f32 3.0, %v1703_v4  ;;  %v2471_v54 = vadd.f32 1e-12, %v1703_v4  ;;  %737 = vst [vmem:[#allocation3 + $0x1f0] sm:$0xff] %v667_v60 }
 0x28f   :  { %v3275_v63 = vmul.f32 %v672_v55, %v672_v55  ;;  %v3141_v28 = vmul.f32 %v6379_v6, %v672_v55  ;;  %v3274_v43 = vmul.f32 %v667_v60, %v667_v60  ;;  %v1702_v35 = vmul.f32 %v1632_v40, %v1632_v40 }
 0x290   :  { %4237 = shalt.err (!%p4234_p4)
}
 0x291   :  { %s4238_s0 = scalar_lea.hbm %s6500_s5, 8192 }
 0x292   :  { %p4239_p5 = scmp.ne.s32.totalorder %s6500_s5, %s4238_s0  ;;  %p4242_p6 = scmp.lt.u32.totalorder %s4238_s0, %s6500_s5 }
 0x294   :  { %p4244_p7 = pnand %p4242_p6, %p4239_p5 }
 0x296   :  { %4247 = shalt.err (!%p4244_p7)
}
 0x297   :  { %s4275_s9 = smov 128   ;;  %s4276_s10 = smov 8   ;;  %v6412_v48 = vsel %vm2375_vm5, %v6321_v53, %v2374_v32  ;;  %vm2368_vm6 = vcmp.eq.f32.partialorder %v6330_v26, inf  ;;  %v2371_v42 = vand.u32 2147483648, %v6330_v26  ;;  %4213 = vrsqrt.f32 %v6389_v34  ;;  %v4208_v62 = vpop.eup %4207 }
 0x298   :  { %3358 = dma.vmem_to_hbm [thread:$0]  %s6383_s27, 8192, %s6500_s5, [#allocation4], %s4275_s9, %s4275_s9, %s4276_s10   ;;  %v2367_v46 = vmul.f32 %v4206_v1, %v6330_v26  ;;  %v1831_v61 = vmul.f32 0.33333334, %v1767_v2  ;;  %4215 = vrcp.f32 %v2471_v54  ;;  %v3337_v57 = vadd.f32 %v3336_v16, %v3274_v43  ;;  %v4210_v20 = vpop.eup %4209 }
 0x299   :  { %vm2370_vm7 = vcmp.eq.f32.partialorder %v6330_v26, 0.0  ;;  %v1766_v23 = vmul.f32 3.0, %v1702_v35  ;;  %v2470_v50 = vadd.f32 1e-12, %v1702_v35  ;;  %v2662_v18 = vsub.f32 %v667_v60, %v1632_v40  ;;  %v4212_v24 = vpop.eup %4211  ;;  %s4278_s5 = smov [#allocation5]  }
 0x29a   :  { %v3068_v47 = vadd.f32 %v6364_v7, %v6346_v31  ;;  %v1895_v10 = vsub.f32 %v1831_v61, %v1703_v4  ;;  %v2727_v19 = vmul.f32 %v6379_v6, %v6379_v6  ;;  %v3338_v0 = vadd.f32 %v3337_v57, %v3275_v63  ;;  %s3365_s13 = sshll.u32 %s4278_s5, 4  ;;  %s3366_s13 = int_to_ptr.vmem [resolvable:$true] %s3365_s13 }
 0x29b   :  { %v3202_v11 = vadd.f32 %v3201_v30, %v6355_v21  ;;  %v2593_v12 = vmul.f32 %v4210_v20, %v6389_v34  ;;  %v1830_v38 = vmul.f32 0.33333334, %v1766_v23  ;;  %4217 = vrcp.f32 %v2470_v50  ;;  %s4248_s14 = scalar_lea.vmem %s3366_s13, 128  ;;  %p4253_p9 = scmp.lt.s32.totalorder %s3366_s13, %s3366_s13 }
 0x29c   :  { %v2726_v58 = vmul.f32 %v2662_v18, %v2662_v18  ;;  %vm2377_vm8 = vcmp.eq.f32.partialorder %v6321_v53, 0.0  ;;  %v6426_v25 = vmax.f32 %v1895_v10, 0.0  ;;  %v3339_v5 = vrot.slane %v3338_v0, 4  ;;  %p4249_p8 = scmp.ne.s32.totalorder %s3366_s13, %s4248_s14  ;;  %p4254_p10 = scmp.lt.s32.totalorder %s4248_s14, %s4248_s14 }
 0x29d   :  { %v3069_v8 = vadd.f32 %v3068_v47, %v2662_v18  ;;  %v3140_v31 = vmul.f32 %v2662_v18, %v667_v60  ;;  %v2595_v36 = vmul.f32 %v4208_v62, %v6366_v33  ;;  %v2927_v52 = vadd.f32 %v6362_v27, %v2593_v12 }
 0x29e   :  { %v1894_v55 = vsub.f32 %v1830_v38, %v1702_v35  ;;  %v2999_v15 = vadd.f32 %v2998_v3, %v2726_v58  ;;  %4219 = vrsqrt.f32 %v6426_v25  ;;  %v3340_v21 = vadd.f32 %v3339_v5, %v3338_v0  ;;  %p4255_p11 = por %p4254_p10, %p4253_p9 }
 0x29f   :  { %v3070_v49 = vadd.f32 %v3069_v8, %v6379_v6  ;;  %v3203_v14 = vadd.f32 %v3202_v11, %v3140_v31  ;;  %v2369_v41 = vsel %vm2368_vm6, %v6330_v26, %v2367_v46  ;;  %v2928_v9 = vadd.f32 %v2927_v52, %v2595_v36 }
 0x2a0   :  { %v6435_v7 = vmax.f32 %v1894_v55, 0.0  ;;  %v3000_v51 = vadd.f32 %v2999_v15, %v2727_v19  ;;  %vm2389_vm9 = vcmp.eq.f32.partialorder %v6366_v33, inf  ;;  %v3341_v27 = vrot.slane %v3340_v21, 2  ;;  %p4256_p12 = pnand %p4255_p11, %p4249_p8 }
 0x2a1   :  { %v3071_v37 = vrot.slane %v3070_v49, 4  ;;  %v3204_v30 = vadd.f32 %v3203_v14, %v3141_v28  ;;  %v4214_v22 = vpop.eup %4213  ;;  %v2388_v13 = vmul.f32 %v4212_v24, %v6366_v33  ;;  %v2392_v32 = vand.u32 2147483648, %v6366_v33 }
 0x2a2   :  { %4221 = vrsqrt.f32 %v6435_v7  ;;  %v3001_v44 = vrot.slane %v3000_v51, 4  ;;  %v4216_v29 = vpop.eup %4215  ;;  %v2372_v4 = vsel %vm2370_vm7, %v2371_v42, %v2369_v41  ;;  %v3342_v6 = vadd.f32 %v3341_v27, %v3340_v21 }
 0x2a3   :  { %v3072_v60 = vadd.f32 %v3071_v37, %v3070_v49  ;;  %v3205_v1 = vrot.slane %v3204_v30, 4  ;;  %v2381_v16 = vmul.f32 %v4214_v22, %v6389_v34  ;;  %vm2382_vm10 = vcmp.eq.f32.partialorder %v6389_v34, inf }
 0x2a4   :  { %vm2384_vm11 = vcmp.eq.f32.partialorder %v6389_v34, 0.0  ;;  %v3002_v39 = vadd.f32 %v3001_v44, %v3000_v51  ;;  %v2385_v40 = vand.u32 2147483648, %v6389_v34  ;;  %v3343_v3 = vrot.slane %v3342_v6, 1 }
 0x2a5   :  { %v3073_v2 = vrot.slane %v3072_v60, 2  ;;  %v3206_v54 = vadd.f32 %v3205_v1, %v3204_v30  ;;  %v4218_v63 = vpop.eup %4217  ;;  %v2599_v28 = vmul.f32 %v4216_v29, %v6426_v25  ;;  %v2379_v43 = vsel %vm2377_vm8, %v2378_v59, %v6412_v48 }
 0x2a6   :  { %v3003_v26 = vrot.slane %v3002_v39, 2  ;;  %v2390_v35 = vsel %vm2389_vm9, %v6366_v33, %v2388_v13  ;;  %v3344_v42 = vadd.f32 %v3343_v3, %v3342_v6  ;;  %v2597_v46 = vmul.f32 %v4218_v63, %v6435_v7 }
 0x2a7   :  { %v3074_v61 = vadd.f32 %v3073_v2, %v3072_v60  ;;  %v3207_v57 = vrot.slane %v3206_v54, 2  ;;  %v2383_v62 = vsel %vm2382_vm10, %v6389_v34, %v2381_v16  ;;  %v2786_v50 = vadd.f32 %v6344_v17, %v6321_v53 }
 0x2a8   :  { %v3004_v23 = vadd.f32 %v3003_v26, %v3002_v39  ;;  %v2854_v59 = vadd.f32 %v6350_v56, %v6373_v45  ;;  %v4220_v48 = vpop.eup %4219  ;;  %3345 = vst [vmem:[#allocation5 + $0x6] sm:$0x1] %v3344_v42  ;;  %v2929_v18 = vadd.f32 %v2928_v9, %v2597_v46  ;;  %vm2391_vm12 = vcmp.eq.f32.partialorder %v6366_v33, 0.0 }
 0x2a9   :  { %v3075_v47 = vrot.slane %v3074_v61, 1  ;;  %v3208_v20 = vadd.f32 %v3207_v57, %v3206_v54  ;;  %v2787_v19 = vadd.f32 %v2786_v50, %v6389_v34  ;;  %v4277_v11 = vmov 0.0  }
 0x2aa   :  { %v3005_v10 = vrot.slane %v3004_v23, 1  ;;  %v2855_v0 = vadd.f32 %v2854_v59, %v2372_v4  ;;  %3346 = vst [vmem:[#allocation5 + $0x7] sm:$0x1] %v4277_v11  ;;  %v2930_v12 = vadd.f32 %v2929_v18, %v2599_v28  ;;  %v2386_v53 = vsel %vm2384_vm11, %v2385_v40, %v2383_v62 }
 0x2ab   :  { %v3076_v38 = vadd.f32 %v3075_v47, %v3074_v61  ;;  %v3209_v58 = vrot.slane %v3208_v20, 1  ;;  %v2402_v45 = vmul.f32 %v4220_v48, %v6426_v25  ;;  %v2788_v5 = vadd.f32 %v2787_v19, %v6366_v33 }
 0x2ac   :  { %v4222_v17 = vpop.eup %4221  ;;  %v3006_v56 = vadd.f32 %v3005_v10, %v3004_v23  ;;  %v2856_v8 = vadd.f32 %v2855_v0, %v2379_v43  ;;  %v2931_v36 = vrot.slane %v2930_v12, 4  ;;  %v2393_v55 = vsel %vm2391_vm12, %v2392_v32, %v2390_v35 }
 0x2ad   :  { %v2395_v31 = vmul.f32 %v4222_v17, %v6435_v7  ;;  %3077 = vst [vmem:[#allocation5 + $0x4] sm:$0x1] %v3076_v38  ;;  %v3210_v52 = vadd.f32 %v3209_v58, %v3208_v20  ;;  %vm2396_vm13 = vcmp.eq.f32.partialorder %v6435_v7, inf  ;;  %v2399_v34 = vand.u32 2147483648, %v6435_v7 }
 0x2ae   :  { %3007 = vst [vmem:[#allocation5 + $0x3] sm:$0x1] %v3006_v56  ;;  %v2789_v15 = vadd.f32 %v2788_v5, %v6435_v7  ;;  %v2857_v24 = vadd.f32 %v2856_v8, %v2386_v53  ;;  %v2932_v21 = vadd.f32 %v2931_v36, %v2930_v12  ;;  %vm2398_vm14 = vcmp.eq.f32.partialorder %v6435_v7, 0.0 }
 0x2af   :  { %3211 = vst [vmem:[#allocation5 + $0x5] sm:$0x1] %v3210_v52  ;;  %v2397_v49 = vsel %vm2396_vm13, %v6435_v7, %v2395_v31  ;;  %vm2403_vm15 = vcmp.eq.f32.partialorder %v6426_v25, inf  ;;  %v2406_v27 = vand.u32 2147483648, %v6426_v25  ;;  %vm2405_vm0 = vcmp.eq.f32.partialorder %v6426_v25, 0.0 }
 0x2b0   :  { %v2400_v14 = vsel %vm2398_vm14, %v2399_v34, %v2397_v49  ;;  %v2404_v33 = vsel %vm2403_vm15, %v6426_v25, %v2402_v45  ;;  %v2790_v41 = vadd.f32 %v2789_v15, %v6426_v25  ;;  %v2858_v9 = vadd.f32 %v2857_v24, %v2393_v55 }
 0x2b1   :  { %v2933_v51 = vrot.slane %v2932_v21, 2  ;;  %v2407_v13 = vsel %vm2405_vm0, %v2406_v27, %v2404_v33 }
 0x2b2   :  { %v2791_v37 = vrot.slane %v2790_v41, 4  ;;  %v2859_v30 = vadd.f32 %v2858_v9, %v2400_v14 }
 0x2b3   :  { %v2934_v22 = vadd.f32 %v2933_v51, %v2932_v21 }
 0x2b4   :  { %v2792_v32 = vadd.f32 %v2791_v37, %v2790_v41  ;;  %v2860_v44 = vadd.f32 %v2859_v30, %v2407_v13 }
 0x2b5   :  { %v2935_v7 = vrot.slane %v2934_v22, 1 }
 0x2b6   :  { %v2793_v29 = vrot.slane %v2792_v32, 2  ;;  %v2861_v4 = vrot.slane %v2860_v44, 4 }
 0x2b7   :  { %v2936_v6 = vadd.f32 %v2935_v7, %v2934_v22 }
 0x2b8   :  { %v2794_v60 = vadd.f32 %v2793_v29, %v2792_v32  ;;  %v2862_v1 = vadd.f32 %v2861_v4, %v2860_v44 }
 0x2b9   :  { %2937 = vst [vmem:[#allocation5 + $0x2] sm:$0x1] %v2936_v6 }
 0x2ba   :  { %v2795_v16 = vrot.slane %v2794_v60, 1  ;;  %v2863_v39 = vrot.slane %v2862_v1, 2 }
 0x2bc   :  { %v2796_v40 = vadd.f32 %v2795_v16, %v2794_v60  ;;  %v2864_v3 = vadd.f32 %v2863_v39, %v2862_v1 }
 0x2be   :  { %2797 = vst [vmem:[#allocation5] sm:$0x1] %v2796_v40  ;;  %v2865_v25 = vrot.slane %v2864_v3, 1 }
 0x2c0   :  { %v2866_v2 = vadd.f32 %v2865_v25, %v2864_v3 }
 0x2c2   :  { %2867 = vst [vmem:[#allocation5 + $0x1] sm:$0x1] %v2866_v2 }
 0x2c3   :  { %4259 = shalt.err (!%p4256_p12)
}
 0x2c4   :  { %s4260_s17 = scalar_lea.hbm %s6501_s6, 128 }
 0x2c5   :  { %p4261_p13 = scmp.ne.s32.totalorder %s6501_s6, %s4260_s17  ;;  %p4264_p0 = scmp.lt.u32.totalorder %s4260_s17, %s6501_s6 }
 0x2c7   :  { %p4266_p1 = pnand %p4264_p0, %p4261_p13 }
 0x2c9   :  { %4269 = shalt.err (!%p4266_p1)
}
 0x2ca   :  { %3368 = dma.vmem_to_hbm [thread:$0]  %s3366_s13, 128, %s6501_s6, [#allocation6]  }
 0x2cb   :  { %4270 = dma.done.wait [#allocation4], 8192  }
 0x2cc   :  { %4271 = vsyncadd [#allocation4], 4294959104 }
 0x2cd   :  { %4272 = dma.done.wait [#allocation6], 128  }
 0x2ce   :  { %4273 = vsyncadd [#allocation6], 4294967168 }
 0x2cf   :  { %3375 = vsyncpa [#allocation4], 1 }
 0x2d0   :  { %3376 = vsyncpa [#allocation6], 1 }

</bundles_post_ra>
